<compile_context>
chip_gen: v5e
topology: v5e:2x2
jax: 0.10.0
libtpu: 0.0.40
codegen_flags: <defaults>
</compile_context>

<pallas_src>
from functools import partial

import jax
import jax.numpy as jnp
from jax import lax
from jax.experimental import pallas as pl
from jax.experimental.pallas import tpu as pltpu


def _resblock_kernel(x_ref, s1_ref, b1_ref, w14_ref, s2_ref, b2_ref,
                     w2_ref, s3_ref, b3_ref, w3_ref, o_ref, pad_ref,
                     *, has_proj, H, W):
    """Fused pre-activation bottleneck block for a (Bt, H, W, C) batch tile."""
    Bt, _, _, Cin = x_ref.shape
    Cmid = w2_ref.shape[1]
    Cout = w3_ref.shape[1]
    N = Bt * H * W

    # ---- BN1 + ReLU (pre-activation) on a lane-dense 2-D slab ----
    x2d = x_ref[...].astype(jnp.float32).reshape(N, Cin)
    out1 = jnp.maximum(x2d * s1_ref[...] + b1_ref[...], 0.0)          # (N, Cin)

    # ---- conv1 (1x1) fused with the projection shortcut conv4 (1x1) ----
    # Weight layout is [w4 | w1]: res = hc[:, :Cout] and h = hc[:, Cout:]
    # both start on a 128-lane tile boundary (Cout = 128 in the demo).
    hc = jnp.dot(out1, w14_ref[...], preferred_element_type=jnp.float32)
    if has_proj:
        res = hc[:, :Cout]                                            # (N, Cout)
        h = hc[:, Cout:Cout + Cmid]                                   # (N, Cmid)
    else:
        res = x2d                       # identity shortcut (Cin == Cout)
        h = hc
    h = jnp.maximum(h * s2_ref[...] + b2_ref[...], 0.0)

    # ---- conv2 (3x3, pad=1, stride=1) as ONE big-K matmul ----
    # Zero only the 1-pixel halo strips; the interior is fully overwritten
    # below.  Done every step (cheap) so it stays correct when the grid is
    # sharded across TensorCores ("parallel" semantics).
    zrow = jnp.zeros((Bt, 1, W + 2, Cmid), jnp.float32)
    zcol = jnp.zeros((Bt, H + 2, 1, Cmid), jnp.float32)
    pad_ref[:, 0:1, :, :] = zrow
    pad_ref[:, H + 1:H + 2, :, :] = zrow
    pad_ref[:, :, 0:1, :] = zcol
    pad_ref[:, :, W + 1:W + 2, :] = zcol
    pad_ref[:, 1:H + 1, 1:W + 1, :] = h.reshape(Bt, H, W, Cmid)

    # im2col: concatenate the 9 shifted windows along channels (kh-major,
    # kw, channel order — matches w2 reshaped to (9*Cmid, Cmid) in HWIO
    # order) and do a single K = 9*Cmid MXU matmul.
    cols = jnp.concatenate(
        [pad_ref[:, kh:kh + H, kw:kw + W, :]
         for kh in range(3) for kw in range(3)],
        axis=-1)                                                      # (Bt,H,W,9*Cmid)
    h2 = jnp.dot(cols.reshape(N, 9 * Cmid), w2_ref[...],
                 preferred_element_type=jnp.float32)                  # (N, Cmid)

    # ---- BN3 + ReLU + conv3 (1x1) + residual add ----
    h2 = jnp.maximum(h2 * s3_ref[...] + b3_ref[...], 0.0)
    out = jnp.dot(h2, w3_ref[...], preferred_element_type=jnp.float32)  # (N, Cout)
    o_ref[...] = (out + res).reshape(Bt, H, W, Cout).astype(o_ref.dtype)


def _tpu_vmem_capacity():
    """Physical VMEM bytes (falls back to 128 MiB if the query is unavailable)."""
    try:
        return int(pltpu.get_tpu_info().vmem_capacity_bytes)
    except Exception:
        return 128 << 20


def _pick_block_batch(B, per_image_bytes, vmem_cap):
    """Batch tile: ~3 resident blocks + weights within a VMEM fraction, and
    >= min(B, 4) grid steps so both v7x TensorCores get pipelined steps."""
    budget = max(vmem_cap // 6, 4 << 20)
    cap = max(1, budget // max(per_image_bytes, 1))
    min_steps = min(B, 4)
    bt = max(1, min(cap, B // min_steps))
    while B % bt:
        bt -= 1
    return max(bt, 1)


def residual_block(x_nhwc, s1, b1, w1, s2, b2, w2, s3, b3, w3, w4=None,
                   stride=1, block_batch=None):
    """Fused bottleneck block; NHWC in, NHWC out (no layout round trips)."""
    assert stride == 1, "Pallas path only implements stride=1"
    B, H, W, Cin = x_nhwc.shape
    Cmid = w1.shape[1]
    Cout = w3.shape[1]
    has_proj = w4 is not None
    assert has_proj or Cin == Cout

    # Fuse conv4 + conv1 weights ([w4 | w1] keeps both result slices
    # tile-aligned); reshape the HWIO 3x3 weight for the im2col matmul.
    w14 = jnp.concatenate([w4, w1], axis=1) if has_proj else w1
    w14_cols = w14.shape[1]
    w2col = w2.reshape(9 * Cmid, Cmid)

    vmem_cap = _tpu_vmem_capacity()
    # Per-image VMEM footprint: x block + out block + padded scratch +
    # im2col / fused-conv1 temporaries (all f32).
    per_image_bytes = 4 * (H * W * (Cin + Cout)
                           + (H + 2) * (W + 2) * Cmid
                           + H * W * (9 * Cmid)
                           + H * W * (Cout + 2 * Cmid))
    Bt = block_batch if block_batch is not None else _pick_block_batch(
        B, per_image_bytes, vmem_cap)
    assert B % Bt == 0
    grid = (B // Bt,)

    in_specs = [
        pl.BlockSpec((Bt, H, W, Cin), lambda b: (b, 0, 0, 0)),
        pl.BlockSpec((1, Cin), lambda b: (0, 0)),
        pl.BlockSpec((1, Cin), lambda b: (0, 0)),
        pl.BlockSpec((Cin, w14_cols), lambda b: (0, 0)),
        pl.BlockSpec((1, Cmid), lambda b: (0, 0)),
        pl.BlockSpec((1, Cmid), lambda b: (0, 0)),
        pl.BlockSpec((9 * Cmid, Cmid), lambda b: (0, 0)),
        pl.BlockSpec((1, Cmid), lambda b: (0, 0)),
        pl.BlockSpec((1, Cmid), lambda b: (0, 0)),
        pl.BlockSpec((Cmid, Cout), lambda b: (0, 0)),
    ]
    args = [x_nhwc, s1, b1, w14, s2, b2, w2col, s3, b3, w3]

    weight_elems = (Cin * w14_cols + 9 * Cmid * Cmid + Cmid * Cout
                    + 2 * (Cin + 2 * Cmid))
    flops = 2 * B * H * W * (Cin * w14_cols + 9 * Cmid * Cmid + Cmid * Cout)
    bytes_accessed = 4 * (B * H * W * (Cin + Cout) + weight_elems)
    cost = pl.CostEstimate(flops=flops, transcendentals=0,
                           bytes_accessed=bytes_accessed)

    # Generation-aware VMEM limit: big blocks allowed on 128 MiB chips, but
    # always leave ~25% headroom for Mosaic internals (v7x physical = 64 MiB).
    block_bytes = Bt * per_image_bytes
    vmem_limit = int(min(int(0.75 * vmem_cap),
                         max(32 << 20, 4 * block_bytes + 16 * weight_elems)))

    return pl.pallas_call(
        partial(_resblock_kernel, has_proj=has_proj, H=H, W=W),
        out_shape=jax.ShapeDtypeStruct((B, H, W, Cout), x_nhwc.dtype),
        grid_spec=pltpu.PrefetchScalarGridSpec(
            num_scalar_prefetch=0,
            grid=grid,
            in_specs=in_specs,
            out_specs=pl.BlockSpec((Bt, H, W, Cout), lambda b: (b, 0, 0, 0)),
            scratch_shapes=[pltpu.VMEM((Bt, H + 2, W + 2, Cmid), jnp.float32)],
        ),
        compiler_params=pltpu.CompilerParams(
            dimension_semantics=("parallel",),
            vmem_limit_bytes=vmem_limit),
        cost_estimate=cost,
    )(*args)


def residual_block_ref(x_nhwc, s1, b1, w1, s2, b2, w2, s3, b3, w3, w4=None):
    """Pure-JAX NHWC reference matching the PyTorch forward (eval-mode BN)."""
    out1 = jnp.maximum(x_nhwc * s1[0] + b1[0], 0.0)
    h = jnp.einsum('bhwc,cd->bhwd', out1, w1)
    h = jnp.maximum(h * s2[0] + b2[0], 0.0)
    h = lax.conv_general_dilated(h, w2, window_strides=(1, 1), padding='SAME',
                                 dimension_numbers=('NHWC', 'HWIO', 'NHWC'))
    h = jnp.maximum(h * s3[0] + b3[0], 0.0)
    out = jnp.einsum('bhwc,cd->bhwd', h, w3)
    res = jnp.einsum('bhwc,cd->bhwd', out1, w4) if w4 is not None else x_nhwc
    return out + res


def _bn_affine(kg, kb, km, kv, C, eps=1e-5):
    """Fold BatchNorm (eval mode) into a per-channel (scale, bias) pair."""
    gamma = 1.0 + 0.1 * jax.random.normal(kg, (C,), jnp.float32)
    beta = 0.1 * jax.random.normal(kb, (C,), jnp.float32)
    mean = 0.1 * jax.random.normal(km, (C,), jnp.float32)
    var = 0.5 + jax.random.uniform(kv, (C,), jnp.float32)
    scale = gamma * lax.rsqrt(var + eps)
    bias = beta - mean * scale
    return scale.reshape(1, C), bias.reshape(1, C)


if __name__ == "__main__":
    key = jax.random.PRNGKey(0)
    ks = jax.random.split(key, 17)

    # ResidualBlock(input_channels=64, output_channels=128, stride=1),
    # channel-last (NHWC) end-to-end.
    B, Cin, Cout, H, W = 4, 64, 128, 16, 16
    Cmid = Cout // 4  # bottleneck width

    x = jax.random.normal(ks[0], (B, H, W, Cin), jnp.float32)

    s1, b1 = _bn_affine(ks[1], ks[2], ks[3], ks[4], Cin)
    s2, b2 = _bn_affine(ks[5], ks[6], ks[7], ks[8], Cmid)
    s3, b3 = _bn_affine(ks[9], ks[10], ks[11], ks[12], Cmid)

    # Conv weights stored so the kernel computes plain matmuls:
    #   conv1: (Cin, Cmid) = torch weight[:, :, 0, 0].T
    #   conv2: (3, 3, Cmid, Cmid) = torch weight.transpose(2, 3, 1, 0)  (HWIO)
    #   conv3: (Cmid, Cout), conv4: (Cin, Cout)
    w1 = jax.random.normal(ks[13], (Cin, Cmid), jnp.float32) / jnp.sqrt(Cin)
    w2 = jax.random.normal(ks[14], (3, 3, Cmid, Cmid), jnp.float32) / jnp.sqrt(9 * Cmid)
    w3 = jax.random.normal(ks[15], (Cmid, Cout), jnp.float32) / jnp.sqrt(Cmid)
    w4 = jax.random.normal(ks[16], (Cin, Cout), jnp.float32) / jnp.sqrt(Cin)

    out = jax.block_until_ready(
        residual_block(x, s1, b1, w1, s2, b2, w2, s3, b3, w3, w4))
    ref = residual_block_ref(x, s1, b1, w1, s2, b2, w2, s3, b3, w3, w4)

    assert out.shape == (B, H, W, Cout)
    assert jnp.allclose(out, ref, atol=1e-3, rtol=1e-3), "mismatch vs reference"
    print("KERNEL_OK")
</pallas_src>

<mosaic_0001>
module attributes {stable_mosaic.version = 11 : i64} {
  func.func @_resblock_kernel(%arg0: i32, %arg1: memref<1x16x16x64xf32, #tpu.memory_space<vmem>>, %arg2: memref<1x64xf32, #tpu.memory_space<vmem>>, %arg3: memref<1x64xf32, #tpu.memory_space<vmem>>, %arg4: memref<64x160xf32, #tpu.memory_space<vmem>>, %arg5: memref<1x32xf32, #tpu.memory_space<vmem>>, %arg6: memref<1x32xf32, #tpu.memory_space<vmem>>, %arg7: memref<288x32xf32, #tpu.memory_space<vmem>>, %arg8: memref<1x32xf32, #tpu.memory_space<vmem>>, %arg9: memref<1x32xf32, #tpu.memory_space<vmem>>, %arg10: memref<32x128xf32, #tpu.memory_space<vmem>>, %arg11: memref<1x16x16x128xf32, #tpu.memory_space<vmem>>, %arg12: memref<1x18x18x32xf32, #tpu.memory_space<vmem>>) attributes {dimension_semantics = [#tpu.dimension_semantics<parallel>], iteration_bounds = array<i64: 4>, scalar_prefetch = 0 : i64, scratch_operands = 1 : i64, tpu.core_type = #tpu.core_type<tc>, window_params = [{transform_indices = @transform_0, window_bounds = array<i64: 1, 16, 16, 64>}, {pipeline_mode = #tpu.pipeline_mode<synchronous>, transform_indices = @transform_1, window_bounds = array<i64: 1, 64>}, {pipeline_mode = #tpu.pipeline_mode<synchronous>, transform_indices = @transform_2, window_bounds = array<i64: 1, 64>}, {pipeline_mode = #tpu.pipeline_mode<synchronous>, transform_indices = @transform_3, window_bounds = array<i64: 64, 160>}, {pipeline_mode = #tpu.pipeline_mode<synchronous>, transform_indices = @transform_4, window_bounds = array<i64: 1, 32>}, {pipeline_mode = #tpu.pipeline_mode<synchronous>, transform_indices = @transform_5, window_bounds = array<i64: 1, 32>}, {pipeline_mode = #tpu.pipeline_mode<synchronous>, transform_indices = @transform_6, window_bounds = array<i64: 288, 32>}, {pipeline_mode = #tpu.pipeline_mode<synchronous>, transform_indices = @transform_7, window_bounds = array<i64: 1, 32>}, {pipeline_mode = #tpu.pipeline_mode<synchronous>, transform_indices = @transform_8, window_bounds = array<i64: 1, 32>}, {pipeline_mode = #tpu.pipeline_mode<synchronous>, transform_indices = @transform_9, window_bounds = array<i64: 32, 128>}, {transform_indices = @transform_10, window_bounds = array<i64: 1, 16, 16, 128>}]} {
    %c0 = arith.constant 0 : index
    %c0_0 = arith.constant 0 : index
    %c0_1 = arith.constant 0 : index
    %c0_2 = arith.constant 0 : index
    %0 = vector.load %arg1[%c0, %c0_0, %c0_1, %c0_2] : memref<1x16x16x64xf32, #tpu.memory_space<vmem>>, vector<1x16x16x64xf32>
    %1 = vector.shape_cast %0 : vector<1x16x16x64xf32> to vector<256x64xf32>
    %c0_3 = arith.constant 0 : index
    %c0_4 = arith.constant 0 : index
    %2 = vector.load %arg2[%c0_3, %c0_4] : memref<1x64xf32, #tpu.memory_space<vmem>>, vector<1x64xf32>
    %3 = vector.broadcast %2 : vector<1x64xf32> to vector<256x64xf32>
    %4 = arith.mulf %1, %3 : vector<256x64xf32>
    %c0_5 = arith.constant 0 : index
    %c0_6 = arith.constant 0 : index
    %5 = vector.load %arg3[%c0_5, %c0_6] : memref<1x64xf32, #tpu.memory_space<vmem>>, vector<1x64xf32>
    %6 = vector.broadcast %5 : vector<1x64xf32> to vector<256x64xf32>
    %7 = arith.addf %4, %6 : vector<256x64xf32>
    %cst = arith.constant 0.000000e+00 : f32
    %8 = vector.broadcast %cst : f32 to vector<256x64xf32>
    %9 = arith.maximumf %7, %8 : vector<256x64xf32>
    %c0_7 = arith.constant 0 : index
    %c0_8 = arith.constant 0 : index
    %10 = vector.load %arg4[%c0_7, %c0_8] : memref<64x160xf32, #tpu.memory_space<vmem>>, vector<64x160xf32>
    %cst_9 = arith.constant dense<0.000000e+00> : vector<256x160xf32>
    %11 = tpu.matmul %9, %10, %cst_9 {dimension_numbers = #tpu.dot_dimension_numbers<[1], [0], [0], [1], [0, 0, 1, 1], [], []>} : vector<256x64xf32>, vector<64x160xf32>, vector<256x160xf32> -> vector<256x160xf32>
    %12 = vector.extract_strided_slice %11 {offsets = [0, 0], sizes = [256, 128], strides = [1, 1]} : vector<256x160xf32> to vector<256x128xf32>
    %13 = vector.extract_strided_slice %11 {offsets = [0, 128], sizes = [256, 32], strides = [1, 1]} : vector<256x160xf32> to vector<256x32xf32>
    %c0_10 = arith.constant 0 : index
    %c0_11 = arith.constant 0 : index
    %14 = vector.load %arg5[%c0_10, %c0_11] : memref<1x32xf32, #tpu.memory_space<vmem>>, vector<1x32xf32>
    %15 = vector.broadcast %14 : vector<1x32xf32> to vector<256x32xf32>
    %16 = arith.mulf %13, %15 : vector<256x32xf32>
    %c0_12 = arith.constant 0 : index
    %c0_13 = arith.constant 0 : index
    %17 = vector.load %arg6[%c0_12, %c0_13] : memref<1x32xf32, #tpu.memory_space<vmem>>, vector<1x32xf32>
    %18 = vector.broadcast %17 : vector<1x32xf32> to vector<256x32xf32>
    %19 = arith.addf %16, %18 : vector<256x32xf32>
    %cst_14 = arith.constant 0.000000e+00 : f32
    %20 = vector.broadcast %cst_14 : f32 to vector<256x32xf32>
    %21 = arith.maximumf %19, %20 : vector<256x32xf32>
    %cst_15 = arith.constant 0.000000e+00 : f32
    %22 = vector.broadcast %cst_15 : f32 to vector<1x1x18x32xf32>
    %cst_16 = arith.constant 0.000000e+00 : f32
    %23 = vector.broadcast %cst_16 : f32 to vector<1x18x1x32xf32>
    %c0_17 = arith.constant 0 : index
    %c0_18 = arith.constant 0 : index
    %c0_19 = arith.constant 0 : index
    %c0_20 = arith.constant 0 : index
    %24 = vector.load %arg12[%c0_17, %c0_18, %c0_19, %c0_20] : memref<1x18x18x32xf32, #tpu.memory_space<vmem>>, vector<1x1x18x32xf32>
    tpu.vector_store %arg12[%c0_17, %c0_18, %c0_19, %c0_20], %22 {strides = array<i32>} : memref<1x18x18x32xf32, #tpu.memory_space<vmem>>, vector<1x1x18x32xf32>,
    %c0_21 = arith.constant 0 : index
    %c17 = arith.constant 17 : index
    %c0_22 = arith.constant 0 : index
    %c0_23 = arith.constant 0 : index
    %25 = vector.load %arg12[%c0_21, %c17, %c0_22, %c0_23] : memref<1x18x18x32xf32, #tpu.memory_space<vmem>>, vector<1x1x18x32xf32>
    tpu.vector_store %arg12[%c0_21, %c17, %c0_22, %c0_23], %22 {strides = array<i32>} : memref<1x18x18x32xf32, #tpu.memory_space<vmem>>, vector<1x1x18x32xf32>,
    %c0_24 = arith.constant 0 : index
    %c0_25 = arith.constant 0 : index
    %c0_26 = arith.constant 0 : index
    %c0_27 = arith.constant 0 : index
    %26 = vector.load %arg12[%c0_24, %c0_25, %c0_26, %c0_27] : memref<1x18x18x32xf32, #tpu.memory_space<vmem>>, vector<1x18x1x32xf32>
    tpu.vector_store %arg12[%c0_24, %c0_25, %c0_26, %c0_27], %23 {strides = array<i32>} : memref<1x18x18x32xf32, #tpu.memory_space<vmem>>, vector<1x18x1x32xf32>,
    %c0_28 = arith.constant 0 : index
    %c0_29 = arith.constant 0 : index
    %c17_30 = arith.constant 17 : index
    %c0_31 = arith.constant 0 : index
    %27 = vector.load %arg12[%c0_28, %c0_29, %c17_30, %c0_31] : memref<1x18x18x32xf32, #tpu.memory_space<vmem>>, vector<1x18x1x32xf32>
    tpu.vector_store %arg12[%c0_28, %c0_29, %c17_30, %c0_31], %23 {strides = array<i32>} : memref<1x18x18x32xf32, #tpu.memory_space<vmem>>, vector<1x18x1x32xf32>,
    %28 = vector.shape_cast %21 : vector<256x32xf32> to vector<1x16x16x32xf32>
    %c0_32 = arith.constant 0 : index
    %c1 = arith.constant 1 : index
    %c1_33 = arith.constant 1 : index
    %c0_34 = arith.constant 0 : index
    %29 = vector.load %arg12[%c0_32, %c1, %c1_33, %c0_34] : memref<1x18x18x32xf32, #tpu.memory_space<vmem>>, vector<1x16x16x32xf32>
    tpu.vector_store %arg12[%c0_32, %c1, %c1_33, %c0_34], %28 {strides = array<i32>} : memref<1x18x18x32xf32, #tpu.memory_space<vmem>>, vector<1x16x16x32xf32>,
    %c0_35 = arith.constant 0 : index
    %c0_36 = arith.constant 0 : index
    %c0_37 = arith.constant 0 : index
    %c0_38 = arith.constant 0 : index
    %30 = vector.load %arg12[%c0_35, %c0_36, %c0_37, %c0_38] : memref<1x18x18x32xf32, #tpu.memory_space<vmem>>, vector<1x16x16x32xf32>
    %c0_39 = arith.constant 0 : index
    %c0_40 = arith.constant 0 : index
    %c1_41 = arith.constant 1 : index
    %c0_42 = arith.constant 0 : index
    %31 = vector.load %arg12[%c0_39, %c0_40, %c1_41, %c0_42] : memref<1x18x18x32xf32, #tpu.memory_space<vmem>>, vector<1x16x16x32xf32>
    %c0_43 = arith.constant 0 : index
    %c0_44 = arith.constant 0 : index
    %c2 = arith.constant 2 : index
    %c0_45 = arith.constant 0 : index
    %32 = vector.load %arg12[%c0_43, %c0_44, %c2, %c0_45] : memref<1x18x18x32xf32, #tpu.memory_space<vmem>>, vector<1x16x16x32xf32>
    %c0_46 = arith.constant 0 : index
    %c1_47 = arith.constant 1 : index
    %c0_48 = arith.constant 0 : index
    %c0_49 = arith.constant 0 : index
    %33 = vector.load %arg12[%c0_46, %c1_47, %c0_48, %c0_49] : memref<1x18x18x32xf32, #tpu.memory_space<vmem>>, vector<1x16x16x32xf32>
    %c0_50 = arith.constant 0 : index
    %c1_51 = arith.constant 1 : index
    %c1_52 = arith.constant 1 : index
    %c0_53 = arith.constant 0 : index
    %34 = vector.load %arg12[%c0_50, %c1_51, %c1_52, %c0_53] : memref<1x18x18x32xf32, #tpu.memory_space<vmem>>, vector<1x16x16x32xf32>
    %c0_54 = arith.constant 0 : index
    %c1_55 = arith.constant 1 : index
    %c2_56 = arith.constant 2 : index
    %c0_57 = arith.constant 0 : index
    %35 = vector.load %arg12[%c0_54, %c1_55, %c2_56, %c0_57] : memref<1x18x18x32xf32, #tpu.memory_space<vmem>>, vector<1x16x16x32xf32>
    %c0_58 = arith.constant 0 : index
    %c2_59 = arith.constant 2 : index
    %c0_60 = arith.constant 0 : index
    %c0_61 = arith.constant 0 : index
    %36 = vector.load %arg12[%c0_58, %c2_59, %c0_60, %c0_61] : memref<1x18x18x32xf32, #tpu.memory_space<vmem>>, vector<1x16x16x32xf32>
    %c0_62 = arith.constant 0 : index
    %c2_63 = arith.constant 2 : index
    %c1_64 = arith.constant 1 : index
    %c0_65 = arith.constant 0 : index
    %37 = vector.load %arg12[%c0_62, %c2_63, %c1_64, %c0_65] : memref<1x18x18x32xf32, #tpu.memory_space<vmem>>, vector<1x16x16x32xf32>
    %c0_66 = arith.constant 0 : index
    %c2_67 = arith.constant 2 : index
    %c2_68 = arith.constant 2 : index
    %c0_69 = arith.constant 0 : index
    %38 = vector.load %arg12[%c0_66, %c2_67, %c2_68, %c0_69] : memref<1x18x18x32xf32, #tpu.memory_space<vmem>>, vector<1x16x16x32xf32>
    %39 = tpu.concatenate %30, %31, %32, %33, %34, %35, %36, %37, %38 in 3 : vector<1x16x16x32xf32>, vector<1x16x16x32xf32>, vector<1x16x16x32xf32>, vector<1x16x16x32xf32>, vector<1x16x16x32xf32>, vector<1x16x16x32xf32>, vector<1x16x16x32xf32>, vector<1x16x16x32xf32>, vector<1x16x16x32xf32> -> vector<1x16x16x288xf32>
    %40 = vector.shape_cast %39 : vector<1x16x16x288xf32> to vector<256x288xf32>
    %c0_70 = arith.constant 0 : index
    %c0_71 = arith.constant 0 : index
    %41 = vector.load %arg7[%c0_70, %c0_71] : memref<288x32xf32, #tpu.memory_space<vmem>>, vector<288x32xf32>
    %cst_72 = arith.constant dense<0.000000e+00> : vector<256x32xf32>
    %42 = tpu.matmul %40, %41, %cst_72 {dimension_numbers = #tpu.dot_dimension_numbers<[1], [0], [0], [1], [0, 0, 1, 1], [], []>} : vector<256x288xf32>, vector<288x32xf32>, vector<256x32xf32> -> vector<256x32xf32>
    %c0_73 = arith.constant 0 : index
    %c0_74 = arith.constant 0 : index
    %43 = vector.load %arg8[%c0_73, %c0_74] : memref<1x32xf32, #tpu.memory_space<vmem>>, vector<1x32xf32>
    %44 = vector.broadcast %43 : vector<1x32xf32> to vector<256x32xf32>
    %45 = arith.mulf %42, %44 : vector<256x32xf32>
    %c0_75 = arith.constant 0 : index
    %c0_76 = arith.constant 0 : index
    %46 = vector.load %arg9[%c0_75, %c0_76] : memref<1x32xf32, #tpu.memory_space<vmem>>, vector<1x32xf32>
    %47 = vector.broadcast %46 : vector<1x32xf32> to vector<256x32xf32>
    %48 = arith.addf %45, %47 : vector<256x32xf32>
    %cst_77 = arith.constant 0.000000e+00 : f32
    %49 = vector.broadcast %cst_77 : f32 to vector<256x32xf32>
    %50 = arith.maximumf %48, %49 : vector<256x32xf32>
    %c0_78 = arith.constant 0 : index
    %c0_79 = arith.constant 0 : index
    %51 = vector.load %arg10[%c0_78, %c0_79] : memref<32x128xf32, #tpu.memory_space<vmem>>, vector<32x128xf32>
    %cst_80 = arith.constant dense<0.000000e+00> : vector<256x128xf32>
    %52 = tpu.matmul %50, %51, %cst_80 {dimension_numbers = #tpu.dot_dimension_numbers<[1], [0], [0], [1], [0, 0, 1, 1], [], []>} : vector<256x32xf32>, vector<32x128xf32>, vector<256x128xf32> -> vector<256x128xf32>
    %53 = arith.addf %52, %12 : vector<256x128xf32>
    %54 = vector.shape_cast %53 : vector<256x128xf32> to vector<1x16x16x128xf32>
    %c0_81 = arith.constant 0 : index
    %c0_82 = arith.constant 0 : index
    %c0_83 = arith.constant 0 : index
    %c0_84 = arith.constant 0 : index
    %55 = vector.load %arg11[%c0_81, %c0_82, %c0_83, %c0_84] : memref<1x16x16x128xf32, #tpu.memory_space<vmem>>, vector<1x16x16x128xf32>
    tpu.vector_store %arg11[%c0_81, %c0_82, %c0_83, %c0_84], %54 {strides = array<i32>} : memref<1x16x16x128xf32, #tpu.memory_space<vmem>>, vector<1x16x16x128xf32>,
    return
  }
  func.func @transform_0(%arg0: i32) -> (i32, i32, i32, i32) {
    %c0_i32 = arith.constant 0 : i32
    %c0_i32_0 = arith.constant 0 : i32
    %c0_i32_1 = arith.constant 0 : i32
    %c0_i32_2 = arith.constant 0 : i32
    return %arg0, %c0_i32, %c0_i32_0, %c0_i32_1 : i32, i32, i32, i32
  }
  func.func @transform_1(%arg0: i32) -> (i32, i32) {
    %c0_i32 = arith.constant 0 : i32
    %c0_i32_0 = arith.constant 0 : i32
    %c0_i32_1 = arith.constant 0 : i32
    return %c0_i32, %c0_i32_0 : i32, i32
  }
  func.func @transform_2(%arg0: i32) -> (i32, i32) {
    %c0_i32 = arith.constant 0 : i32
    %c0_i32_0 = arith.constant 0 : i32
    %c0_i32_1 = arith.constant 0 : i32
    return %c0_i32, %c0_i32_0 : i32, i32
  }
  func.func @transform_3(%arg0: i32) -> (i32, i32) {
    %c0_i32 = arith.constant 0 : i32
    %c0_i32_0 = arith.constant 0 : i32
    %c0_i32_1 = arith.constant 0 : i32
    return %c0_i32, %c0_i32_0 : i32, i32
  }
  func.func @transform_4(%arg0: i32) -> (i32, i32) {
    %c0_i32 = arith.constant 0 : i32
    %c0_i32_0 = arith.constant 0 : i32
    %c0_i32_1 = arith.constant 0 : i32
    return %c0_i32, %c0_i32_0 : i32, i32
  }
  func.func @transform_5(%arg0: i32) -> (i32, i32) {
    %c0_i32 = arith.constant 0 : i32
    %c0_i32_0 = arith.constant 0 : i32
    %c0_i32_1 = arith.constant 0 : i32
    return %c0_i32, %c0_i32_0 : i32, i32
  }
  func.func @transform_6(%arg0: i32) -> (i32, i32) {
    %c0_i32 = arith.constant 0 : i32
    %c0_i32_0 = arith.constant 0 : i32
    %c0_i32_1 = arith.constant 0 : i32
    return %c0_i32, %c0_i32_0 : i32, i32
  }
  func.func @transform_7(%arg0: i32) -> (i32, i32) {
    %c0_i32 = arith.constant 0 : i32
    %c0_i32_0 = arith.constant 0 : i32
    %c0_i32_1 = arith.constant 0 : i32
    return %c0_i32, %c0_i32_0 : i32, i32
  }
  func.func @transform_8(%arg0: i32) -> (i32, i32) {
    %c0_i32 = arith.constant 0 : i32
    %c0_i32_0 = arith.constant 0 : i32
    %c0_i32_1 = arith.constant 0 : i32
    return %c0_i32, %c0_i32_0 : i32, i32
  }
  func.func @transform_9(%arg0: i32) -> (i32, i32) {
    %c0_i32 = arith.constant 0 : i32
    %c0_i32_0 = arith.constant 0 : i32
    %c0_i32_1 = arith.constant 0 : i32
    return %c0_i32, %c0_i32_0 : i32, i32
  }
  func.func @transform_10(%arg0: i32) -> (i32, i32, i32, i32) {
    %c0_i32 = arith.constant 0 : i32
    %c0_i32_0 = arith.constant 0 : i32
    %c0_i32_1 = arith.constant 0 : i32
    %c0_i32_2 = arith.constant 0 : i32
    return %arg0, %c0_i32, %c0_i32_0, %c0_i32_1 : i32, i32, i32, i32
  }
}

</mosaic_0001>

<bundles_post_ra>
// kernel: tpu_custom_call.1
= control target key start
LH: loop header
LB: loop body
LE: loop exit
PB: predicated region body
PF: predicated region fallthrough
CT: control target
= control target key end

     0   :  { %15 = vsyncpa [#allocation4], 0  ;;  %s5876_s0 = inlined_call_operand.hbm [shape: f32[4,16,16,64], index: 0, kind: input, shape index: {}]   ;;  %s5877_s1 = inlined_call_operand.vmem [shape: f32[1,64], index: 1, kind: input, shape index: {}]   ;;  %s5878_s2 = inlined_call_operand.vmem [shape: f32[1,64], index: 2, kind: input, shape index: {}]   ;;  %s5879_s3 = inlined_call_operand.vmem [shape: f32[64,160], index: 3, kind: input, shape index: {}]   ;;  %s5880_s4 = inlined_call_operand.vmem [shape: f32[1,32], index: 4, kind: input, shape index: {}]   ;;  %s5881_s5 = inlined_call_operand.vmem [shape: f32[1,32], index: 5, kind: input, shape index: {}]   ;;  %s5882_s6 = inlined_call_operand.vmem [shape: f32[288,32], index: 6, kind: input, shape index: {}]   ;;  %s5883_s7 = inlined_call_operand.vmem [shape: f32[1,32], index: 7, kind: input, shape index: {}]   ;;  %s5884_s8 = inlined_call_operand.vmem [shape: f32[1,32], index: 8, kind: input, shape index: {}]   ;;  %s5885_s9 = inlined_call_operand.vmem [shape: f32[32,128], index: 9, kind: input, shape index: {}]   ;;  %s5886_s10 = inlined_call_operand.hbm [shape: f32[4,16,16,128], index: 10, kind: output, shape index: {}]  }
   0x1   :  { %17 = vsyncpa [#allocation4 + $0x1], 0 }
   0x2   :  { %18 = vsyncpa [#allocation5], 0 }
   0x3   :  { %20 = vsyncpa [#allocation5 + $0x1], 0  ;;  %s4056_s13 = smov 0   ;;  %s4058_s14 = smov 0  }
   0x4   :  { %s4060_s15 = smov 0   ;;  %s4062_s16 = smov 0  }
   0x5 LB: > { %5891 = sst [smem:[#allocation9_spill]] %s3987_s15  ;;  %s4077_s17 = sadd.s32 4294967295, %s3991_s16   ;;  %s3991_s16 = sphi %s4062_s16, %s5909_s16   ;;  %s3987_s15 = sphi %s4060_s15, %s5911_s15   ;;  %s3983_s14 = sphi %s4058_s14, %s5913_s14   ;;  %s3979_s13 = sphi %s4056_s13, %s5912_s13  }
   0x6   : > { %s3197_s18 = sadd.s32 4294967294, %s3991_s16   ;;  %s4081_s19 = sadd.s32 1, %s3991_s16  }
   0x7   : > { %5892 = sst [smem:[#allocation10_spill]] %s4081_s19  ;;  %s33_s20 = sadd.s32 1, %s3987_s15 }
   0x8   : > { %s30_s21 = ssub.s32 %s3991_s16, %s4081_s19  ;;  %p40_p0 = scmp.ne.s32.totalorder %s3987_s15, %s3983_s14 }
   0x9   : > { %p31_p1 = scmp.eq.s32.totalorder %s30_s21, 0  ;;  %p41_p2 = scmp.eq.s32.totalorder %s3991_s16, 0 }
   0xa   : > { %p46_p3 = scmp.ne.s32.totalorder %s3983_s14, %s3979_s13  ;;  %p47_p4 = scmp.eq.s32.totalorder %s4077_s17, 0 }
   0xb   : > { %s4093_s22 = scalar_select %p31_p1, %s3987_s15, %s33_s20  }
   0xc   : > { %p4095_p5 = por %p41_p2, %p40_p0  ;;  %p4099_p6 = por %p47_p4, %p46_p3 }
   0xd   : > { %5893 = sst [smem:[#allocation11_spill]] %s4093_s22  ;;  %p259_p7 = scmp.eq.s32.totalorder %s4077_s17, 3 }
   0xe   : > { %p265_p8 = scmp.eq.s32.totalorder %s3197_s18, 3  ;;  %p3373_p9 = scmp.lt.s32.totalorder %s3991_s16, 4 }
   0xf   : > { %p4105_p10 = por %p259_p7, %p40_p0  ;;  %s312_s27 = sand.u32 1, %s3987_s15  }
  0x10   : > { %p4109_p11 = por %p265_p8, %p46_p3  ;;  %s3339_s28 = sshll.u32 %s3991_s16, 8 }
  0x11   : > { %s3200_s29 = sshll.u32 %s312_s27, 8  ;;  %s321_s12 = scalar_lea.hbm %s5876_s0, %s3339_s28 }
  0x12   : > { %s5897_s26 = scalar_select %p4109_p11, 1, 0 }
  0x13   : > { %s322_s20 = sshll.u32 %s321_s12, 4  ;;  %s316_s21 = scalar_lea.vmem [#allocation3], %s3200_s29  ;;  %s323_s20 = int_to_ptr.hbm [resolvable:$true] %s322_s20 }
  0x14   : > { %5898 = sst [smem:[#allocation12_spill]] %s5897_s26  ;;  %s324_s22 = sshll.u32 %s316_s21, 4  ;;  %s325_s22 = int_to_ptr.vmem [resolvable:$true] %s324_s22 }
  0x15   : > { %p4120_p12 = pnand %p3373_p9, %p4095_p5  ;;  %p3203_p13 = scmp.ge.s32.totalorder %s3991_s16, 1 }
  0x16   : > { %p332_p0 = scmp.lt.s32.totalorder %s3991_s16, 5  ;;  %s313_s15 = scalar_lea.sflag [#allocation4], %s312_s27 }
  0x17   : > { %s3895_s19 = sshra.s32 %s323_s20, 4  ;;  %p3899_p2 = pneg %p4120_p12  ;;  %s3896_s19 = int_to_ptr.hbm [resolvable:$true] %s3895_s19 }
  0x18   : > { %s3897_s26 = scalar_lea.hbm %s3896_s19, 256  ;;  %s3902_s23 = scalar_lea.hbm %s5876_s0, 1024 }
  0x19   : > { %p3898_p1 = scmp.ne.s32.totalorder %s3896_s19, %s3897_s26  ;;  %p3903_p5 = scmp.lt.s32.totalorder %s3896_s19, %s5876_s0 }
  0x1a   : > { %p3904_p7 = scmp.lt.s32.totalorder %s3902_s23, %s3897_s26 }
  0x1b   : > { %p3900_p3 = pnand %p3899_p2, %p3898_p1 }
  0x1c   : > { %p3905_p8 = por %p3904_p7, %p3903_p5 }
  0x1d   : > { %p3901_p4 = pneg %p3900_p3 }
  0x1f   : > { %p3906_p9 = pnand %p3905_p8, %p3901_p4 }
  0x21   : > { %3909 = shalt.err (!%p3906_p9)
}
  0x22   : > { %s3993_s27 = smov 128   ;;  %s3994_s12 = smov 8  }
  0x23   : > { %3368 = dma.hbm_to_vmem [thread:$0]  (!%p4120_p12), %s323_s20, 4096, %s325_s22, %s313_s15, %s3993_s27, %s3993_s27, %s3994_s12  }
  0x24   : > { %p333_p1 = pnand %p3203_p13, %p332_p0 }
  0x26   : > { %336 = sbr.rel (%p333_p1) target bundleno = 875 (0x36b), region = 60 }
  0x2b   : > { %s4141_s21 = sand.u32 1, %s3983_s14  }
  0x2c   : > { %s3204_s19 = sshll.u32 %s4141_s21, 8  ;;  %s339_s26 = scalar_lea.sflag [#allocation4], %s4141_s21 }
  0x2d   : > { %s4147_s28 = scalar_lea.vmem [#allocation3], %s3204_s19 }
  0x2e   : > { %3970 = dma.done.wait (%p4099_p6), %s339_s26, 4096  }
  0x2f   : > { %3972 = vsyncadd (%p4099_p6), %s339_s26, 4294963200  ;;  %v531_v0 = vld [vmem:[%s5879_s3 + $0x78] sm:$0xff]  ;;  %v529_v1 = vld [vmem:[%s5879_s3 + $0x68] sm:$0xff]  ;;  %vm532_vm0 = vcmask 523264   ;;  %vm959_vm1 = vcmask 261120   ;;  %vm962_vm2 = vcmask 254976  }
  0x30   : > { %750 = vmatpush.msra.mxu1 %v531_v0  ;;  %3349 = vmatpush.msra.mxu3 %v531_v0  ;;  %v527_v2 = vld [vmem:[%s5879_s3 + $0x58] sm:$0xff]  ;;  %v380_v3 = vld [vmem:[%s4147_s28] sm:$0xff]  ;;  %v4166_v4 = vld [vmem:[%s5877_s1] ss:$0 sm:$0xff]  ;;  %vm968_vm3 = vcmask 253952   ;;  %s3996_s15 = smov 32  }
  0x31   : > { %v525_v5 = vld [vmem:[%s5879_s3 + $0x48] sm:$0xff]  ;;  %v4174_v6 = vld [vmem:[%s5878_s2] ss:$0 sm:$0xff]  ;;  %v530_v7 = vld [vmem:[%s5879_s3 + $0x70] sm:$0xff]  ;;  %v416_v8 = vmul.f32 %v4166_v4, %v380_v3  ;;  %s3997_s24 = smov 64   ;;  %s3998_s22 = smov 96  }
  0x32   : > { %751 = vmatpush.msra.mxu1 %v529_v1  ;;  %3350 = vmatpush.msra.mxu3 %v529_v1  ;;  %v528_v9 = vld [vmem:[%s5879_s3 + $0x60] sm:$0xff]  ;;  %v523_v10 = vld [vmem:[%s5879_s3 + $0x38] sm:$0xff]  ;;  %v526_v11 = vld [vmem:[%s5879_s3 + $0x50] sm:$0xff]  ;;  %vm2159_vm4 = vcmask 785408   ;;  %s5723_s12 = scalar_lea.vmem [#allocation6], %s3204_s19  ;;  %s3340_s18 = sshll.u32 %s4077_s17, 8 }
  0x33   : > { %637 = vmatpush.msra.mxu0 %v530_v7  ;;  %3341 = vmatpush.msra.mxu2 %v530_v7  ;;  %v521_v12 = vld [vmem:[%s5879_s3 + $0x28] sm:$0xff]  ;;  %v452_v13 = vadd.f32 %v4174_v6, %v416_v8  ;;  %v524_v14 = vld [vmem:[%s5879_s3 + $0x40] sm:$0xff]  ;;  %v381_v15 = vld [vmem:[%s4147_s28 + $0x8] sm:$0xff]  ;;  %s3120_s30 = scalar_lea.hbm %s5886_s10, %s3340_s18  ;;  %s3121_s11 = sshll.u32 %s5723_s12, 4  ;;  %s3122_s11 = int_to_ptr.vmem [resolvable:$true] %s3121_s11 }
  0x34   : > { %752 = vmatpush.msra.mxu1 %v527_v2  ;;  %3351 = vmatpush.msra.mxu3 %v527_v2  ;;  %v519_v16 = vld [vmem:[%s5879_s3 + $0x18] sm:$0xff]  ;;  %v522_v17 = vld [vmem:[%s5879_s3 + $0x30] sm:$0xff]  ;;  %v517_v18 = vld [vmem:[%s5879_s3 + $0x8] sm:$0xff]  ;;  %v417_v20 = vmul.f32 %v4166_v4, %v381_v15 }
  0x35   : > { %638 = vmatpush.msra.mxu0 %v528_v9  ;;  %3342 = vmatpush.msra.mxu2 %v528_v9  ;;  %v484_v19 = vmax.f32 %v452_v13, 0.0  ;;  %v520_v21 = vld [vmem:[%s5879_s3 + $0x20] sm:$0xff]  ;;  %v518_v22 = vld [vmem:[%s5879_s3 + $0x10] sm:$0xff]  ;;  %v383_v29 = vld [vmem:[%s4147_s28 + $0x18] sm:$0xff] }
  0x36   : > { %753 = vmatpush.msra.mxu1 %v525_v5  ;;  %3352 = vmatpush.msra.mxu3 %v525_v5  ;;  %v453_v23 = vadd.f32 %v4174_v6, %v417_v20  ;;  %v516_v24 = vld [vmem:[%s5879_s3] sm:$0xff]  ;;  %v419_v31 = vmul.f32 %v4166_v4, %v383_v29  ;;  %v384_v33 = vld [vmem:[%s4147_s28 + $0x20] sm:$0xff]  ;;  %v385_v37 = vld [vmem:[%s4147_s28 + $0x28] sm:$0xff] }
  0x37   : > { %639 = vmatpush.msra.mxu0 %v526_v11  ;;  %3343 = vmatpush.msra.mxu2 %v526_v11  ;;  %v382_v25 = vld [vmem:[%s4147_s28 + $0x10] sm:$0xff]  ;;  %v420_v35 = vmul.f32 %v4166_v4, %v384_v33  ;;  %v421_v39 = vmul.f32 %v4166_v4, %v385_v37  ;;  %v387_v45 = vld [vmem:[%s4147_s28 + $0x38] sm:$0xff]  ;;  %v388_v49 = vld [vmem:[%s4147_s28 + $0x40] sm:$0xff] }
  0x38   : > { %754 = vmatpush.msra.mxu1 %v523_v10  ;;  %3353 = vmatpush.msra.mxu3 %v523_v10  ;;  %v485_v26 = vmax.f32 %v453_v23, 0.0  ;;  %v418_v27 = vmul.f32 %v4166_v4, %v382_v25  ;;  %v455_v32 = vadd.f32 %v4174_v6, %v419_v31  ;;  %v386_v41 = vld [vmem:[%s4147_s28 + $0x30] sm:$0xff]  ;;  %v423_v47 = vmul.f32 %v4166_v4, %v387_v45  ;;  %v389_v53 = vld [vmem:[%s4147_s28 + $0x48] sm:$0xff]  ;;  %v396_v54 = vld [vmem:[%s4147_s28 + $0x80] sm:$0xff] }
  0x39   : > { %640 = vmatpush.msra.mxu0 %v524_v14  ;;  %3344 = vmatpush.msra.mxu2 %v524_v14  ;;  %v456_v36 = vadd.f32 %v4174_v6, %v420_v35  ;;  %v457_v40 = vadd.f32 %v4174_v6, %v421_v39  ;;  %v422_v43 = vmul.f32 %v4166_v4, %v386_v41  ;;  %v390_v61 = vld [vmem:[%s4147_s28 + $0x50] sm:$0xff]  ;;  %v397_v62 = vld [vmem:[%s4147_s28 + $0x88] sm:$0xff]  ;;  %v391_v7 = vld [vmem:[%s4147_s28 + $0x58] sm:$0xff] }
  0x3a   : > { %755 = vmatpush.msra.mxu1 %v521_v12  ;;  %3354 = vmatpush.msra.mxu3 %v521_v12  ;;  %v454_v28 = vadd.f32 %v4174_v6, %v418_v27  ;;  %v487_v34 = vmax.f32 %v455_v32, 0.0  ;;  %v459_v48 = vadd.f32 %v4174_v6, %v423_v47  ;;  %v424_v51 = vmul.f32 %v4166_v4, %v388_v49  ;;  %v398_v8 = vld [vmem:[%s4147_s28 + $0x90] sm:$0xff]  ;;  %v392_v15 = vld [vmem:[%s4147_s28 + $0x60] sm:$0xff]  ;;  %v393_v23 = vld [vmem:[%s4147_s28 + $0x68] sm:$0xff] }
  0x3b   : > { %641 = vmatpush.msra.mxu0 %v522_v17  ;;  %3345 = vmatpush.msra.mxu2 %v522_v17  ;;  %v488_v38 = vmax.f32 %v456_v36, 0.0  ;;  %v489_v42 = vmax.f32 %v457_v40, 0.0  ;;  %v458_v44 = vadd.f32 %v4174_v6, %v422_v43  ;;  %v432_v55 = vmul.f32 %v4166_v4, %v396_v54  ;;  %v394_v31 = vld [vmem:[%s4147_s28 + $0x70] sm:$0xff]  ;;  %v401_v32 = vld [vmem:[%s4147_s28 + $0xa8] sm:$0xff]  ;;  %v395_v40 = vld [vmem:[%s4147_s28 + $0x78] sm:$0xff] }
  0x3c   : > { %756 = vmatpush.msra.mxu1 %v519_v16  ;;  %3355 = vmatpush.msra.mxu3 %v519_v16  ;;  %v486_v30 = vmax.f32 %v454_v28, 0.0  ;;  %v491_v50 = vmax.f32 %v459_v48, 0.0  ;;  %v460_v52 = vadd.f32 %v4174_v6, %v424_v51  ;;  %v425_v57 = vmul.f32 %v4166_v4, %v389_v53  ;;  %v399_v16 = vld [vmem:[%s4147_s28 + $0x98] sm:$0xff]  ;;  %v402_v41 = vld [vmem:[%s4147_s28 + $0xb0] sm:$0xff] }
  0x3d   : > { %642 = vmatpush.msra.mxu0 %v520_v21  ;;  %3346 = vmatpush.msra.mxu2 %v520_v21  ;;  %v490_v46 = vmax.f32 %v458_v44, 0.0  ;;  %v4259_v58 = vadd.f32 %v4174_v6, %v432_v55  ;;  %v433_v63 = vmul.f32 %v4166_v4, %v397_v62  ;;  %v426_v1 = vmul.f32 %v4166_v4, %v390_v61  ;;  %v403_v51 = vld [vmem:[%s4147_s28 + $0xb8] sm:$0xff]  ;;  %v4395_v61 = vld [vmem:[%s5881_s5] ss:$0 sm:$0xff]  ;;  %v4403_v62 = vld [vmem:[%s5882_s6 + $0x118] sm:$0xff] }
  0x3e   : > { %757 = vmatpush.msra.mxu1 %v517_v18  ;;  %3356 = vmatpush.msra.mxu3 %v517_v18  ;;  %v492_v56 = vmax.f32 %v460_v52, 0.0  ;;  %v461_v60 = vadd.f32 %v4174_v6, %v425_v57  ;;  %v434_v9 = vmul.f32 %v4166_v4, %v398_v8  ;;  %v427_v11 = vmul.f32 %v4166_v4, %v391_v7  ;;  %v404_v57 = vld [vmem:[%s4147_s28 + $0xc0] sm:$0xff]  ;;  %v4426_v7 = vld [vmem:[%s5882_s6 + $0x108] sm:$0xff] }
  0x3f   : > { %3238 = vmatmul.msk.f32.vlgmr.msra.gmra.mxu1 %vm532_vm0, %v484_v19  ;;  %643 = vmatpush.msra.mxu0 %v518_v22  ;;  %v500_v59 = vmax.f32 %v4259_v58, 0.0  ;;  %v469_v2 = vadd.f32 %v4174_v6, %v433_v63  ;;  %v462_v5 = vadd.f32 %v4174_v6, %v426_v1  ;;  %v435_v17 = vmul.f32 %v4166_v4, %v399_v16 }
  0x40   : > { %3347 = vmatpush.msra.mxu2 %v518_v22  ;;  %v493_v0 = vmax.f32 %v461_v60, 0.0  ;;  %v470_v12 = vadd.f32 %v4174_v6, %v434_v9  ;;  %v463_v14 = vadd.f32 %v4174_v6, %v427_v11  ;;  %v429_v27 = vmul.f32 %v4166_v4, %v393_v23  ;;  %v4437_v9 = vld [vmem:[%s5882_s6 + $0x100] sm:$0xff]  ;;  %v2319_v11 = vld [vmem:[%s5882_s6 + $0xf8] sm:$0xff] }
  0x41   : > { %644 = vmatpush.msra.mxu0 %v516_v24  ;;  %3254 = vmatmul.msk.f32.vlgmr.msra.gmra.mxu3 %vm532_vm0, %v500_v59  ;;  %v501_v3 = vmax.f32 %v469_v2, 0.0  ;;  %v494_v10 = vmax.f32 %v462_v5, 0.0  ;;  %v471_v20 = vadd.f32 %v4174_v6, %v435_v17  ;;  %v437_v33 = vmul.f32 %v4166_v4, %v401_v32  ;;  %v4415_v2 = vld [vmem:[%s5882_s6 + $0x110] sm:$0xff] }
  0x42   : > { %3206 = vmatmul.msk.f32.vlgmr.msra.gmra.mxu0 %vm532_vm0, %v484_v19  ;;  %3348 = vmatpush.msra.mxu2 %v516_v24  ;;  %v502_v13 = vmax.f32 %v470_v12, 0.0  ;;  %v495_v18 = vmax.f32 %v463_v14, 0.0  ;;  %v428_v19 = vmul.f32 %v4166_v4, %v392_v15  ;;  %v400_v24 = vld [vmem:[%s4147_s28 + $0xa0] sm:$0xff]  ;;  %v430_v36 = vmul.f32 %v4166_v4, %v394_v31  ;;  %v2303_v12 = vld [vmem:[%s5882_s6 + $0x78] sm:$0xff] }
  0x43   : > { %3223 = vmatmul.msk.f32.vlgmr.msra.gmra.mxu2 %vm532_vm0, %v501_v3  ;;  %v503_v21 = vmax.f32 %v471_v20, 0.0  ;;  %v436_v25 = vmul.f32 %v4166_v4, %v400_v24  ;;  %v473_v37 = vadd.f32 %v4174_v6, %v437_v33  ;;  %v438_v43 = vmul.f32 %v4166_v4, %v402_v41  ;;  %2658 = vmatpush.msrb.mxu0 %v4403_v62  ;;  %v2302_v20 = vld [vmem:[%s5882_s6 + $0x70] sm:$0xff] }
  0x44   : > { %v464_v22 = vadd.f32 %v4174_v6, %v428_v19  ;;  %v466_v39 = vadd.f32 %v4174_v6, %v430_v36  ;;  %v431_v45 = vmul.f32 %v4166_v4, %v395_v40  ;;  %v439_v52 = vmul.f32 %v4166_v4, %v403_v51  ;;  %2533 = vmatpush.msrb.mxu3 %v2319_v11  ;;  %v2318_v19 = vld [vmem:[%s5882_s6 + $0xf0] sm:$0xff] }
  0x45   : > { %v472_v28 = vadd.f32 %v4174_v6, %v436_v25  ;;  %v474_v48 = vadd.f32 %v4174_v6, %v438_v43  ;;  %v440_v60 = vmul.f32 %v4166_v4, %v404_v57  ;;  %2659 = vmatpush.msrb.mxu0 %v4415_v2  ;;  %2420 = vmatpush.msrb.mxu2 %v2303_v12 }
  0x46   : > { %v498_v44 = vmax.f32 %v466_v39, 0.0  ;;  %v475_v54 = vadd.f32 %v4174_v6, %v439_v52  ;;  %2534 = vmatpush.msrb.mxu3 %v2318_v19 }
  0x47   : > { %3239 = vmatmul.msk.f32.gmra.mxu1 %vm532_vm0, %v485_v26  ;;  %v504_v29 = vmax.f32 %v472_v28, 0.0  ;;  %v506_v49 = vmax.f32 %v474_v48, 0.0  ;;  %2660 = vmatpush.msrb.mxu0 %v4426_v7  ;;  %v2316_v48 = vld [vmem:[%s5882_s6 + $0xe0] sm:$0xff] }
  0x48   : > { %v507_v55 = vmax.f32 %v475_v54, 0.0  ;;  %2421 = vmatpush.msrb.mxu2 %v2302_v20 }
  0x49   : > { %3255 = vmatmul.msk.f32.gmra.mxu3 %vm532_vm0, %v501_v3  ;;  %2661 = vmatpush.msrb.mxu0 %v4437_v9 }
  0x4a   : > { %3207 = vmatmul.msk.f32.gmra.mxu0 %vm532_vm0, %v485_v26  ;;  %v496_v26 = vmax.f32 %v464_v22, 0.0 }
  0x4b   : > { %3224 = vmatmul.msk.f32.gmra.mxu2 %vm532_vm0, %v502_v13 }
  0x4f   : > { %3240 = vmatmul.msk.f32.gmra.mxu1 %vm532_vm0, %v486_v30 }
  0x51   : > { %3256 = vmatmul.msk.f32.gmra.mxu3 %vm532_vm0, %v502_v13 }
  0x52   : > { %3208 = vmatmul.msk.f32.gmra.mxu0 %vm532_vm0, %v486_v30  ;;  %v465_v30 = vadd.f32 %v4174_v6, %v429_v27 }
  0x53   : > { %3225 = vmatmul.msk.f32.gmra.mxu2 %vm532_vm0, %v503_v21 }
  0x54   : > { %v497_v35 = vmax.f32 %v465_v30, 0.0 }
  0x57   : > { %3241 = vmatmul.msk.f32.gmra.mxu1 %vm532_vm0, %v487_v34 }
  0x59   : > { %3257 = vmatmul.msk.f32.gmra.mxu3 %vm532_vm0, %v503_v21 }
  0x5a   : > { %3209 = vmatmul.msk.f32.gmra.mxu0 %vm532_vm0, %v487_v34  ;;  %v3995_v34 = vmov 0.0  }
  0x5b   : > { %3226 = vmatmul.msk.f32.gmra.mxu2 %vm532_vm0, %v504_v29  ;;  %960 = vst.msk [vmem:[#allocation2] sm:$0xff] %vm959_vm1, %v3995_v34 }
  0x5c   : > { %961 = vst.msk [vmem:[#allocation2 + $0x8] sm:$0xff] %vm959_vm1, %v3995_v34 }
  0x5d   : > { %963 = vst.msk [vmem:[#allocation2 + $0x10] sm:$0x3] %vm962_vm2, %v3995_v34 }
  0x5e   : > { %969 = vst.msk [vmem:[#allocation2] sm:$0x1] %vm968_vm3, %v3995_v34 }
  0x5f   : > { %3242 = vmatmul.msk.f32.gmra.mxu1 %vm532_vm0, %v488_v38  ;;  %965 = vst.msk [vmem:[#allocation2 + $0x198] sm:$0xff] %vm959_vm1, %v3995_v34 }
  0x60   : > { %966 = vst.msk [vmem:[#allocation2 + $0x1a0] sm:$0xff] %vm959_vm1, %v3995_v34 }
  0x61   : > { %3258 = vmatmul.msk.f32.gmra.mxu3 %vm532_vm0, %v504_v29  ;;  %967 = vst.msk [vmem:[#allocation2 + $0x1a8] sm:$0x3] %vm962_vm2, %v3995_v34 }
  0x62   : > { %3210 = vmatmul.msk.f32.gmra.mxu0 %vm532_vm0, %v488_v38  ;;  %v505_v38 = vmax.f32 %v473_v37, 0.0  ;;  %970 = vst.msk [vmem:[#allocation2 + $0x18] sm:$0x1] %vm968_vm3, %v3995_v34  ;;  %v407_v37 = vld [vmem:[%s4147_s28 + $0xd8] sm:$0xff] }
  0x63   : > { %971 = vst.msk [vmem:[#allocation2 + $0x30] sm:$0x1] %vm968_vm3, %v3995_v34  ;;  %v443_v39 = vmul.f32 %v4166_v4, %v407_v37 }
  0x64   : > { %3227 = vmatmul.msk.f32.gmra.mxu2 %vm532_vm0, %v505_v38  ;;  %972 = vst.msk [vmem:[#allocation2 + $0x48] sm:$0x1] %vm968_vm3, %v3995_v34 }
  0x65   : > { %973 = vst.msk [vmem:[#allocation2 + $0x60] sm:$0x1] %vm968_vm3, %v3995_v34  ;;  %v479_v41 = vadd.f32 %v4174_v6, %v443_v39 }
  0x66   : > { %974 = vst.msk [vmem:[#allocation2 + $0x78] sm:$0x1] %vm968_vm3, %v3995_v34 }
  0x67   : > { %3243 = vmatmul.msk.f32.gmra.mxu1 %vm532_vm0, %v489_v42  ;;  %975 = vst.msk [vmem:[#allocation2 + $0x90] sm:$0x1] %vm968_vm3, %v3995_v34 }
  0x68   : > { %976 = vst.msk [vmem:[#allocation2 + $0xa8] sm:$0x1] %vm968_vm3, %v3995_v34 }
  0x69   : > { %3259 = vmatmul.msk.f32.gmra.mxu3 %vm532_vm0, %v505_v38  ;;  %977 = vst.msk [vmem:[#allocation2 + $0xc0] sm:$0x1] %vm968_vm3, %v3995_v34 }
  0x6a   : > { %3211 = vmatmul.msk.f32.gmra.mxu0 %vm532_vm0, %v489_v42  ;;  %v1070_v42 = vld [vmem:[#allocation2 + $0x1] sm:$0xff]  ;;  %978 = vst.msk [vmem:[#allocation2 + $0xd8] sm:$0x1] %vm968_vm3, %v3995_v34 }
  0x6b   : > { %979 = vst.msk [vmem:[#allocation2 + $0xf0] sm:$0x1] %vm968_vm3, %v3995_v34 }
  0x6c   : > { %3228 = vmatmul.msk.f32.gmra.mxu2 %vm532_vm0, %v506_v49  ;;  %980 = vst.msk [vmem:[#allocation2 + $0x108] sm:$0x1] %vm968_vm3, %v3995_v34 }
  0x6d   : > { %981 = vst.msk [vmem:[#allocation2 + $0x120] sm:$0x1] %vm968_vm3, %v3995_v34 }
  0x6e   : > { %982 = vst.msk [vmem:[#allocation2 + $0x138] sm:$0x1] %vm968_vm3, %v3995_v34 }
  0x6f   : > { %3244 = vmatmul.msk.f32.gmra.mxu1 %vm532_vm0, %v490_v46  ;;  %983 = vst.msk [vmem:[#allocation2 + $0x150] sm:$0x1] %vm968_vm3, %v3995_v34 }
  0x70   : > { %984 = vst.msk [vmem:[#allocation2 + $0x168] sm:$0x1] %vm968_vm3, %v3995_v34 }
  0x71   : > { %3260 = vmatmul.msk.f32.gmra.mxu3 %vm532_vm0, %v506_v49  ;;  %985 = vst.msk [vmem:[#allocation2 + $0x180] sm:$0x1] %vm968_vm3, %v3995_v34  ;;  %v2300_v49 = vld [vmem:[%s5882_s6 + $0x60] sm:$0xff] }
  0x72   : > { %3212 = vmatmul.msk.f32.gmra.mxu0 %vm532_vm0, %v490_v46  ;;  %v1071_v46 = vld [vmem:[#allocation2 + $0x9] sm:$0xff]  ;;  %987 = vst.msk [vmem:[#allocation2 + $0x11] sm:$0x1] %vm968_vm3, %v3995_v34 }
  0x73   : > { %v3415_v47 = vpack.i.bf16 %v1071_v46, %v1070_v42  ;;  %988 = vst.msk [vmem:[#allocation2 + $0x29] sm:$0x1] %vm968_vm3, %v3995_v34  ;;  %v1102_v42 = vld [vmem:[#allocation2 + $0x2] sm:$0xff]  ;;  %v408_v46 = vld [vmem:[%s4147_s28 + $0xe0] sm:$0xff] }
  0x74   : > { %3229 = vmatmul.msk.f32.gmra.mxu2 %vm532_vm0, %v507_v55  ;;  %989 = vst.msk [vmem:[#allocation2 + $0x41] sm:$0x1] %vm968_vm3, %v3995_v34 }
  0x75   : > { %3416 = vrot.lane.b32.xlu0 %v3415_v47, %s3996_s15  ;;  %990 = vst.msk [vmem:[#allocation2 + $0x59] sm:$0x1] %vm968_vm3, %v3995_v34 }
  0x76   : > { %991 = vst.msk [vmem:[#allocation2 + $0x71] sm:$0x1] %vm968_vm3, %v3995_v34 }
  0x77   : > { %3245 = vmatmul.msk.f32.gmra.mxu1 %vm532_vm0, %v491_v50  ;;  %992 = vst.msk [vmem:[#allocation2 + $0x89] sm:$0x1] %vm968_vm3, %v3995_v34 }
  0x78   : > { %993 = vst.msk [vmem:[#allocation2 + $0xa1] sm:$0x1] %vm968_vm3, %v3995_v34 }
  0x79   : > { %3261 = vmatmul.msk.f32.gmra.mxu3 %vm532_vm0, %v507_v55  ;;  %994 = vst.msk [vmem:[#allocation2 + $0xb9] sm:$0x1] %vm968_vm3, %v3995_v34 }
  0x7a   : > { %3213 = vmatmul.msk.f32.gmra.mxu0 %vm532_vm0, %v491_v50  ;;  %v467_v50 = vadd.f32 %v4174_v6, %v431_v45  ;;  %995 = vst.msk [vmem:[#allocation2 + $0xd1] sm:$0x1] %vm968_vm3, %v3995_v34 }
  0x7b   : > { %996 = vst.msk [vmem:[#allocation2 + $0xe9] sm:$0x1] %vm968_vm3, %v3995_v34 }
  0x7c   : > { %v499_v53 = vmax.f32 %v467_v50, 0.0  ;;  %997 = vst.msk [vmem:[#allocation2 + $0x101] sm:$0x1] %vm968_vm3, %v3995_v34  ;;  %v444_v50 = vmul.f32 %v4166_v4, %v408_v46  ;;  %v2313_v46 = vld [vmem:[%s5882_s6 + $0xc8] sm:$0xff] }
  0x7d   : > { %998 = vst.msk [vmem:[#allocation2 + $0x119] sm:$0x1] %vm968_vm3, %v3995_v34 }
  0x7e   : > { %999 = vst.msk [vmem:[#allocation2 + $0x131] sm:$0x1] %vm968_vm3, %v3995_v34 }
  0x7f   : > { %3246 = vmatmul.msk.f32.gmra.mxu1 %vm532_vm0, %v492_v56  ;;  %1000 = vst.msk [vmem:[#allocation2 + $0x149] sm:$0x1] %vm968_vm3, %v3995_v34 }
  0x80   : > { %1001 = vst.msk [vmem:[#allocation2 + $0x161] sm:$0x1] %vm968_vm3, %v3995_v34 }
  0x81   : > { %1002 = vst.msk [vmem:[#allocation2 + $0x179] sm:$0x1] %vm968_vm3, %v3995_v34 }
  0x82   : > { %3214 = vmatmul.msk.f32.gmra.mxu0 %vm532_vm0, %v492_v56  ;;  %v4384_v56 = vld [vmem:[%s5880_s4] ss:$0 sm:$0xff]  ;;  %1003 = vst.msk [vmem:[#allocation2 + $0x191] sm:$0x1] %vm968_vm3, %v3995_v34 }
  0x83   : > { %986 = vst.msk [vmem:[#allocation2 + $0x198] sm:$0x1] %vm968_vm3, %v3995_v34 }
  0x84   : > { %1004 = vst.msk [vmem:[#allocation2 + $0x1a9] sm:$0x1] %vm968_vm3, %v3995_v34  ;;  %v2317_v34 = vld [vmem:[%s5882_s6 + $0xe8] sm:$0xff] }
  0x85   : > { %2535 = vmatpush.msrb.mxu3 %v2317_v34 }
  0x87   : > { %3247 = vmatmul.msk.f32.gmra.mxu1 %vm532_vm0, %v493_v0  ;;  %2536 = vmatpush.msrb.mxu3 %v2316_v48  ;;  %v411_v48 = vld [vmem:[%s4147_s28 + $0xf8] sm:$0xff] }
  0x8a   : > { %3215 = vmatmul.msk.f32.gmra.mxu0 %vm532_vm0, %v493_v0  ;;  %v476_v0 = vadd.f32 %v4174_v6, %v440_v60  ;;  %v1103_v60 = vld [vmem:[#allocation2 + $0xa] sm:$0xff] }
  0x8c   : > { %v508_v3 = vmax.f32 %v476_v0, 0.0 }
  0x8e   : > { %3262 = vmatmul.msk.f32.gmra.mxu3 %vm532_vm0, %v508_v3  ;;  %3230 = vmatmul.msk.f32.gmra.mxu2 %vm532_vm0, %v508_v3 }
  0x8f   : > { %3248 = vmatmul.msk.f32.gmra.mxu1 %vm532_vm0, %v494_v10 }
  0x92   : > { %3216 = vmatmul.msk.f32.gmra.mxu0 %vm532_vm0, %v494_v10  ;;  %v405_v10 = vld [vmem:[%s4147_s28 + $0xc8] sm:$0xff] }
  0x93   : > { %v441_v13 = vmul.f32 %v4166_v4, %v405_v10 }
  0x97   : > { %3249 = vmatmul.msk.f32.gmra.mxu1 %vm532_vm0, %v495_v18 }
  0x9a   : > { %3217 = vmatmul.msk.f32.gmra.mxu0 %vm532_vm0, %v495_v18  ;;  %v406_v18 = vld [vmem:[%s4147_s28 + $0xd0] sm:$0xff] }
  0x9b   : > { %v442_v21 = vmul.f32 %v4166_v4, %v406_v18 }
  0x9d   : > { %v478_v24 = vadd.f32 %v4174_v6, %v442_v21 }
  0x9f   : > { %3250 = vmatmul.msk.f32.gmra.mxu1 %vm532_vm0, %v496_v26 }
  0xa2   : > { %3218 = vmatmul.msk.f32.gmra.mxu0 %vm532_vm0, %v496_v26  ;;  %v510_v26 = vmax.f32 %v478_v24, 0.0 }
  0xa7   : > { %3251 = vmatmul.msk.f32.gmra.mxu1 %vm532_vm0, %v497_v35 }
  0xaa   : > { %3219 = vmatmul.msk.f32.gmra.mxu0 %vm532_vm0, %v497_v35  ;;  %v2301_v35 = vld [vmem:[%s5882_s6 + $0x68] sm:$0xff] }
  0xab   : > { %2422 = vmatpush.msrb.mxu2 %v2301_v35 }
  0xad   : > { %2423 = vmatpush.msrb.mxu2 %v2300_v49 }
  0xaf   : > { %3252 = vmatmul.msk.f32.gmra.mxu1 %vm532_vm0, %v498_v44 }
  0xb2   : > { %3220 = vmatmul.msk.f32.gmra.mxu0 %vm532_vm0, %v498_v44  ;;  %v511_v44 = vmax.f32 %v479_v41, 0.0 }
  0xb7   : > { %3253 = vmatmul.msk.f32.gmra.mxu1 %vm532_vm0, %v499_v53 }
  0xba   : > { %3221 = vmatmul.msk.f32.gmra.mxu0 %vm532_vm0, %v499_v53  ;;  %v480_v53 = vadd.f32 %v4174_v6, %v444_v50 }
  0xbc   : > { %v759_v63 = vpop.f32.mrf.mxu1  ;;  %v512_v55 = vmax.f32 %v480_v53, 0.0 }
  0xbd   : > { %v859_v1 = vmul.f32 %v4384_v56, %v759_v63 }
  0xbf   : > { %v895_v5 = vadd.f32 %v4395_v61, %v859_v1  ;;  %v4591_v37 = vpop.f32.mrf.mxu0 }
  0xc1   : > { %v927_v8 = vmax.f32 %v895_v5, 0.0 }
  0xc2   : > { %3222 = vmatmul.msk.f32.gmra.mxu0 %vm532_vm0, %v500_v59  ;;  %v477_v59 = vadd.f32 %v4174_v6, %v441_v13  ;;  %v2299_v13 = vld [vmem:[%s5882_s6 + $0x58] sm:$0xff] }
  0xc3   : > { %1006 = vst.msk [vmem:[#allocation2 + $0x19] sm:$0xff] %vm959_vm1, %v927_v8  ;;  %2424 = vmatpush.msrb.mxu2 %v2299_v13 }
  0xc4   : > { %v762_v14 = vpop.f32.mrf.mxu1  ;;  %v509_v16 = vmax.f32 %v477_v59, 0.0  ;;  %v409_v59 = vld [vmem:[%s4147_s28 + $0xe8] sm:$0xff] }
  0xc5   : > { %v860_v58 = vmul.f32 %v4384_v56, %v762_v14  ;;  %v2315_v14 = vld [vmem:[%s5882_s6 + $0xd8] sm:$0xff] }
  0xc6   : > { %3263 = vmatmul.msk.f32.gmra.mxu3 %vm532_vm0, %v509_v16  ;;  %3231 = vmatmul.msk.f32.gmra.mxu2 %vm532_vm0, %v509_v16  ;;  %v445_v16 = vmul.f32 %v4166_v4, %v409_v59 }
  0xc7   : > { %v896_v15 = vadd.f32 %v4395_v61, %v860_v58  ;;  %2537 = vmatpush.msrb.mxu3 %v2315_v14 }
  0xc8   : > { %v481_v19 = vadd.f32 %v4174_v6, %v445_v16  ;;  %v2311_v16 = vld [vmem:[%s5882_s6 + $0xb8] sm:$0xff] }
  0xc9   : > { %v928_v17 = vmax.f32 %v896_v15, 0.0 }
  0xca   : > { %v1072_v28 = vld [vmem:[#allocation2 + $0x19] sm:$0xff]  ;;  %v513_v21 = vmax.f32 %v481_v19, 0.0 }
  0xcb   : > { %1007 = vst.msk [vmem:[#allocation2 + $0x21] sm:$0xff] %vm959_vm1, %v928_v17  ;;  %v1134_v0 = vld [vmem:[#allocation2 + $0x18] sm:$0xff] }
  0xcc   : > { %v765_v22 = vpop.f32.mrf.mxu1 }
  0xcd   : > { %v861_v23 = vmul.f32 %v4384_v56, %v765_v22 }
  0xce   : > { %3264 = vmatmul.msk.f32.gmra.mxu3 %vm532_vm0, %v510_v26  ;;  %3232 = vmatmul.msk.f32.gmra.mxu2 %vm532_vm0, %v510_v26 }
  0xcf   : > { %v897_v25 = vadd.f32 %v4395_v61, %v861_v23 }
  0xd1   : > { %v929_v27 = vmax.f32 %v897_v25, 0.0  ;;  %v410_v25 = vld [vmem:[%s4147_s28 + $0xf0] sm:$0xff]  ;;  %s3945_s28 = scalar_lea.hbm %s5886_s10, 1024 }
  0xd2   : > { %v4492_v29 = vld [vmem:[#allocation2 + $0x1a] sm:$0xff]  ;;  %v4494_v30 = vld [vmem:[#allocation2 + $0x22] sm:$0xff] }
  0xd3   : > { %v1073_v31 = vld [vmem:[#allocation2 + $0x21] sm:$0xff]  ;;  %1008 = vst.msk [vmem:[#allocation2 + $0x31] sm:$0xff] %vm959_vm1, %v929_v27  ;;  %v3435_v32 = vpack.i.bf16 %v4494_v30, %v4492_v29 }
  0xd4   : > { %v3420_v33 = vpack.i.bf16 %v1073_v31, %v1072_v28  ;;  %v768_v36 = vpop.f32.mrf.mxu1  ;;  %v1135_v1 = vld [vmem:[#allocation2 + $0x20] sm:$0xff]  ;;  %v2298_v28 = vld [vmem:[%s5882_s6 + $0x50] sm:$0xff] }
  0xd5   : > { %v862_v38 = vmul.f32 %v4384_v56, %v768_v36  ;;  %3436 = vrot.lane.b32.xlu2 %v3435_v32, %s3996_s15  ;;  %v2314_v31 = vld [vmem:[%s5882_s6 + $0xd0] sm:$0xff]  ;;  %v446_v32 = vmul.f32 %v4166_v4, %v410_v25  ;;  %2425 = vmatpush.msrb.mxu2 %v2298_v28 }
  0xd6   : > { %3421 = vrot.lane.b32.xlu0 %v3420_v33, %s3996_s15  ;;  %3265 = vmatmul.msk.f32.gmra.mxu3 %vm532_vm0, %v511_v44 }
  0xd7   : > { %v898_v40 = vadd.f32 %v4395_v61, %v862_v38  ;;  %3233 = vmatmul.msk.f32.gmra.mxu2 %vm532_vm0, %v511_v44  ;;  %2538 = vmatpush.msrb.mxu3 %v2314_v31 }
  0xd9   : > { %v930_v43 = vmax.f32 %v898_v40, 0.0  ;;  %2539 = vmatpush.msrb.mxu3 %v2313_v46 }
  0xda   : > { %v4512_v45 = vld [vmem:[#allocation2 + $0x30] sm:$0xff] }
  0xdb   : > { %1009 = vst.msk [vmem:[#allocation2 + $0x39] sm:$0xff] %vm959_vm1, %v930_v43  ;;  %v3425_v47 = vpack.i.bf16 %v4512_v45, %v1102_v42  ;;  %v4530_v57 = vld [vmem:[#allocation2 + $0x31] sm:$0xff] }
  0xdc   : > { %v771_v51 = vpop.f32.mrf.mxu1  ;;  %v3430_v10 = vpack.i.bf16 %v4530_v57, %v1134_v0  ;;  %v2296_v0 = vld [vmem:[%s5882_s6 + $0x40] sm:$0xff] }
  0xdd   : > { %v863_v52 = vmul.f32 %v4384_v56, %v771_v51  ;;  %3426 = vrot.lane.b32.xlu1 %v3425_v47, %s3997_s24 }
  0xde   : > { %3266 = vmatmul.msk.f32.gmra.mxu3 %vm532_vm0, %v512_v55 }
  0xdf   : > { %v899_v54 = vadd.f32 %v4395_v61, %v863_v52  ;;  %3234 = vmatmul.msk.f32.gmra.mxu2 %vm532_vm0, %v512_v55  ;;  %v4626_v55 = vpop.f32.mrf.mxu0 }
  0xe1   : > { %v931_v63 = vmax.f32 %v899_v54, 0.0 }
  0xe2   : > { %v4532_v3 = vld [vmem:[#allocation2 + $0x32] sm:$0xff]  ;;  %v4559_v18 = vld [vmem:[#allocation2 + $0x3a] sm:$0xff] }
  0xe3   : > { %v4534_v5 = vld [vmem:[#allocation2 + $0x39] sm:$0xff]  ;;  %1010 = vst.msk [vmem:[#allocation2 + $0x49] sm:$0xff] %vm959_vm1, %v931_v63  ;;  %3270 = vmatmul.msk.f32.vlgmr.msrb.gmra.mxu0 %vm959_vm1, %v4532_v3  ;;  %v3450_v22 = vpack.i.bf16 %v4559_v18, %v4532_v3 }
  0xe4   : > { %v4536_v8 = vld [vmem:[#allocation2 + $0x38] sm:$0xff]  ;;  %v3445_v11 = vpack.i.bf16 %v4534_v5, %v1135_v1  ;;  %v774_v58 = vpop.f32.mrf.mxu1  ;;  %v2312_v1 = vld [vmem:[%s5882_s6 + $0xc0] sm:$0xff] }
  0xe5   : > { %v3440_v12 = vpack.i.bf16 %v4536_v8, %v1103_v60  ;;  %v864_v15 = vmul.f32 %v4384_v56, %v774_v58  ;;  %3431 = vrot.lane.b32.xlu1 %v3430_v10, %s3998_s22  ;;  %2540 = vmatpush.msrb.mxu3 %v2312_v1 }
  0xe6   : > { %3446 = vrot.lane.b32.xlu0 %v3445_v11, %s3998_s22  ;;  %3267 = vmatmul.msk.f32.gmra.mxu3 %vm532_vm0, %v513_v21 }
  0xe7   : > { %3441 = vrot.lane.b32.xlu2 %v3440_v12, %s3997_s24  ;;  %v900_v17 = vadd.f32 %v4395_v61, %v864_v15  ;;  %3235 = vmatmul.msk.f32.gmra.mxu2 %vm532_vm0, %v513_v21  ;;  %v2295_v15 = vld [vmem:[%s5882_s6 + $0x38] sm:$0xff]  ;;  %v4675_v19 = vpop.f32.mrf.mxu0 }
  0xe8   : > { %2541 = vmatpush.msrb.mxu3 %v2311_v16 }
  0xe9   : > { %v932_v20 = vmax.f32 %v900_v17, 0.0  ;;  %v807_v17 = vpop.f32.mrf.mxu3 }
  0xea   : > { %v4564_v23 = vld [vmem:[#allocation2 + $0x49] sm:$0xff]  ;;  %v875_v21 = vmul.f32 %v4384_v56, %v807_v17 }
  0xeb   : > { %v4566_v24 = vld [vmem:[#allocation2 + $0x48] sm:$0xff]  ;;  %1011 = vst.msk [vmem:[#allocation2 + $0x51] sm:$0xff] %vm959_vm1, %v932_v20  ;;  %3271 = vmatmul.msk.f32.gmra.mxu0 %vm959_vm1, %v4559_v18  ;;  %v3460_v26 = vpack.i.bf16 %v4564_v23, %v4512_v45 }
  0xec   : > { %v3455_v27 = vpack.i.bf16 %v4566_v24, %v4492_v29  ;;  %v777_v33 = vpop.f32.mrf.mxu1  ;;  %v482_v29 = vadd.f32 %v4174_v6, %v446_v32  ;;  %v2297_v45 = vld [vmem:[%s5882_s6 + $0x48] sm:$0xff] }
  0xed   : > { %v865_v34 = vmul.f32 %v4384_v56, %v777_v33  ;;  %2426 = vmatpush.msrb.mxu2 %v2297_v45 }
  0xee   : > { %3451 = vrot.lane.b32.xlu0 %v3450_v22, %s3996_s15  ;;  %3456 = vrot.lane.b32.xlu1 %v3455_v27, %s3997_s24  ;;  %v514_v36 = vmax.f32 %v482_v29, 0.0  ;;  %v911_v22 = vadd.f32 %v4395_v61, %v875_v21  ;;  %v2310_v29 = vld [vmem:[%s5882_s6 + $0xb0] sm:$0xff] }
  0xef   : > { %3461 = vrot.lane.b32.xlu2 %v3460_v26, %s3998_s22  ;;  %v901_v35 = vadd.f32 %v4395_v61, %v865_v34  ;;  %2427 = vmatpush.msrb.mxu2 %v2296_v0  ;;  %v2294_v34 = vld [vmem:[%s5882_s6 + $0x30] sm:$0xff] }
  0xf0   : > { %3268 = vmatmul.msk.f32.gmra.mxu3 %vm532_vm0, %v514_v36  ;;  %3236 = vmatmul.msk.f32.gmra.mxu2 %vm532_vm0, %v514_v36  ;;  %v943_v25 = vmax.f32 %v911_v22, 0.0  ;;  %v2307_v22 = vld [vmem:[%s5882_s6 + $0x98] sm:$0xff] }
  0xf1   : > { %v933_v38 = vmax.f32 %v901_v35, 0.0  ;;  %2428 = vmatpush.msrb.mxu2 %v2295_v15  ;;  %v810_v35 = vpop.f32.mrf.mxu3  ;;  %2542 = vmatpush.msrb.mxu3 %v2310_v29  ;;  %v2291_v15 = vld [vmem:[%s5882_s6 + $0x18] sm:$0xff]  ;;  %v2290_v29 = vld [vmem:[%s5882_s6 + $0x10] sm:$0xff] }
  0xf2   : > { %v4593_v39 = vld [vmem:[#allocation2 + $0x4a] sm:$0xff]  ;;  %v4624_v52 = vld [vmem:[#allocation2 + $0x52] sm:$0xff]  ;;  %1022 = vst.msk [vmem:[#allocation2 + $0xd9] sm:$0xff] %vm959_vm1, %v943_v25 }
  0xf3   : > { %v4595_v40 = vld [vmem:[#allocation2 + $0x51] sm:$0xff]  ;;  %1012 = vst.msk [vmem:[#allocation2 + $0x61] sm:$0xff] %vm959_vm1, %v933_v38  ;;  %3272 = vmatmul.msk.f32.gmra.mxu0 %vm959_vm1, %v4593_v39  ;;  %v3475_v44 = vpack.i.bf16 %v4593_v39, %v4530_v57  ;;  %2429 = vmatpush.msrb.mxu2 %v2294_v34  ;;  %v876_v38 = vmul.f32 %v4384_v56, %v810_v35 }
  0xf4   : > { %v4597_v41 = vld [vmem:[#allocation2 + $0x50] sm:$0xff]  ;;  %v3470_v42 = vpack.i.bf16 %v4595_v40, %v4536_v8  ;;  %v780_v47 = vpop.f32.mrf.mxu1 }
  0xf5   : > { %v3465_v43 = vpack.i.bf16 %v4597_v41, %v4494_v30  ;;  %v866_v49 = vmul.f32 %v4384_v56, %v780_v47  ;;  %v447_v30 = vmul.f32 %v4166_v4, %v411_v48  ;;  %v3480_v4 = vpack.i.bf16 %v4624_v52, %v4534_v5 }
  0xf6   : > { %3476 = vrot.lane.b32.xlu0 %v3475_v44, %s3996_s15 }
  0xf7   : > { %3466 = vrot.lane.b32.xlu1 %v3465_v43, %s3997_s24  ;;  %3471 = vrot.lane.b32.xlu2 %v3470_v42, %s3998_s22  ;;  %v902_v50 = vadd.f32 %v4395_v61, %v866_v49  ;;  %v483_v51 = vadd.f32 %v4174_v6, %v447_v30 }
  0xf9   : > { %v934_v53 = vmax.f32 %v902_v50, 0.0  ;;  %v515_v54 = vmax.f32 %v483_v51, 0.0  ;;  %v2293_v50 = vld [vmem:[%s5882_s6 + $0x28] sm:$0xff] }
  0xfa   : > { %v4628_v57 = vld [vmem:[#allocation2 + $0x61] sm:$0xff]  ;;  %2430 = vmatpush.msrb.mxu2 %v2293_v50 }
  0xfb   : > { %v4630_v60 = vld [vmem:[#allocation2 + $0x60] sm:$0xff]  ;;  %1013 = vst.msk [vmem:[#allocation2 + $0x69] sm:$0xff] %vm959_vm1, %v934_v53  ;;  %3273 = vmatmul.msk.f32.gmra.mxu0 %vm959_vm1, %v4624_v52  ;;  %v3490_v6 = vpack.i.bf16 %v4628_v57, %v4566_v24  ;;  %3269 = vmatmul.msk.f32.gmra.mxu3 %vm532_vm0, %v515_v54  ;;  %v2309_v51 = vld [vmem:[%s5882_s6 + $0xa8] sm:$0xff]  ;;  %v813_v53 = vpop.f32.mrf.mxu3 }
  0xfc   : > { %v3485_v63 = vpack.i.bf16 %v4630_v60, %v4532_v3  ;;  %v783_v8 = vpop.f32.mrf.mxu1  ;;  %3237 = vmatmul.msk.f32.gmra.mxu2 %vm532_vm0, %v515_v54  ;;  %2543 = vmatpush.msrb.mxu3 %v2309_v51  ;;  %v2289_v51 = vld [vmem:[%s5882_s6 + $0x8] sm:$0xff] }
  0xfd   : > { %v867_v5 = vmul.f32 %v4384_v56, %v783_v8 }
  0xfe   : > { %3481 = vrot.lane.b32.xlu0 %v3480_v4, %s3996_s15 }
  0xff   : > { %3486 = vrot.lane.b32.xlu1 %v3485_v63, %s3997_s24  ;;  %3491 = vrot.lane.b32.xlu2 %v3490_v6, %s3998_s22  ;;  %v903_v3 = vadd.f32 %v4395_v61, %v867_v5 }
 0x101   : > { %v935_v10 = vmax.f32 %v903_v3, 0.0 }
 0x102   : > { %v4654_v11 = vld [vmem:[#allocation2 + $0x62] sm:$0xff]  ;;  %v4684_v24 = vld [vmem:[#allocation2 + $0x6a] sm:$0xff] }
 0x103   : > { %v4656_v12 = vld [vmem:[#allocation2 + $0x69] sm:$0xff]  ;;  %1014 = vst.msk [vmem:[#allocation2 + $0x79] sm:$0xff] %vm959_vm1, %v935_v10  ;;  %3274 = vmatmul.msk.f32.gmra.mxu0 %vm959_vm1, %v4654_v11  ;;  %v3505_v59 = vpack.i.bf16 %v4654_v11, %v4564_v23  ;;  %v3510_v31 = vpack.i.bf16 %v4684_v24, %v4595_v40 }
 0x104   : > { %v4658_v13 = vld [vmem:[#allocation2 + $0x68] sm:$0xff]  ;;  %v3500_v14 = vpack.i.bf16 %v4656_v12, %v4597_v41  ;;  %v786_v20 = vpop.f32.mrf.mxu1  ;;  %v912_v41 = vadd.f32 %v4395_v61, %v876_v38 }
 0x105   : > { %v3495_v58 = vpack.i.bf16 %v4658_v13, %v4559_v18  ;;  %v868_v18 = vmul.f32 %v4384_v56, %v786_v20 }
 0x106   : > { %3506 = vrot.lane.b32.xlu0 %v3505_v59, %s3996_s15  ;;  %v944_v43 = vmax.f32 %v912_v41, 0.0  ;;  %v816_v59 = vpop.f32.mrf.mxu3 }
 0x107   : > { %3496 = vrot.lane.b32.xlu1 %v3495_v58, %s3997_s24  ;;  %3501 = vrot.lane.b32.xlu2 %v3500_v14, %s3998_s22  ;;  %v904_v23 = vadd.f32 %v4395_v61, %v868_v18  ;;  %v2292_v14 = vld [vmem:[%s5882_s6 + $0x20] sm:$0xff]  ;;  %v878_v16 = vmul.f32 %v4384_v56, %v816_v59 }
 0x108   : > { %1023 = vst.msk [vmem:[#allocation2 + $0xe1] sm:$0xff] %vm959_vm1, %v944_v43  ;;  %v2308_v58 = vld [vmem:[%s5882_s6 + $0xa0] sm:$0xff]  ;;  %2431 = vmatpush.msrb.mxu2 %v2292_v14  ;;  %v2306_v43 = vld [vmem:[%s5882_s6 + $0x90] sm:$0xff] }
 0x109   : > { %v936_v26 = vmax.f32 %v904_v23, 0.0  ;;  %2544 = vmatpush.msrb.mxu3 %v2308_v58  ;;  %v914_v17 = vadd.f32 %v4395_v61, %v878_v16  ;;  %v2288_v59 = vld [vmem:[%s5882_s6] sm:$0xff] }
 0x10a   : > { %v4686_v27 = vld [vmem:[#allocation2 + $0x79] sm:$0xff]  ;;  %2432 = vmatpush.msrb.mxu2 %v2291_v15 }
 0x10b   : > { %v4688_v28 = vld [vmem:[#allocation2 + $0x78] sm:$0xff]  ;;  %1015 = vst.msk [vmem:[#allocation2 + $0x81] sm:$0xff] %vm959_vm1, %v936_v26  ;;  %3275 = vmatmul.msk.f32.gmra.mxu0 %vm959_vm1, %v4684_v24  ;;  %v3520_v32 = vpack.i.bf16 %v4686_v27, %v4630_v60  ;;  %v877_v60 = vmul.f32 %v4384_v56, %v813_v53  ;;  %v946_v21 = vmax.f32 %v914_v17, 0.0  ;;  %2545 = vmatpush.msrb.mxu3 %v2307_v22  ;;  %v2304_v22 = vld [vmem:[%s5882_s6 + $0x80] sm:$0xff] }
 0x10c   : > { %v3515_v33 = vpack.i.bf16 %v4688_v28, %v4593_v39  ;;  %v789_v36 = vpop.f32.mrf.mxu1  ;;  %v4710_v39 = vpop.f32.mrf.mxu0  ;;  %2433 = vmatpush.msrb.mxu2 %v2290_v29 }
 0x10d   : > { %v869_v40 = vmul.f32 %v4384_v56, %v789_v36  ;;  %1025 = vst.msk [vmem:[#allocation2 + $0xf9] sm:$0xff] %vm959_vm1, %v946_v21  ;;  %2546 = vmatpush.msrb.mxu3 %v2306_v43  ;;  %v4911_v43 = vpop.permute.xlu0 %3416 }
 0x10e   : > { %3511 = vrot.lane.b32.xlu0 %v3510_v31, %s3996_s15  ;;  %v819_v34 = vpop.f32.mrf.mxu3  ;;  %2434 = vmatpush.msrb.mxu2 %v2289_v51 }
 0x10f   : > { %3516 = vrot.lane.b32.xlu1 %v3515_v33, %s3997_s24  ;;  %3521 = vrot.lane.b32.xlu2 %v3520_v32, %s3998_s22  ;;  %v905_v42 = vadd.f32 %v4395_v61, %v869_v40  ;;  %v879_v36 = vmul.f32 %v4384_v56, %v819_v34 }
 0x110   : > { %2435 = vmatpush.msrb.mxu2 %v2288_v59 }
 0x111   : > { %v937_v44 = vmax.f32 %v905_v42, 0.0 }
 0x112   : > { %v4715_v45 = vld [vmem:[#allocation2 + $0x7a] sm:$0xff]  ;;  %v4746_v63 = vld [vmem:[#allocation2 + $0x82] sm:$0xff]  ;;  %3357 = vmatpush.msra.mxu2 %v4403_v62 }
 0x113   : > { %v4717_v46 = vld [vmem:[#allocation2 + $0x81] sm:$0xff]  ;;  %1016 = vst.msk [vmem:[#allocation2 + $0x91] sm:$0xff] %vm959_vm1, %v937_v44  ;;  %3276 = vmatmul.msk.f32.gmra.mxu0 %vm959_vm1, %v4715_v45  ;;  %v3535_v30 = vpack.i.bf16 %v4715_v45, %v4628_v57  ;;  %v3540_v3 = vpack.i.bf16 %v4746_v63, %v4656_v12 }
 0x114   : > { %v4719_v47 = vld [vmem:[#allocation2 + $0x80] sm:$0xff]  ;;  %v3530_v48 = vpack.i.bf16 %v4717_v46, %v4658_v13  ;;  %v792_v54 = vpop.f32.mrf.mxu1  ;;  %v4744_v6 = vpop.f32.mrf.mxu0  ;;  %3358 = vmatpush.msra.mxu2 %v4415_v2 }
 0x115   : > { %v3525_v49 = vpack.i.bf16 %v4719_v47, %v4624_v52  ;;  %v870_v4 = vmul.f32 %v4384_v56, %v792_v54  ;;  %v913_v52 = vadd.f32 %v4395_v61, %v877_v60 }
 0x116   : > { %3536 = vrot.lane.b32.xlu0 %v3535_v30, %s3996_s15  ;;  %v822_v50 = vpop.f32.mrf.mxu3  ;;  %3359 = vmatpush.msra.mxu2 %v4426_v7 }
 0x117   : > { %3526 = vrot.lane.b32.xlu1 %v3525_v49, %s3997_s24  ;;  %3531 = vrot.lane.b32.xlu2 %v3530_v48, %s3998_s22  ;;  %v906_v57 = vadd.f32 %v4395_v61, %v870_v4  ;;  %v945_v0 = vmax.f32 %v913_v52, 0.0  ;;  %v880_v60 = vmul.f32 %v4384_v56, %v822_v50  ;;  %v4925_v50 = vld [vmem:[#allocation2 + $0xd9] sm:$0xff] }
 0x118   : > { %3360 = vmatpush.msra.mxu2 %v4437_v9 }
 0x119   : > { %v938_v1 = vmax.f32 %v906_v57, 0.0  ;;  %1024 = vst.msk [vmem:[#allocation2 + $0xf1] sm:$0xff] %vm959_vm1, %v945_v0  ;;  %v2305_v0 = vld [vmem:[%s5882_s6 + $0x88] sm:$0xff] }
 0x11a   : > { %v4748_v8 = vld [vmem:[#allocation2 + $0x91] sm:$0xff]  ;;  %2547 = vmatpush.msrb.mxu3 %v2305_v0 }
 0x11b   : > { %v4750_v5 = vld [vmem:[#allocation2 + $0x90] sm:$0xff]  ;;  %1017 = vst.msk [vmem:[#allocation2 + $0x99] sm:$0xff] %vm959_vm1, %v938_v1  ;;  %3277 = vmatmul.msk.f32.gmra.mxu0 %vm959_vm1, %v4746_v63  ;;  %v3550_v10 = vpack.i.bf16 %v4748_v8, %v4688_v28 }
 0x11c   : > { %v3545_v13 = vpack.i.bf16 %v4750_v5, %v4654_v11  ;;  %v795_v12 = vpop.f32.mrf.mxu1  ;;  %v4781_v23 = vpop.f32.mrf.mxu0  ;;  %2548 = vmatpush.msrb.mxu3 %v2304_v22 }
 0x11d   : > { %v871_v11 = vmul.f32 %v4384_v56, %v795_v12 }
 0x11e   : > { %3541 = vrot.lane.b32.xlu0 %v3540_v3, %s3996_s15  ;;  %v825_v58 = vpop.f32.mrf.mxu3 }
 0x11f   : > { %3546 = vrot.lane.b32.xlu1 %v3545_v13, %s3997_s24  ;;  %3551 = vrot.lane.b32.xlu2 %v3550_v10, %s3998_s22  ;;  %v907_v20 = vadd.f32 %v4395_v61, %v871_v11  ;;  %v881_v12 = vmul.f32 %v4384_v56, %v825_v58  ;;  %v3418_v58 = vunpack.i.l.bf16 %v4911_v43 }
 0x121   : > { %v939_v18 = vmax.f32 %v907_v20, 0.0 }
 0x122   : > { %v4783_v25 = vld [vmem:[#allocation2 + $0x92] sm:$0xff]  ;;  %v4809_v40 = vld [vmem:[#allocation2 + $0x9a] sm:$0xff] }
 0x123   : > { %v4785_v26 = vld [vmem:[#allocation2 + $0x99] sm:$0xff]  ;;  %1018 = vst.msk [vmem:[#allocation2 + $0xa9] sm:$0xff] %vm959_vm1, %v939_v18  ;;  %3278 = vmatmul.msk.f32.gmra.mxu0 %vm959_vm1, %v4783_v25  ;;  %v3565_v33 = vpack.i.bf16 %v4783_v25, %v4686_v27  ;;  %v3570_v48 = vpack.i.bf16 %v4809_v40, %v4717_v46 }
 0x124   : > { %v4787_v28 = vld [vmem:[#allocation2 + $0x98] sm:$0xff]  ;;  %v3560_v31 = vpack.i.bf16 %v4785_v26, %v4719_v47  ;;  %v798_v35 = vpop.f32.mrf.mxu1  ;;  %v4831_v53 = vpop.f32.mrf.mxu0 }
 0x125   : > { %v3555_v32 = vpack.i.bf16 %v4787_v28, %v4684_v24  ;;  %v872_v38 = vmul.f32 %v4384_v56, %v798_v35  ;;  %v915_v24 = vadd.f32 %v4395_v61, %v879_v36 }
 0x126   : > { %3566 = vrot.lane.b32.xlu0 %v3565_v33, %s3996_s15  ;;  %v828_v33 = vpop.f32.mrf.mxu3 }
 0x127   : > { %3556 = vrot.lane.b32.xlu1 %v3555_v32, %s3997_s24  ;;  %3561 = vrot.lane.b32.xlu2 %v3560_v31, %s3998_s22  ;;  %v908_v27 = vadd.f32 %v4395_v61, %v872_v38  ;;  %v947_v41 = vmax.f32 %v915_v24, 0.0  ;;  %v882_v34 = vmul.f32 %v4384_v56, %v828_v33 }
 0x129   : > { %v940_v42 = vmax.f32 %v908_v27, 0.0  ;;  %1026 = vst.msk [vmem:[#allocation2 + $0x109] sm:$0xff] %vm959_vm1, %v947_v41  ;;  %v918_v7 = vadd.f32 %v4395_v61, %v882_v34 }
 0x12a   : > { %v4814_v44 = vld [vmem:[#allocation2 + $0xa9] sm:$0xff] }
 0x12b   : > { %v4816_v47 = vld [vmem:[#allocation2 + $0xa8] sm:$0xff]  ;;  %1019 = vst.msk [vmem:[#allocation2 + $0xb1] sm:$0xff] %vm959_vm1, %v940_v42  ;;  %3279 = vmatmul.msk.f32.gmra.mxu0 %vm959_vm1, %v4809_v40  ;;  %v3580_v49 = vpack.i.bf16 %v4814_v44, %v4750_v5  ;;  %v950_v35 = vmax.f32 %v918_v7, 0.0 }
 0x12c   : > { %v3575_v30 = vpack.i.bf16 %v4816_v47, %v4715_v45  ;;  %v801_v54 = vpop.f32.mrf.mxu1  ;;  %v916_v45 = vadd.f32 %v4395_v61, %v880_v60  ;;  %v4863_v11 = vpop.f32.mrf.mxu0 }
 0x12d   : > { %v873_v4 = vmul.f32 %v4384_v56, %v801_v54  ;;  %1029 = vst.msk [vmem:[#allocation2 + $0x129] sm:$0xff] %vm959_vm1, %v950_v35 }
 0x12e   : > { %3571 = vrot.lane.b32.xlu0 %v3570_v48, %s3996_s15  ;;  %v948_v52 = vmax.f32 %v916_v45, 0.0  ;;  %v831_v41 = vpop.f32.mrf.mxu3 }
 0x12f   : > { %3576 = vrot.lane.b32.xlu1 %v3575_v30, %s3997_s24  ;;  %3581 = vrot.lane.b32.xlu2 %v3580_v49, %s3998_s22  ;;  %v909_v46 = vadd.f32 %v4395_v61, %v873_v4  ;;  %v4869_v17 = vpop.permute.xlu2 %3436  ;;  %v883_v42 = vmul.f32 %v4384_v56, %v831_v41  ;;  %v4923_v30 = vpop.f32.mrf.mxu2  ;;  %v4984_v41 = vld [vmem:[#allocation2 + $0xf1] sm:$0xff] }
 0x130   : > { %1027 = vst.msk [vmem:[#allocation2 + $0x111] sm:$0xff] %vm959_vm1, %v948_v52  ;;  %v2866_v52 = vld [vmem:[%s5885_s9 + $0x18] sm:$0xff] }
 0x131   : > { %v941_v57 = vmax.f32 %v909_v46, 0.0  ;;  %2975 = vmatpush.msrb.mxu1 %v2866_v52 }
 0x132   : > { %v4843_v1 = vld [vmem:[#allocation2 + $0xaa] sm:$0xff]  ;;  %v4871_v20 = vld [vmem:[#allocation2 + $0xb2] sm:$0xff] }
 0x133   : > { %v4845_v5 = vld [vmem:[#allocation2 + $0xb1] sm:$0xff]  ;;  %1020 = vst.msk [vmem:[#allocation2 + $0xc1] sm:$0xff] %vm959_vm1, %v941_v57  ;;  %3280 = vmatmul.msk.f32.gmra.mxu0 %vm959_vm1, %v4843_v1  ;;  %v3595_v14 = vpack.i.bf16 %v4843_v1, %v4748_v8  ;;  %v3600_v62 = vpack.i.bf16 %v4871_v20, %v4785_v26 }
 0x134   : > { %v1242_v3 = vld [vmem:[#allocation2 + $0xb0] sm:$0xff]  ;;  %v3590_v10 = vpack.i.bf16 %v4845_v5, %v4787_v28  ;;  %v804_v15 = vpop.f32.mrf.mxu1  ;;  %v4895_v29 = vpop.f32.mrf.mxu0 }
 0x135   : > { %v3585_v13 = vpack.i.bf16 %v1242_v3, %v4746_v63  ;;  %v874_v16 = vmul.f32 %v4384_v56, %v804_v15  ;;  %v917_v63 = vadd.f32 %v4395_v61, %v881_v12 }
 0x136   : > { %3596 = vrot.lane.b32.xlu0 %v3595_v14, %s3996_s15 }
 0x137   : > { %3586 = vrot.lane.b32.xlu1 %v3585_v13, %s3997_s24  ;;  %3591 = vrot.lane.b32.xlu2 %v3590_v10, %s3998_s22  ;;  %v910_v8 = vadd.f32 %v4395_v61, %v874_v16  ;;  %v949_v21 = vmax.f32 %v917_v63, 0.0  ;;  %v4951_v10 = vld [vmem:[#allocation2 + $0xe0] sm:$0xff]  ;;  %v4956_v59 = vpop.f32.mrf.mxu2 }
 0x138   : > { %v4953_v13 = vld [vmem:[#allocation2 + $0xe1] sm:$0xff]  ;;  %v3635_v15 = vpack.i.bf16 %v4951_v10, %v4871_v20 }
 0x139   : > { %v942_v18 = vmax.f32 %v910_v8, 0.0  ;;  %1028 = vst.msk [vmem:[#allocation2 + $0x121] sm:$0xff] %vm959_vm1, %v949_v21  ;;  %v1038_v16 = vld [vmem:[#allocation2] sm:$0xff]  ;;  %v3438_v8 = vunpack.i.l.bf16 %v4869_v17 }
 0x13a   : > { %v4877_v28 = vld [vmem:[#allocation2 + $0xc1] sm:$0xff] }
 0x13b   : > { %v1243_v31 = vld [vmem:[#allocation2 + $0xc0] sm:$0xff]  ;;  %1021 = vst.msk [vmem:[#allocation2 + $0xc9] sm:$0xff] %vm959_vm1, %v942_v18  ;;  %3281 = vmatmul.msk.f32.gmra.mxu0 %vm959_vm1, %v4871_v20  ;;  %v3610_v2 = vpack.i.bf16 %v4877_v28, %v4816_v47  ;;  %v919_v47 = vadd.f32 %v4395_v61, %v883_v42 }
 0x13c   : > { %v3605_v32 = vpack.i.bf16 %v1243_v31, %v4783_v25  ;;  %v4927_v51 = vpop.f32.mrf.mxu0  ;;  %v3630_v4 = vpack.i.bf16 %v4925_v50, %v1243_v31 }
 0x13e   : > { %3601 = vrot.lane.b32.xlu0 %v3600_v62, %s3996_s15 }
 0x13f   : > { %3606 = vrot.lane.b32.xlu1 %v3605_v32, %s3997_s24  ;;  %3611 = vrot.lane.b32.xlu2 %v3610_v2, %s3998_s22  ;;  %v1166_v32 = vld [vmem:[#allocation2 + $0x19] sm:$0xff] }
 0x141   : > { %v4897_v26 = vpop.permute.xlu2 %3441 }
 0x142   : > { %v4899_v36 = vld [vmem:[#allocation2 + $0xc2] sm:$0xff]  ;;  %v4919_v49 = vld [vmem:[#allocation2 + $0xca] sm:$0xff]  ;;  %v3444_v52 = vunpack.i.h.bf16 %v4897_v26 }
 0x143   : > { %v4901_v25 = vld [vmem:[#allocation2 + $0xc9] sm:$0xff]  ;;  %3282 = vmatmul.msk.f32.gmra.mxu0 %vm959_vm1, %v4899_v36  ;;  %v3640_v27 = vpack.i.bf16 %v4899_v36, %v4814_v44  ;;  %v951_v44 = vmax.f32 %v919_v47, 0.0  ;;  %v3645_v60 = vpack.i.bf16 %v4919_v49, %v4845_v5  ;;  %v3419_v47 = vunpack.i.h.bf16 %v4911_v43 }
 0x144   : > { %v1244_v38 = vld [vmem:[#allocation2 + $0xc8] sm:$0xff]  ;;  %v3625_v9 = vpack.i.bf16 %v4901_v25, %v1242_v3  ;;  %v4949_v3 = vld [vmem:[#allocation2 + $0xda] sm:$0xff]  ;;  %v4965_v63 = vpop.f32.mrf.mxu0 }
 0x145   : > { %v3615_v24 = vpack.i.bf16 %v1244_v38, %v4809_v40  ;;  %v4921_v40 = vld [vmem:[#allocation2 + $0xd8] sm:$0xff]  ;;  %1030 = vst.msk [vmem:[#allocation2 + $0x139] sm:$0xff] %vm959_vm1, %v951_v44  ;;  %v3650_v12 = vpack.i.bf16 %v4949_v3, %v4877_v28  ;;  %v3655_v21 = vpack.i.bf16 %v4953_v13, %v1244_v38  ;;  %v2095_v28 = vsel %vm959_vm1, %v1038_v16, %v3418_v58 }
 0x146   : > { %3641 = vrot.lane.b32.xlu0 %v3640_v27, %s3996_s15  ;;  %v3620_v54 = vpack.i.bf16 %v4921_v40, %v4843_v1  ;;  %v2192_v38 = vsel %vm959_vm1, %v1166_v32, %v3438_v8  ;;  %v3660_v43 = vpack.i.bf16 %v4984_v41, %v4921_v40 }
 0x147   : > { %3616 = vrot.lane.b32.xlu1 %v3615_v24, %s3997_s24  ;;  %3626 = vrot.lane.b32.xlu2 %v3625_v9, %s3998_s22  ;;  %v4978_v9 = vld [vmem:[#allocation2 + $0xe2] sm:$0xff]  ;;  %v4980_v24 = vld [vmem:[#allocation2 + $0xf0] sm:$0xff] }
 0x148   : > { %v4944_v57 = vpop.permute.xlu0 %3421 }
 0x149   : > { %v4917_v48 = vpop.permute.xlu2 %3461  ;;  %v834_v45 = vpop.f32.mrf.mxu3  ;;  %v3423_v32 = vunpack.i.l.bf16 %v4944_v57 }
 0x14a   : > { %v884_v46 = vmul.f32 %v4384_v56, %v834_v45  ;;  %v3439_v45 = vunpack.i.h.bf16 %v4869_v17 }
 0x14b   : > { %3283 = vmatmul.msk.f32.gmra.mxu0 %vm959_vm1, %v4919_v49 }
 0x14c   : > { %v920_v1 = vadd.f32 %v4395_v61, %v884_v46  ;;  %v4999_v46 = vpop.f32.mrf.mxu2 }
 0x14e   : > { %3646 = vrot.lane.b32.xlu0 %v3645_v60, %s3996_s15  ;;  %v952_v14 = vmax.f32 %v920_v1, 0.0  ;;  %v3675_v60 = vpack.i.bf16 %v4978_v9, %v4901_v25  ;;  %v5005_v25 = vpop.f32.mrf.mxu0 }
 0x14f   : > { %3621 = vrot.lane.b32.xlu1 %v3620_v54, %s3997_s24  ;;  %3631 = vrot.lane.b32.xlu2 %v3630_v4, %s3998_s22  ;;  %v3427_v0 = vpop.permute.xlu1 %3426  ;;  %v3670_v54 = vpack.i.bf16 %v4980_v24, %v4899_v36  ;;  %v1039_v4 = vld [vmem:[#allocation2 + $0x8] sm:$0xff]  ;;  %v3443_v36 = vunpack.i.l.bf16 %v4897_v26  ;;  %v5016_v26 = vld [vmem:[%s5880_s4] ss:$0 sm:$0xff] }
 0x150   : > { %1031 = vst.msk [vmem:[#allocation2 + $0x141] sm:$0xff] %vm959_vm1, %v952_v14  ;;  %v3429_v22 = vunpack.i.h.bf16 %v3427_v0  ;;  %v3428_v31 = vunpack.i.l.bf16 %v3427_v0  ;;  %v2096_v1 = vsel %vm959_vm1, %v1039_v4, %v3419_v47 }
 0x151   : > { %v4947_v5 = vpop.permute.xlu2 %3471  ;;  %v837_v18 = vpop.f32.mrf.mxu3 }
 0x152   : > { %v885_v20 = vmul.f32 %v4384_v56, %v837_v18  ;;  %v2127_v56 = vsel %vm532_vm0, %v2095_v28, %v3428_v31  ;;  %v2224_v27 = vsel %vm532_vm0, %v2192_v38, %v3429_v22  ;;  %v5023_v22 = vld [vmem:[#allocation2 + $0xf8] sm:$0xff]  ;;  %v2128_v31 = vsel %vm532_vm0, %v2096_v1, %v3443_v36 }
 0x153   : > { %3284 = vmatmul.msk.f32.gmra.mxu0 %vm959_vm1, %v4949_v3  ;;  %v5027_v28 = vld [vmem:[#allocation2 + $0xf9] sm:$0xff]  ;;  %v3463_v1 = vunpack.i.l.bf16 %v4917_v48 }
 0x154   : > { %v921_v33 = vadd.f32 %v4395_v61, %v885_v20 }
 0x156   : > { %3651 = vrot.lane.b32.xlu0 %v3650_v12, %s3996_s15  ;;  %v953_v42 = vmax.f32 %v921_v33, 0.0  ;;  %v5011_v12 = vld [vmem:[#allocation2 + $0xf2] sm:$0xff] }
 0x157   : > { %3636 = vrot.lane.b32.xlu1 %v3635_v15, %s3997_s24  ;;  %3656 = vrot.lane.b32.xlu2 %v3655_v21, %s3998_s22  ;;  %v3432_v62 = vpop.permute.xlu1 %3431  ;;  %v1167_v15 = vld [vmem:[#allocation2 + $0x21] sm:$0xff] }
 0x158   : > { %v3447_v2 = vpop.permute.xlu0 %3446  ;;  %v3434_v34 = vunpack.i.h.bf16 %v3432_v62  ;;  %v3433_v7 = vunpack.i.l.bf16 %v3432_v62  ;;  %1032 = vst.msk [vmem:[#allocation2 + $0x151] sm:$0xff] %vm959_vm1, %v953_v42  ;;  %v2193_v18 = vsel %vm959_vm1, %v1167_v15, %v3439_v45  ;;  %v5032_v62 = vld [vmem:[%s5881_s5] ss:$0 sm:$0xff]  ;;  %v1168_v42 = vld [vmem:[#allocation2 + $0x31] sm:$0xff]  ;;  %v5069_v15 = vld [vmem:[#allocation2 + $0x109] sm:$0xff] }
 0x159   : > { %v4975_v35 = vpop.permute.xlu2 %3491  ;;  %v3449_v0 = vunpack.i.h.bf16 %v3447_v2  ;;  %v3448_v17 = vunpack.i.l.bf16 %v3447_v2  ;;  %v840_v14 = vpop.f32.mrf.mxu3  ;;  %v2225_v20 = vsel %vm532_vm0, %v2193_v18, %v3444_v52  ;;  %v3424_v18 = vunpack.i.h.bf16 %v4944_v57 }
 0x15a   : > { %v2160_v61 = vsel %vm2159_vm4, %v2127_v56, %v3433_v7  ;;  %v2256_v44 = vsel %vm2159_vm4, %v2224_v27, %v3434_v34  ;;  %v886_v16 = vmul.f32 %v5016_v26, %v840_v14  ;;  %v3680_v7 = vpack.i.bf16 %v5011_v12, %v4925_v50  ;;  %v1040_v50 = vld [vmem:[#allocation2 + $0x18] sm:$0xff] }
 0x15b   : > { %2436 = vmatmul.f32.vlgmr.msrb.gmra.mxu2 %v2160_v61  ;;  %2549 = vmatmul.f32.vlgmr.msrb.gmra.mxu3 %v2256_v44  ;;  %v2161_v33 = vsel %vm2159_vm4, %v2128_v31, %v3448_v17  ;;  %v2257_v34 = vsel %vm2159_vm4, %v2225_v20, %v3449_v0  ;;  %v3685_v27 = vpack.i.bf16 %v5023_v22, %v4919_v49  ;;  %v5061_v0 = vpop.f32.mrf.mxu0  ;;  %v3464_v17 = vunpack.i.h.bf16 %v4917_v48 }
 0x15c   : > { %3285 = vmatmul.msk.f32.gmra.mxu0 %vm959_vm1, %v4978_v9  ;;  %v922_v2 = vadd.f32 %v5032_v62, %v886_v16  ;;  %v3665_v61 = vpack.i.bf16 %v5027_v28, %v4951_v10  ;;  %v2097_v49 = vsel %vm959_vm1, %v1040_v50, %v3423_v32  ;;  %v3695_v57 = vpack.i.bf16 %v5069_v15, %v4980_v24  ;;  %v2865_v24 = vld [vmem:[%s5885_s9 + $0x10] sm:$0xff] }
 0x15d   : > { %2976 = vmatpush.msrb.mxu1 %v2865_v24  ;;  %v3474_v50 = vunpack.i.h.bf16 %v4947_v5  ;;  %v3493_v24 = vunpack.i.l.bf16 %v4975_v35 }
 0x15e   : > { %3676 = vrot.lane.b32.xlu0 %v3675_v60, %s3996_s15  ;;  %v954_v47 = vmax.f32 %v922_v2, 0.0  ;;  %v5054_v60 = vpop.f32.mrf.mxu2 }
 0x15f   : > { %3671 = vrot.lane.b32.xlu1 %v3670_v54, %s3997_s24  ;;  %3661 = vrot.lane.b32.xlu2 %v3660_v43, %s3998_s22  ;;  %v5052_v54 = vld [vmem:[#allocation2 + $0x108] sm:$0xff] }
 0x160   : > { %v5009_v40 = vpop.permute.xlu0 %3451  ;;  %v3457_v58 = vpop.permute.xlu1 %3456  ;;  %1033 = vst.msk [vmem:[#allocation2 + $0x159] sm:$0xff] %vm959_vm1, %v954_v47  ;;  %v3690_v16 = vpack.i.bf16 %v5052_v54, %v4949_v3  ;;  %v1041_v3 = vld [vmem:[#allocation2 + $0x20] sm:$0xff] }
 0x161   : > { %v3453_v8 = vunpack.i.l.bf16 %v5009_v40  ;;  %v5020_v21 = vpop.permute.xlu2 %3501  ;;  %v3459_v38 = vunpack.i.h.bf16 %v3457_v58  ;;  %v3458_v56 = vunpack.i.l.bf16 %v3457_v58  ;;  %v843_v4 = vpop.f32.mrf.mxu3  ;;  %v5067_v58 = vld [vmem:[#allocation2 + $0xfa] sm:$0xff]  ;;  %v3454_v31 = vunpack.i.h.bf16 %v5009_v40 }
 0x162   : > { %v887_v36 = vmul.f32 %v5016_v26, %v843_v4  ;;  %v1169_v40 = vld [vmem:[#allocation2 + $0x39] sm:$0xff] }
 0x163   : > { %2439 = vmatmul.f32.gmra.mxu2 %v2161_v33  ;;  %2552 = vmatmul.f32.gmra.mxu3 %v2257_v34  ;;  %v2194_v44 = vsel %vm959_vm1, %v1168_v42, %v3453_v8  ;;  %v2129_v43 = vsel %vm532_vm0, %v2097_v49, %v3458_v56  ;;  %v3700_v33 = vpack.i.bf16 %v5067_v58, %v4953_v13  ;;  %v3473_v49 = vunpack.i.l.bf16 %v4947_v5 }
 0x164   : > { %3286 = vmatmul.msk.f32.gmra.mxu0 %vm959_vm1, %v5011_v12  ;;  %v2226_v52 = vsel %vm532_vm0, %v2194_v44, %v3459_v38  ;;  %v923_v8 = vadd.f32 %v5032_v62, %v887_v36  ;;  %v2162_v20 = vsel %vm2159_vm4, %v2129_v43, %v3463_v1  ;;  %v2195_v13 = vsel %vm959_vm1, %v1169_v40, %v3454_v31  ;;  %v5090_v38 = vld [vmem:[#allocation2 + $0x110] sm:$0xff]  ;;  %v5113_v1 = vpop.f32.mrf.mxu0 }
 0x165   : > { %v2258_v2 = vsel %vm2159_vm4, %v2226_v52, %v3464_v17  ;;  %v5108_v52 = vld [vmem:[#allocation2 + $0x111] sm:$0xff]  ;;  %v3705_v36 = vpack.i.bf16 %v5090_v38, %v4978_v9 }
 0x166   : > { %3681 = vrot.lane.b32.xlu0 %v3680_v7, %s3996_s15  ;;  %v955_v34 = vmax.f32 %v923_v8, 0.0  ;;  %v2098_v7 = vsel %vm959_vm1, %v1041_v3, %v3424_v18  ;;  %v5106_v43 = vpop.f32.mrf.mxu2 }
 0x167   : > { %3686 = vrot.lane.b32.xlu1 %v3685_v27, %s3997_s24  ;;  %3666 = vrot.lane.b32.xlu2 %v3665_v61, %s3998_s22 }
 0x168   : > { %v5056_v10 = vpop.permute.xlu0 %3476  ;;  %1034 = vst.msk [vmem:[#allocation2 + $0x169] sm:$0xff] %vm959_vm1, %v955_v34  ;;  %v5131_v34 = vld [vmem:[#allocation2 + $0x120] sm:$0xff] }
 0x169   : > { %v3467_v45 = vpop.permute.xlu1 %3466  ;;  %v5065_v14 = vpop.permute.xlu2 %3521  ;;  %v3478_v8 = vunpack.i.l.bf16 %v5056_v10 }
 0x16a   : > { %v3469_v48 = vunpack.i.h.bf16 %v3467_v45  ;;  %v3468_v32 = vunpack.i.l.bf16 %v3467_v45  ;;  %v846_v56 = vpop.f32.mrf.mxu3  ;;  %v5104_v45 = vld [vmem:[#allocation2 + $0x10a] sm:$0xff] }
 0x16b   : > { %2442 = vmatmul.f32.gmra.mxu2 %v2162_v20  ;;  %2555 = vmatmul.f32.gmra.mxu3 %v2258_v2  ;;  %v888_v44 = vmul.f32 %v5016_v26, %v846_v56  ;;  %v3715_v2 = vpack.i.bf16 %v5104_v45, %v4984_v41  ;;  %v3494_v56 = vunpack.i.h.bf16 %v4975_v35 }
 0x16c   : > { %3287 = vmatmul.msk.f32.gmra.mxu0 %vm959_vm1, %v5067_v58  ;;  %v2130_v47 = vsel %vm532_vm0, %v2098_v7, %v3468_v32  ;;  %v2227_v61 = vsel %vm532_vm0, %v2195_v13, %v3469_v48  ;;  %v3710_v48 = vpack.i.bf16 %v5108_v52, %v5023_v22  ;;  %v1170_v32 = vld [vmem:[#allocation2 + $0x49] sm:$0xff] }
 0x16d   : > { %v924_v17 = vadd.f32 %v5032_v62, %v888_v44  ;;  %v2163_v5 = vsel %vm2159_vm4, %v2130_v47, %v3473_v49  ;;  %v2259_v18 = vsel %vm2159_vm4, %v2227_v61, %v3474_v50  ;;  %v5142_v47 = vld [vmem:[#allocation2 + $0x112] sm:$0xff]  ;;  %v5144_v61 = vld [vmem:[#allocation2 + $0x121] sm:$0xff]  ;;  %v3720_v44 = vpack.i.bf16 %v5131_v34, %v5011_v12 }
 0x16e   : > { %3701 = vrot.lane.b32.xlu0 %v3700_v33, %s3996_s15  ;;  %v5153_v35 = vpop.f32.mrf.mxu2 }
 0x16f   : > { %3691 = vrot.lane.b32.xlu1 %v3690_v16, %s3997_s24  ;;  %3696 = vrot.lane.b32.xlu2 %v3695_v57, %s3998_s22  ;;  %v3479_v16 = vunpack.i.h.bf16 %v5056_v10  ;;  %v956_v9 = vmax.f32 %v924_v17, 0.0  ;;  %v1042_v10 = vld [vmem:[#allocation2 + $0x30] sm:$0xff] }
 0x170   : > { %v5095_v27 = vpop.permute.xlu0 %3481  ;;  %v2099_v33 = vsel %vm959_vm1, %v1042_v10, %v3478_v8 }
 0x171   : > { %v3487_v42 = vpop.permute.xlu1 %3486  ;;  %v5102_v4 = vpop.permute.xlu2 %3531  ;;  %1035 = vst.msk [vmem:[#allocation2 + $0x171] sm:$0xff] %vm959_vm1, %v956_v9  ;;  %v2196_v41 = vsel %vm959_vm1, %v1170_v32, %v3479_v16  ;;  %v3484_v49 = vunpack.i.h.bf16 %v5095_v27 }
 0x172   : > { %v3489_v31 = vunpack.i.h.bf16 %v3487_v42  ;;  %v3488_v20 = vunpack.i.l.bf16 %v3487_v42 }
 0x173   : > { %2445 = vmatmul.f32.gmra.mxu2 %v2163_v5  ;;  %2558 = vmatmul.f32.gmra.mxu3 %v2259_v18  ;;  %v849_v57 = vpop.f32.mrf.mxu3  ;;  %v3730_v18 = vpack.i.bf16 %v5142_v47, %v5027_v28 }
 0x174   : > { %3288 = vmatmul.msk.f32.gmra.mxu0 %vm959_vm1, %v5104_v45  ;;  %v2131_v22 = vsel %vm532_vm0, %v2099_v33, %v3488_v20  ;;  %v2228_v7 = vsel %vm532_vm0, %v2196_v41, %v3489_v31  ;;  %v889_v13 = vmul.f32 %v5016_v26, %v849_v57  ;;  %v5157_v31 = vpop.f32.mrf.mxu0  ;;  %v1043_v20 = vld [vmem:[#allocation2 + $0x38] sm:$0xff] }
 0x175   : > { %v2164_v17 = vsel %vm2159_vm4, %v2131_v22, %v3493_v24  ;;  %v2260_v16 = vsel %vm2159_vm4, %v2228_v7, %v3494_v56  ;;  %v3503_v22 = vunpack.i.l.bf16 %v5020_v21  ;;  %v5182_v56 = vld [vmem:[#allocation2 + $0x129] sm:$0xff] }
 0x176   : > { %3716 = vrot.lane.b32.xlu0 %v3715_v2, %s3996_s15  ;;  %v925_v50 = vadd.f32 %v5032_v62, %v889_v13  ;;  %v1171_v2 = vld [vmem:[#allocation2 + $0x51] sm:$0xff]  ;;  %v5180_v13 = vld [vmem:[#allocation2 + $0x122] sm:$0xff] }
 0x177   : > { %3706 = vrot.lane.b32.xlu1 %v3705_v36, %s3997_s24  ;;  %3711 = vrot.lane.b32.xlu2 %v3710_v48, %s3998_s22  ;;  %v3483_v36 = vunpack.i.l.bf16 %v5095_v27  ;;  %v3725_v27 = vpack.i.bf16 %v5144_v61, %v5052_v54  ;;  %v2197_v9 = vsel %vm959_vm1, %v1171_v2, %v3484_v49  ;;  %v5169_v48 = vld [vmem:[#allocation2 + $0x128] sm:$0xff] }
 0x178   : > { %v5133_v40 = vpop.permute.xlu0 %3506  ;;  %v957_v12 = vmax.f32 %v925_v50, 0.0  ;;  %v3735_v24 = vpack.i.bf16 %v5169_v48, %v5067_v58  ;;  %v5197_v58 = vpop.f32.mrf.mxu2 }
 0x179   : > { %v3497_v3 = vpop.permute.xlu1 %3496  ;;  %v5140_v42 = vpop.permute.xlu2 %3551  ;;  %v2100_v28 = vsel %vm959_vm1, %v1043_v20, %v3483_v36  ;;  %v3509_v50 = vunpack.i.h.bf16 %v5133_v40  ;;  %v3508_v49 = vunpack.i.l.bf16 %v5133_v40  ;;  %v1044_v40 = vld [vmem:[#allocation2 + $0x48] sm:$0xff] }
 0x17a   : > { %v3499_v8 = vunpack.i.h.bf16 %v3497_v3  ;;  %v3498_v5 = vunpack.i.l.bf16 %v3497_v3  ;;  %1036 = vst.msk [vmem:[#allocation2 + $0x181] sm:$0xff] %vm959_vm1, %v957_v12  ;;  %v3504_v3 = vunpack.i.h.bf16 %v5020_v21 }
 0x17b   : > { %2448 = vmatmul.f32.gmra.mxu2 %v2164_v17  ;;  %2561 = vmatmul.f32.gmra.mxu3 %v2260_v16  ;;  %v3745_v16 = vpack.i.bf16 %v5180_v13, %v5069_v15  ;;  %v2101_v15 = vsel %vm959_vm1, %v1044_v40, %v3508_v49 }
 0x17c   : > { %3289 = vmatmul.msk.f32.gmra.mxu0 %vm959_vm1, %v5142_v47  ;;  %v2132_v33 = vsel %vm532_vm0, %v2100_v28, %v3498_v5  ;;  %v2229_v41 = vsel %vm532_vm0, %v2197_v9, %v3499_v8  ;;  %v1172_v5 = vld [vmem:[#allocation2 + $0x61] sm:$0xff]  ;;  %v3524_v28 = vunpack.i.h.bf16 %v5065_v14  ;;  %v3523_v9 = vunpack.i.l.bf16 %v5065_v14 }
 0x17d   : > { %v2261_v36 = vsel %vm2159_vm4, %v2229_v41, %v3504_v3  ;;  %v2198_v12 = vsel %vm959_vm1, %v1172_v5, %v3509_v50  ;;  %v5217_v41 = vld [vmem:[#allocation2 + $0x139] sm:$0xff]  ;;  %v3534_v5 = vunpack.i.h.bf16 %v5102_v4 }
 0x17e   : > { %3731 = vrot.lane.b32.xlu0 %v3730_v18, %s3996_s15  ;;  %v852_v10 = vpop.f32.mrf.mxu3  ;;  %v5202_v18 = vpop.f32.mrf.mxu0 }
 0x17f   : > { %3721 = vrot.lane.b32.xlu1 %v3720_v44, %s3997_s24  ;;  %3726 = vrot.lane.b32.xlu2 %v3725_v27, %s3998_s22  ;;  %v890_v57 = vmul.f32 %v5016_v26, %v852_v10  ;;  %v2165_v26 = vsel %vm2159_vm4, %v2132_v33, %v3503_v22  ;;  %v5215_v33 = vld [vmem:[#allocation2 + $0x138] sm:$0xff] }
 0x180   : > { %v5171_v32 = vpop.permute.xlu0 %3511  ;;  %v3750_v14 = vpack.i.bf16 %v5215_v33, %v5104_v45 }
 0x181   : > { %v3517_v54 = vpop.permute.xlu1 %3516  ;;  %v5178_v7 = vpop.permute.xlu2 %3561  ;;  %v926_v44 = vadd.f32 %v5032_v62, %v890_v57  ;;  %v3740_v62 = vpack.i.bf16 %v5182_v56, %v5090_v38  ;;  %v3514_v57 = vunpack.i.h.bf16 %v5171_v32  ;;  %v3513_v3 = vunpack.i.l.bf16 %v5171_v32 }
 0x182   : > { %v3519_v21 = vunpack.i.h.bf16 %v3517_v54  ;;  %v3518_v17 = vunpack.i.l.bf16 %v3517_v54  ;;  %v5213_v54 = vld [vmem:[#allocation2 + $0x12a] sm:$0xff]  ;;  %v3755_v32 = vpack.i.bf16 %v5217_v41, %v5131_v34 }
 0x183   : > { %2451 = vmatmul.f32.gmra.mxu2 %v2165_v26  ;;  %2564 = vmatmul.f32.gmra.mxu3 %v2261_v36  ;;  %v958_v8 = vmax.f32 %v926_v44, 0.0  ;;  %v3760_v49 = vpack.i.bf16 %v5213_v54, %v5108_v52  ;;  %v1045_v26 = vld [vmem:[#allocation2 + $0x50] sm:$0xff]  ;;  %v2864_v52 = vld [vmem:[%s5885_s9 + $0x8] sm:$0xff] }
 0x184   : > { %3290 = vmatmul.msk.f32.gmra.mxu0 %vm959_vm1, %v5180_v13  ;;  %v2133_v20 = vsel %vm532_vm0, %v2101_v15, %v3518_v17  ;;  %v2230_v2 = vsel %vm532_vm0, %v2198_v12, %v3519_v21  ;;  %v1173_v36 = vld [vmem:[#allocation2 + $0x69] sm:$0xff]  ;;  %v2102_v21 = vsel %vm959_vm1, %v1045_v26, %v3513_v3  ;;  %v5236_v17 = vpop.f32.mrf.mxu2  ;;  %2977 = vmatpush.msrb.mxu1 %v2864_v52  ;;  %v3533_v15 = vunpack.i.l.bf16 %v5102_v4 }
 0x185   : > { %1037 = vst.msk [vmem:[#allocation2 + $0x189] sm:$0xff] %vm959_vm1, %v958_v8  ;;  %v2166_v22 = vsel %vm2159_vm4, %v2133_v20, %v3523_v9  ;;  %v2199_v45 = vsel %vm959_vm1, %v1173_v36, %v3514_v57  ;;  %v5253_v20 = vld [vmem:[#allocation2 + $0x140] sm:$0xff] }
 0x186   : > { %3746 = vrot.lane.b32.xlu0 %v3745_v16, %s3996_s15  ;;  %v5245_v40 = vpop.f32.mrf.mxu0  ;;  %v3765_v4 = vpack.i.bf16 %v5253_v20, %v5142_v47  ;;  %v5278_v52 = vld [vmem:[#allocation2 + $0x142] sm:$0xff] }
 0x187   : > { %3736 = vrot.lane.b32.xlu1 %v3735_v24, %s3997_s24  ;;  %3741 = vrot.lane.b32.xlu2 %v3740_v62, %s3998_s22  ;;  %v2262_v24 = vsel %vm2159_vm4, %v2230_v2, %v3524_v28  ;;  %v5255_v2 = vld [vmem:[#allocation2 + $0x141] sm:$0xff] }
 0x188   : > { %v3537_v38 = vpop.permute.xlu0 %3536 }
 0x189   : > { %v3527_v27 = vpop.permute.xlu1 %3526  ;;  %v5211_v10 = vpop.permute.xlu2 %3581  ;;  %v3539_v28 = vunpack.i.h.bf16 %v3537_v38  ;;  %v3538_v9 = vunpack.i.l.bf16 %v3537_v38  ;;  %v3770_v38 = vpack.i.bf16 %v5255_v2, %v5169_v48  ;;  %v3554_v48 = vunpack.i.h.bf16 %v5140_v42 }
 0x18a   : > { %v3529_v44 = vunpack.i.h.bf16 %v3527_v27  ;;  %v3528_v50 = vunpack.i.l.bf16 %v3527_v27  ;;  %v5251_v27 = vld [vmem:[#allocation2 + $0x13a] sm:$0xff] }
 0x18b   : > { %2454 = vmatmul.f32.gmra.mxu2 %v2166_v22  ;;  %2567 = vmatmul.f32.gmra.mxu3 %v2262_v24 }
 0x18c   : > { %3291 = vmatmul.msk.f32.gmra.mxu0 %vm959_vm1, %v5213_v54  ;;  %v2134_v8 = vsel %vm532_vm0, %v2102_v21, %v3528_v50  ;;  %v2231_v62 = vsel %vm532_vm0, %v2199_v45, %v3529_v44  ;;  %v3775_v44 = vpack.i.bf16 %v5251_v27, %v5144_v61  ;;  %v1046_v50 = vld [vmem:[#allocation2 + $0x60] sm:$0xff]  ;;  %v3553_v21 = vunpack.i.l.bf16 %v5140_v42 }
 0x18d   : > { %v2167_v57 = vsel %vm2159_vm4, %v2134_v8, %v3533_v15  ;;  %v2263_v3 = vsel %vm2159_vm4, %v2231_v62, %v3534_v5  ;;  %v5282_v8 = vpop.f32.mrf.mxu2  ;;  %v5284_v62 = vld [vmem:[#allocation2 + $0x151] sm:$0xff] }
 0x18e   : > { %3761 = vrot.lane.b32.xlu0 %v3760_v49, %s3996_s15  ;;  %v2103_v49 = vsel %vm959_vm1, %v1046_v50, %v3538_v9  ;;  %v5286_v5 = vpop.f32.mrf.mxu0 }
 0x18f   : > { %3751 = vrot.lane.b32.xlu1 %v3750_v14, %s3997_s24  ;;  %3756 = vrot.lane.b32.xlu2 %v3755_v32, %s3998_s22  ;;  %v1174_v14 = vld [vmem:[#allocation2 + $0x79] sm:$0xff] }
 0x190   : > { %v5241_v16 = vpop.permute.xlu0 %3541  ;;  %v2200_v47 = vsel %vm959_vm1, %v1174_v14, %v3539_v28 }
 0x191   : > { %v3547_v34 = vpop.permute.xlu1 %3546  ;;  %v5249_v12 = vpop.permute.xlu2 %3591  ;;  %v3544_v15 = vunpack.i.h.bf16 %v5241_v16  ;;  %v3543_v28 = vunpack.i.l.bf16 %v5241_v16  ;;  %v3785_v16 = vpack.i.bf16 %v5284_v62, %v5215_v33  ;;  %v3564_v33 = vunpack.i.h.bf16 %v5178_v7 }
 0x192   : > { %v3549_v22 = vunpack.i.h.bf16 %v3547_v34  ;;  %v3548_v24 = vunpack.i.l.bf16 %v3547_v34  ;;  %v5280_v34 = vld [vmem:[#allocation2 + $0x150] sm:$0xff] }
 0x193   : > { %2457 = vmatmul.f32.gmra.mxu2 %v2167_v57  ;;  %2570 = vmatmul.f32.gmra.mxu3 %v2263_v3 }
 0x194   : > { %3292 = vmatmul.msk.f32.gmra.mxu0 %vm959_vm1, %v5251_v27  ;;  %v2135_v26 = vsel %vm532_vm0, %v2103_v49, %v3548_v24  ;;  %v2232_v36 = vsel %vm532_vm0, %v2200_v47, %v3549_v22  ;;  %v3780_v22 = vpack.i.bf16 %v5280_v34, %v5180_v13  ;;  %v3790_v24 = vpack.i.bf16 %v5278_v52, %v5182_v56 }
 0x195   : > { %v2168_v9 = vsel %vm2159_vm4, %v2135_v26, %v3553_v21  ;;  %v2264_v42 = vsel %vm2159_vm4, %v2232_v36, %v3554_v48  ;;  %v3563_v47 = vunpack.i.l.bf16 %v5178_v7  ;;  %v5313_v26 = vld [vmem:[#allocation2 + $0x152] sm:$0xff] }
 0x196   : > { %3776 = vrot.lane.b32.xlu0 %v3775_v44, %s3996_s15  ;;  %v1175_v44 = vld [vmem:[#allocation2 + $0x81] sm:$0xff]  ;;  %v5315_v36 = vld [vmem:[#allocation2 + $0x158] sm:$0xff] }
 0x197   : > { %3766 = vrot.lane.b32.xlu1 %v3765_v4, %s3997_s24  ;;  %3771 = vrot.lane.b32.xlu2 %v3770_v38, %s3998_s22  ;;  %v1047_v4 = vld [vmem:[#allocation2 + $0x68] sm:$0xff]  ;;  %v2201_v13 = vsel %vm959_vm1, %v1175_v44, %v3544_v15  ;;  %v5317_v48 = vld [vmem:[#allocation2 + $0x159] sm:$0xff]  ;;  %v3795_v7 = vpack.i.bf16 %v5315_v36, %v5213_v54 }
 0x198   : > { %v3567_v61 = vpop.permute.xlu0 %3566  ;;  %v2104_v38 = vsel %vm959_vm1, %v1047_v4, %v3543_v28  ;;  %v1176_v4 = vld [vmem:[#allocation2 + $0x91] sm:$0xff] }
 0x199   : > { %v3557_v32 = vpop.permute.xlu1 %3556  ;;  %v5276_v45 = vpop.permute.xlu2 %3611  ;;  %v3569_v21 = vunpack.i.h.bf16 %v3567_v61  ;;  %v3568_v15 = vunpack.i.l.bf16 %v3567_v61  ;;  %v3800_v61 = vpack.i.bf16 %v5317_v48, %v5253_v20  ;;  %v3584_v20 = vunpack.i.h.bf16 %v5211_v10 }
 0x19a   : > { %v3559_v57 = vunpack.i.h.bf16 %v3557_v32  ;;  %v3558_v3 = vunpack.i.l.bf16 %v3557_v32 }
 0x19b   : > { %2460 = vmatmul.f32.gmra.mxu2 %v2168_v9  ;;  %2573 = vmatmul.f32.gmra.mxu3 %v2264_v42  ;;  %v5321_v42 = vpop.f32.mrf.mxu2 }
 0x19c   : > { %3293 = vmatmul.msk.f32.gmra.mxu0 %vm959_vm1, %v5278_v52  ;;  %v2136_v14 = vsel %vm532_vm0, %v2104_v38, %v3558_v3  ;;  %v2233_v49 = vsel %vm532_vm0, %v2201_v13, %v3559_v57 }
 0x19d   : > { %v2169_v28 = vsel %vm2159_vm4, %v2136_v14, %v3563_v47  ;;  %v2265_v9 = vsel %vm2159_vm4, %v2233_v49, %v3564_v33  ;;  %v3583_v14 = vunpack.i.l.bf16 %v5211_v10  ;;  %v5344_v33 = vld [vmem:[#allocation2 + $0x15a] sm:$0xff]  ;;  %v5346_v47 = vld [vmem:[#allocation2 + $0x168] sm:$0xff] }
 0x19e   : > { %3791 = vrot.lane.b32.xlu0 %v3790_v24, %s3996_s15  ;;  %v5327_v24 = vpop.f32.mrf.mxu0  ;;  %v3810_v10 = vpack.i.bf16 %v5346_v47, %v5251_v27 }
 0x19f   : > { %3781 = vrot.lane.b32.xlu1 %v3780_v22, %s3997_s24  ;;  %3786 = vrot.lane.b32.xlu2 %v3785_v16, %s3998_s22  ;;  %v3805_v22 = vpack.i.bf16 %v5313_v26, %v5217_v41  ;;  %v1048_v16 = vld [vmem:[#allocation2 + $0x78] sm:$0xff]  ;;  %v2202_v41 = vsel %vm959_vm1, %v1176_v4, %v3569_v21 }
 0x1a0   : > { %v5305_v50 = vpop.permute.xlu0 %3571  ;;  %v2105_v54 = vsel %vm959_vm1, %v1048_v16, %v3568_v15  ;;  %v1049_v16 = vld [vmem:[#allocation2 + $0x80] sm:$0xff] }
 0x1a1   : > { %v3577_v56 = vpop.permute.xlu1 %3576  ;;  %v5311_v32 = vpop.permute.xlu2 %3626  ;;  %v3574_v21 = vunpack.i.h.bf16 %v5305_v50  ;;  %v3573_v15 = vunpack.i.l.bf16 %v5305_v50  ;;  %v1177_v4 = vld [vmem:[#allocation2 + $0x99] sm:$0xff] }
 0x1a2   : > { %v3579_v57 = vunpack.i.h.bf16 %v3577_v56  ;;  %v3578_v3 = vunpack.i.l.bf16 %v3577_v56 }
 0x1a3   : > { %2463 = vmatmul.f32.gmra.mxu2 %v2169_v28  ;;  %2576 = vmatmul.f32.gmra.mxu3 %v2265_v9  ;;  %v5348_v28 = vld [vmem:[#allocation2 + $0x169] sm:$0xff]  ;;  %v2106_v27 = vsel %vm959_vm1, %v1049_v16, %v3573_v15 }
 0x1a4   : > { %3294 = vmatmul.msk.f32.gmra.mxu0 %vm959_vm1, %v5313_v26  ;;  %v2137_v13 = vsel %vm532_vm0, %v2105_v54, %v3578_v3  ;;  %v2234_v56 = vsel %vm532_vm0, %v2202_v41, %v3579_v57  ;;  %v3815_v50 = vpack.i.bf16 %v5348_v28, %v5280_v34  ;;  %v2863_v34 = vld [vmem:[%s5885_s9] sm:$0xff]  ;;  %v5380_v15 = vld [vmem:[#allocation2 + $0x16a] sm:$0xff] }
 0x1a5   : > { %v2170_v9 = vsel %vm2159_vm4, %v2137_v13, %v3583_v14  ;;  %v2266_v57 = vsel %vm2159_vm4, %v2234_v56, %v3584_v20  ;;  %2978 = vmatpush.msrb.mxu1 %v2863_v34  ;;  %v3594_v20 = vunpack.i.h.bf16 %v5249_v12  ;;  %v3593_v14 = vunpack.i.l.bf16 %v5249_v12 }
 0x1a6   : > { %3806 = vrot.lane.b32.xlu0 %v3805_v22, %s3996_s15  ;;  %v3820_v22 = vpack.i.bf16 %v5344_v33, %v5255_v2  ;;  %v5366_v54 = vpop.f32.mrf.mxu0  ;;  %v2203_v2 = vsel %vm959_vm1, %v1177_v4, %v3574_v21  ;;  %v5382_v21 = vld [vmem:[#allocation2 + $0x170] sm:$0xff]  ;;  %v3835_v4 = vpack.i.bf16 %v5380_v15, %v5284_v62 }
 0x1a7   : > { %3796 = vrot.lane.b32.xlu1 %v3795_v7, %s3997_s24  ;;  %3801 = vrot.lane.b32.xlu2 %v3800_v61, %s3998_s22  ;;  %v5362_v61 = vpop.f32.mrf.mxu2  ;;  %v3825_v12 = vpack.i.bf16 %v5382_v21, %v5278_v52 }
 0x1a8   : > { %v3597_v38 = vpop.permute.xlu0 %3596 }
 0x1a9   : > { %v3587_v44 = vpop.permute.xlu1 %3586  ;;  %v5342_v49 = vpop.permute.xlu2 %3631 }
 0x1aa   : > { %v3589_v3 = vunpack.i.h.bf16 %v3587_v44  ;;  %v3588_v7 = vunpack.i.l.bf16 %v3587_v44 }
 0x1ab   : > { %2466 = vmatmul.f32.gmra.mxu2 %v2170_v9  ;;  %2579 = vmatmul.f32.gmra.mxu3 %v2266_v57  ;;  %v5384_v57 = vld [vmem:[#allocation2 + $0x171] sm:$0xff] }
 0x1ac   : > { %3295 = vmatmul.msk.f32.gmra.mxu0 %vm959_vm1, %v5344_v33  ;;  %v2138_v13 = vsel %vm532_vm0, %v2106_v27, %v3588_v7  ;;  %v2235_v56 = vsel %vm532_vm0, %v2203_v2, %v3589_v3  ;;  %v1050_v27 = vld [vmem:[#allocation2 + $0x90] sm:$0xff] }
 0x1ad   : > { %v2267_v7 = vsel %vm2159_vm4, %v2235_v56, %v3594_v20  ;;  %v1178_v2 = vld [vmem:[#allocation2 + $0xa9] sm:$0xff] }
 0x1ae   : > { %3821 = vrot.lane.b32.xlu0 %v3820_v22, %s3996_s15  ;;  %v3598_v22 = vunpack.i.l.bf16 %v3597_v38  ;;  %v5405_v20 = vpop.f32.mrf.mxu0 }
 0x1af   : > { %3811 = vrot.lane.b32.xlu1 %v3810_v10, %s3997_s24  ;;  %3816 = vrot.lane.b32.xlu2 %v3815_v50, %s3998_s22  ;;  %v3599_v10 = vunpack.i.h.bf16 %v3597_v38  ;;  %v2171_v50 = vsel %vm2159_vm4, %v2138_v13, %v3593_v14  ;;  %v3830_v38 = vpack.i.bf16 %v5384_v57, %v5315_v36  ;;  %v3614_v14 = vunpack.i.h.bf16 %v5276_v45 }
 0x1b0   : > { %v3602_v41 = vpop.permute.xlu0 %3601  ;;  %v2107_v34 = vsel %vm959_vm1, %v1050_v27, %v3598_v22  ;;  %v5413_v22 = vld [vmem:[#allocation2 + $0x180] sm:$0xff] }
 0x1b1   : > { %v3607_v44 = vpop.permute.xlu1 %3606  ;;  %v5378_v9 = vpop.permute.xlu2 %3656  ;;  %v2204_v52 = vsel %vm959_vm1, %v1178_v2, %v3599_v10  ;;  %v1291_v10 = vld [vmem:[#allocation2 + $0x181] sm:$0xff] }
 0x1b2   : > { %v3609_v3 = vunpack.i.h.bf16 %v3607_v44  ;;  %v3608_v16 = vunpack.i.l.bf16 %v3607_v44  ;;  %v5401_v44 = vpop.f32.mrf.mxu2 }
 0x1b3   : > { %2469 = vmatmul.f32.gmra.mxu2 %v2171_v50  ;;  %2582 = vmatmul.f32.gmra.mxu3 %v2267_v7  ;;  %5900 = vst [vmem:[#allocation13_spill] sm:$0xff] %v5401_v44  ;;  %v3613_v50 = vunpack.i.l.bf16 %v5276_v45  ;;  %v3840_v45 = vpack.i.bf16 %v5413_v22, %v5313_v26 }
 0x1b4   : > { %3296 = vmatmul.msk.f32.gmra.mxu0 %vm959_vm1, %v5380_v15  ;;  %v2139_v56 = vsel %vm532_vm0, %v2107_v34, %v3608_v16  ;;  %v2236_v36 = vsel %vm532_vm0, %v2204_v52, %v3609_v3  ;;  %v3845_v52 = vpack.i.bf16 %v1291_v10, %v5346_v47  ;;  %v3629_v47 = vunpack.i.h.bf16 %v5311_v32 }
 0x1b5   : > { %v2172_v27 = vsel %vm2159_vm4, %v2139_v56, %v3613_v50  ;;  %v2268_v16 = vsel %vm2159_vm4, %v2236_v36, %v3614_v14  ;;  %v1179_v56 = vld [vmem:[#allocation2 + $0xb1] sm:$0xff]  ;;  %v3628_v10 = vunpack.i.l.bf16 %v5311_v32 }
 0x1b6   : > { %3836 = vrot.lane.b32.xlu0 %v3835_v4, %s3996_s15  ;;  %v3604_v4 = vunpack.i.h.bf16 %v3602_v41 }
 0x1b7   : > { %3826 = vrot.lane.b32.xlu1 %v3825_v12, %s3997_s24  ;;  %3831 = vrot.lane.b32.xlu2 %v3830_v38, %s3998_s22  ;;  %v5411_v12 = vld [vmem:[#allocation2 + $0x172] sm:$0xff]  ;;  %v3603_v38 = vunpack.i.l.bf16 %v3602_v41 }
 0x1b8   : > { %v3642_v13 = vpop.permute.xlu0 %3641  ;;  %v3850_v34 = vpack.i.bf16 %v5411_v12, %v5317_v48  ;;  %v1051_v41 = vld [vmem:[#allocation2 + $0x98] sm:$0xff]  ;;  %v2205_v26 = vsel %vm959_vm1, %v1179_v56, %v3604_v4  ;;  %v5441_v4 = vpop.f32.mrf.mxu0 }
 0x1b9   : > { %v3617_v62 = vpop.permute.xlu1 %3616  ;;  %v5409_v7 = vpop.permute.xlu2 %3661 }
 0x1ba   : > { %v3619_v3 = vunpack.i.h.bf16 %v3617_v62  ;;  %v3618_v2 = vunpack.i.l.bf16 %v3617_v62  ;;  %v2108_v62 = vsel %vm959_vm1, %v1051_v41, %v3603_v38  ;;  %v5439_v38 = vld [vmem:[#allocation2 + $0x189] sm:$0xff]  ;;  %v3643_v41 = vunpack.i.l.bf16 %v3642_v13 }
 0x1bb   : > { %2472 = vmatmul.f32.gmra.mxu2 %v2172_v27  ;;  %2585 = vmatmul.f32.gmra.mxu3 %v2268_v16  ;;  %v1323_v16 = vld [vmem:[#allocation2 + $0x182] sm:$0xff] }
 0x1bc   : > { %3297 = vmatmul.msk.f32.gmra.mxu0 %vm959_vm1, %v5411_v12  ;;  %v2140_v48 = vsel %vm532_vm0, %v2108_v62, %v3618_v2  ;;  %v2237_v50 = vsel %vm532_vm0, %v2205_v26, %v3619_v3  ;;  %v3875_v26 = vpack.i.bf16 %v1323_v16, %v5348_v28 }
 0x1bd   : > { %v2173_v2 = vsel %vm2159_vm4, %v2140_v48, %v3628_v10  ;;  %v2269_v3 = vsel %vm2159_vm4, %v2237_v50, %v3629_v47  ;;  %v1180_v48 = vld [vmem:[#allocation2 + $0xc1] sm:$0xff] }
 0x1be   : > { %3851 = vrot.lane.b32.xlu0 %v3850_v34, %s3996_s15  ;;  %v5437_v34 = vpop.f32.mrf.mxu2 }
 0x1bf   : > { %3841 = vrot.lane.b32.xlu1 %v3840_v45, %s3997_s24  ;;  %3846 = vrot.lane.b32.xlu2 %v3845_v52, %s3998_s22  ;;  %v5435_v45 = vld [vmem:[#allocation2 + $0x188] sm:$0xff]  ;;  %5901 = vst [vmem:[#allocation14_spill] sm:$0xff] %v5437_v34  ;;  %v3644_v52 = vunpack.i.h.bf16 %v3642_v13  ;;  %v3865_v34 = vpack.i.bf16 %v5439_v38, %v5382_v21  ;;  %v3634_v21 = vunpack.i.h.bf16 %v5342_v49 }
 0x1c0   : > { %v3647_v14 = vpop.permute.xlu0 %3646  ;;  %v3855_v32 = vpack.i.bf16 %v5435_v45, %v5344_v33  ;;  %v1052_v13 = vld [vmem:[#allocation2 + $0xa8] sm:$0xff] }
 0x1c1   : > { %v3622_v36 = vpop.permute.xlu1 %3621  ;;  %v5433_v27 = vpop.permute.xlu2 %3666  ;;  %v2206_v50 = vsel %vm959_vm1, %v1180_v48, %v3644_v52  ;;  %v3648_v44 = vunpack.i.l.bf16 %v3647_v14 }
 0x1c2   : > { %v3624_v56 = vunpack.i.h.bf16 %v3622_v36  ;;  %v3623_v62 = vunpack.i.l.bf16 %v3622_v36  ;;  %v2109_v36 = vsel %vm959_vm1, %v1052_v13, %v3643_v41 }
 0x1c3   : > { %2475 = vmatmul.f32.gmra.mxu2 %v2173_v2  ;;  %2588 = vmatmul.f32.gmra.mxu3 %v2269_v3  ;;  %v1324_v3 = vld [vmem:[#allocation2 + $0x18a] sm:$0xff] }
 0x1c4   : > { %3298 = vmatmul.msk.f32.gmra.mxu0 %vm959_vm1, %v1323_v16  ;;  %v2141_v28 = vsel %vm532_vm0, %v2109_v36, %v3623_v62  ;;  %v2238_v10 = vsel %vm532_vm0, %v2206_v50, %v3624_v56  ;;  %v3633_v16 = vunpack.i.l.bf16 %v5342_v49  ;;  %v3880_v49 = vpack.i.bf16 %v1324_v3, %v5384_v57  ;;  %v5468_v36 = vpop.f32.mrf.mxu0  ;;  %v1053_v50 = vld [vmem:[#allocation2 + $0xb0] sm:$0xff] }
 0x1c5   : > { %v2270_v52 = vsel %vm2159_vm4, %v2238_v10, %v3634_v21 }
 0x1c6   : > { %3876 = vrot.lane.b32.xlu0 %v3875_v26, %s3996_s15  ;;  %v1293_v26 = vld [vmem:[#allocation2 + $0x199] sm:$0xff]  ;;  %v2174_v41 = vsel %vm2159_vm4, %v2141_v28, %v3633_v16  ;;  %v5464_v13 = vpop.f32.mrf.mxu2  ;;  %v1181_v28 = vld [vmem:[#allocation2 + $0xc9] sm:$0xff] }
 0x1c7   : > { %3856 = vrot.lane.b32.xlu1 %v3855_v32, %s3997_s24  ;;  %3866 = vrot.lane.b32.xlu2 %v3865_v34, %s3998_s22  ;;  %v1261_v32 = vld [vmem:[#allocation2 + $0x198] sm:$0xff]  ;;  %v3649_v34 = vunpack.i.h.bf16 %v3647_v14  ;;  %5902 = vst [vmem:[#allocation15_spill] sm:$0xff] %v5464_v13  ;;  %v3870_v14 = vpack.i.bf16 %v1293_v26, %v5413_v22  ;;  %v3659_v22 = vunpack.i.h.bf16 %v5378_v9 }
 0x1c8   : > { %v3652_v47 = vpop.permute.xlu0 %3651  ;;  %v3860_v56 = vpack.i.bf16 %v1261_v32, %v5380_v15 }
 0x1c9   : > { %v3637_v33 = vpop.permute.xlu1 %3636  ;;  %v5460_v2 = vpop.permute.xlu2 %3696  ;;  %v2207_v15 = vsel %vm959_vm1, %v1181_v28, %v3649_v34  ;;  %v3654_v26 = vunpack.i.h.bf16 %v3652_v47 }
 0x1ca   : > { %v3639_v62 = vunpack.i.h.bf16 %v3637_v33  ;;  %v3638_v48 = vunpack.i.l.bf16 %v3637_v33  ;;  %v2110_v33 = vsel %vm959_vm1, %v1053_v50, %v3648_v44 }
 0x1cb   : > { %2478 = vmatmul.f32.gmra.mxu2 %v2174_v41  ;;  %2591 = vmatmul.f32.gmra.mxu3 %v2270_v52  ;;  %v3653_v41 = vunpack.i.l.bf16 %v3652_v47 }
 0x1cc   : > { %3299 = vmatmul.msk.f32.gmra.mxu0 %vm959_vm1, %v1324_v3  ;;  %v2142_v21 = vsel %vm532_vm0, %v2110_v33, %v3638_v48  ;;  %v2239_v16 = vsel %vm532_vm0, %v2207_v15, %v3639_v62  ;;  %v3658_v3 = vunpack.i.l.bf16 %v5378_v9  ;;  %v1054_v9 = vld [vmem:[#allocation2 + $0xc0] sm:$0xff] }
 0x1cd   : > { %v2271_v44 = vsel %vm2159_vm4, %v2239_v16, %v3659_v22  ;;  %v1182_v62 = vld [vmem:[#allocation2 + $0xd9] sm:$0xff]  ;;  %v2111_v47 = vsel %vm959_vm1, %v1054_v9, %v3653_v41  ;;  %v1294_v41 = vld [vmem:[#allocation2 + $0x1a1] sm:$0xff] }
 0x1ce   : > { %3881 = vrot.lane.b32.xlu0 %v3880_v49, %s3996_s15  ;;  %v2175_v52 = vsel %vm2159_vm4, %v2142_v21, %v3658_v3  ;;  %v5485_v48 = vpop.f32.mrf.mxu2  ;;  %v5498_v21 = vpop.f32.mrf.mxu0  ;;  %s3123_s15 = sshll.u32 %s3120_s30, 4  ;;  %s3124_s15 = int_to_ptr.hbm [resolvable:$true] %s3123_s15 }
 0x1cf   : > { %3861 = vrot.lane.b32.xlu1 %v3860_v56, %s3997_s24  ;;  %3871 = vrot.lane.b32.xlu2 %v3870_v14, %s3998_s22  ;;  %v1262_v56 = vld [vmem:[#allocation2 + $0x1a0] sm:$0xff]  ;;  %5903 = vst [vmem:[#allocation16_spill] sm:$0xff] %v5485_v48  ;;  %v2208_v14 = vsel %vm959_vm1, %v1182_v62, %v3654_v26 }
 0x1d0   : > { %v3677_v57 = vpop.permute.xlu0 %3676 }
 0x1d1   : > { %v3672_v10 = vpop.permute.xlu1 %3671  ;;  %v5481_v32 = vpop.permute.xlu2 %3711  ;;  %v3679_v16 = vunpack.i.h.bf16 %v3677_v57  ;;  %v3678_v22 = vunpack.i.l.bf16 %v3677_v57 }
 0x1d2   : > { %v3674_v34 = vunpack.i.h.bf16 %v3672_v10  ;;  %v3673_v49 = vunpack.i.l.bf16 %v3672_v10  ;;  %v3664_v10 = vunpack.i.h.bf16 %v5409_v7 }
 0x1d3   : > { %2481 = vmatmul.f32.gmra.mxu2 %v2175_v52  ;;  %2594 = vmatmul.f32.gmra.mxu3 %v2271_v44 }
 0x1d4   : > { %v2143_v33 = vsel %vm532_vm0, %v2111_v47, %v3673_v49  ;;  %v2240_v15 = vsel %vm532_vm0, %v2208_v14, %v3674_v34  ;;  %v1183_v34 = vld [vmem:[#allocation2 + $0xe1] sm:$0xff]  ;;  %v5510_v47 = vld [vmem:[%s5883_s7] ss:$0 sm:$0xff] }
 0x1d5   : > { %v2272_v3 = vsel %vm2159_vm4, %v2240_v15, %v3664_v10  ;;  %v2209_v57 = vsel %vm959_vm1, %v1183_v34, %v3679_v16  ;;  %v3669_v10 = vunpack.i.h.bf16 %v5433_v27  ;;  %v5520_v16 = vld [vmem:[%s5884_s8] ss:$0 sm:$0xff] }
 0x1d6   : > { %1933 = vrot.lane.b32.xlu0 %v1262_v56, %s3997_s24  ;;  %v1055_v56 = vld [vmem:[#allocation2 + $0xc8] sm:$0xff] }
 0x1d7   : > { %1549 = vrot.lane.b32.xlu1 %v5411_v12, %s3997_s24  ;;  %1677 = vrot.lane.b32.xlu2 %v5435_v45, %s3998_s22  ;;  %v3663_v12 = vunpack.i.l.bf16 %v5409_v7  ;;  %v2112_v9 = vsel %vm959_vm1, %v1055_v56, %v3678_v22  ;;  %s3109_s24 = scalar_lea.sflag [#allocation5], %s4141_s21 }
 0x1d8   : > { %v3682_v28 = vpop.permute.xlu0 %3681 }
 0x1d9   : > { %v3687_v50 = vpop.permute.xlu1 %3686  ;;  %v2176_v45 = vsel %vm2159_vm4, %v2143_v33, %v3663_v12  ;;  %v5502_v26 = vpop.permute.xlu2 %3726  ;;  %v3668_v12 = vunpack.i.l.bf16 %v5433_v27 }
 0x1da   : > { %v3689_v52 = vunpack.i.h.bf16 %v3687_v50  ;;  %v3688_v44 = vunpack.i.l.bf16 %v3687_v50 }
 0x1db   : > { %2484 = vmatmul.f32.gmra.mxu2 %v2176_v45  ;;  %2597 = vmatmul.f32.gmra.mxu3 %v2272_v3  ;;  %v3684_v45 = vunpack.i.h.bf16 %v3682_v28  ;;  %v3683_v3 = vunpack.i.l.bf16 %v3682_v28 }
 0x1dc   : > { %v2144_v33 = vsel %vm532_vm0, %v2112_v9, %v3688_v44  ;;  %v2241_v15 = vsel %vm532_vm0, %v2209_v57, %v3689_v52  ;;  %v5524_v44 = vpop.f32.mrf.mxu0  ;;  %v1184_v9 = vld [vmem:[#allocation2 + $0xf1] sm:$0xff] }
 0x1dd   : > { %v2273_v56 = vsel %vm2159_vm4, %v2241_v15, %v3669_v10 }
 0x1de   : > { %v2437_v7 = vpop.f32.mrf.mxu2  ;;  %v2550_v49 = vpop.f32.mrf.mxu3 }
 0x1df   : > { %2061 = vrot.lane.b32.xlu1 %v1294_v41, %s3998_s22  ;;  %v2551_v62 = vadd.f32 %v2550_v49, %v2437_v7  ;;  %v2177_v41 = vsel %vm2159_vm4, %v2144_v33, %v3668_v12  ;;  %v1056_v49 = vld [vmem:[#allocation2 + $0xd8] sm:$0xff]  ;;  %v2210_v33 = vsel %vm959_vm1, %v1184_v9, %v3684_v45  ;;  %s3939_s22 = sshra.s32 %s3124_s15, 4  ;;  %s3940_s22 = int_to_ptr.hbm [resolvable:$true] %s3939_s22 }
 0x1e0   : > { %v3702_v50 = vpop.permute.xlu0 %3701  ;;  %s3941_s27 = scalar_lea.hbm %s3940_s22, 256  ;;  %p3946_p0 = scmp.lt.s32.totalorder %s3940_s22, %s5886_s10 }
 0x1e1   : > { %v3692_v14 = vpop.permute.xlu1 %3691  ;;  %v2664_v22 = vadd.f32 %v5286_v5, %v2551_v62  ;;  %v5528_v27 = vpop.permute.xlu2 %3741  ;;  %v2113_v62 = vsel %vm959_vm1, %v1056_v49, %v3683_v3  ;;  %v3704_v13 = vunpack.i.h.bf16 %v3702_v50  ;;  %v3703_v3 = vunpack.i.l.bf16 %v3702_v50  ;;  %p3942_p6 = scmp.ne.s32.totalorder %s3940_s22, %s3941_s27  ;;  %p3947_p2 = scmp.lt.s32.totalorder %s3945_s28, %s3941_s27 }
 0x1e2   : > { %v3694_v34 = vunpack.i.h.bf16 %v3692_v14  ;;  %v3693_v7 = vunpack.i.l.bf16 %v3692_v14 }
 0x1e3   : > { %v2763_v52 = vmul.f32 %v5510_v47, %v2664_v22  ;;  %2487 = vmatmul.f32.gmra.mxu2 %v2177_v41  ;;  %2600 = vmatmul.f32.gmra.mxu3 %v2273_v56  ;;  %v3699_v56 = vunpack.i.h.bf16 %v5460_v2  ;;  %p3943_p12 = pnand %p3942_p6, %p4105_p10  ;;  %p3948_p3 = por %p3947_p2, %p3946_p0 }
 0x1e4   : > { %v2145_v14 = vsel %vm532_vm0, %v2113_v62, %v3693_v7  ;;  %v2242_v41 = vsel %vm532_vm0, %v2210_v33, %v3694_v34  ;;  %v5541_v34 = vpop.f32.mrf.mxu0 }
 0x1e5   : > { %v2799_v5 = vadd.f32 %v5520_v16, %v2763_v52  ;;  %v3698_v52 = vunpack.i.l.bf16 %v5460_v2  ;;  %v2274_v49 = vsel %vm2159_vm4, %v2242_v41, %v3699_v56  ;;  %v3714_v56 = vunpack.i.h.bf16 %v5481_v32  ;;  %p3944_p13 = pneg %p3943_p12 }
 0x1e6   : > { %v2440_v57 = vpop.f32.mrf.mxu2  ;;  %v2553_v28 = vpop.f32.mrf.mxu3 }
 0x1e7   : > { %v2554_v15 = vadd.f32 %v2553_v28, %v2440_v57  ;;  %v2831_v22 = vmax.f32 %v2799_v5, 0.0  ;;  %v2178_v45 = vsel %vm2159_vm4, %v2145_v14, %v3698_v52  ;;  %v1057_v57 = vld [vmem:[#allocation2 + $0xe0] sm:$0xff]  ;;  %v3713_v52 = vunpack.i.l.bf16 %v5481_v32  ;;  %p3949_p4 = pnand %p3948_p3, %p3944_p13 }
 0x1e8   : > { %v3717_v12 = vpop.permute.xlu0 %3716  ;;  %v2114_v50 = vsel %vm959_vm1, %v1057_v57, %v3703_v3 }
 0x1e9   : > { %v3707_v10 = vpop.permute.xlu1 %3706  ;;  %v2667_v48 = vadd.f32 %v5327_v24, %v2554_v15  ;;  %3302 = vmatmul.msk.f32.vlgmr.msrb.gmra.mxu1 %vm959_vm1, %v2831_v22  ;;  %v1185_v24 = vld [vmem:[#allocation2 + $0xf9] sm:$0xff]  ;;  %v3719_v3 = vunpack.i.h.bf16 %v3717_v12 }
 0x1ea   : > { %v3709_v9 = vunpack.i.h.bf16 %v3707_v10  ;;  %v3708_v7 = vunpack.i.l.bf16 %v3707_v10  ;;  %v2211_v33 = vsel %vm959_vm1, %v1185_v24, %v3704_v13  ;;  %v3718_v13 = vunpack.i.l.bf16 %v3717_v12  ;;  %v1058_v24 = vld [vmem:[#allocation2 + $0xf0] sm:$0xff] }
 0x1eb   : > { %v2764_v5 = vmul.f32 %v5510_v47, %v2667_v48  ;;  %2490 = vmatmul.f32.gmra.mxu2 %v2178_v45  ;;  %2603 = vmatmul.f32.gmra.mxu3 %v2274_v49  ;;  %v5550_v45 = vpop.permute.xlu2 %3756 }
 0x1ec   : > { %v2146_v10 = vsel %vm532_vm0, %v2114_v50, %v3708_v7  ;;  %v2243_v41 = vsel %vm532_vm0, %v2211_v33, %v3709_v9  ;;  %v2115_v50 = vsel %vm959_vm1, %v1058_v24, %v3718_v13 }
 0x1ed   : > { %v2800_v2 = vadd.f32 %v5520_v16, %v2764_v5  ;;  %v2179_v5 = vsel %vm2159_vm4, %v2146_v10, %v3713_v52  ;;  %v3728_v52 = vunpack.i.l.bf16 %v5502_v26 }
 0x1ee   : > { %v2443_v28 = vpop.f32.mrf.mxu2  ;;  %v2556_v62 = vpop.f32.mrf.mxu3 }
 0x1ef   : > { %v2557_v15 = vadd.f32 %v2556_v62, %v2443_v28  ;;  %v2832_v48 = vmax.f32 %v2800_v2, 0.0  ;;  %v2275_v2 = vsel %vm2159_vm4, %v2243_v41, %v3714_v56  ;;  %v1186_v28 = vld [vmem:[#allocation2 + $0x109] sm:$0xff]  ;;  %v3729_v56 = vunpack.i.h.bf16 %v5502_v26 }
 0x1f0   : > { %v3732_v14 = vpop.permute.xlu0 %3731  ;;  %v2212_v12 = vsel %vm959_vm1, %v1186_v28, %v3719_v3  ;;  %v1059_v28 = vld [vmem:[#allocation2 + $0xf8] sm:$0xff] }
 0x1f1   : > { %v3722_v22 = vpop.permute.xlu1 %3721  ;;  %v2670_v49 = vadd.f32 %v5366_v54, %v2557_v15  ;;  %3303 = vmatmul.msk.f32.gmra.mxu1 %vm959_vm1, %v2832_v48  ;;  %v3734_v13 = vunpack.i.h.bf16 %v3732_v14  ;;  %v3733_v3 = vunpack.i.l.bf16 %v3732_v14 }
 0x1f2   : > { %v3724_v57 = vunpack.i.h.bf16 %v3722_v22  ;;  %v3723_v9 = vunpack.i.l.bf16 %v3722_v22 }
 0x1f3   : > { %v2765_v7 = vmul.f32 %v5510_v47, %v2670_v49  ;;  %2493 = vmatmul.f32.gmra.mxu2 %v2179_v5  ;;  %2606 = vmatmul.f32.gmra.mxu3 %v2275_v2  ;;  %v5564_v49 = vpop.f32.mrf.mxu0  ;;  %v2116_v14 = vsel %vm959_vm1, %v1059_v28, %v3733_v3 }
 0x1f4   : > { %v2147_v41 = vsel %vm532_vm0, %v2115_v50, %v3723_v9  ;;  %v2244_v22 = vsel %vm532_vm0, %v2212_v12, %v3724_v57 }
 0x1f5   : > { %v2801_v32 = vadd.f32 %v5520_v16, %v2765_v7  ;;  %v2180_v2 = vsel %vm2159_vm4, %v2147_v41, %v3728_v52  ;;  %v2276_v7 = vsel %vm2159_vm4, %v2244_v22, %v3729_v56  ;;  %v3744_v56 = vunpack.i.h.bf16 %v5528_v27 }
 0x1f6   : > { %v2446_v62 = vpop.f32.mrf.mxu2  ;;  %v2559_v54 = vpop.f32.mrf.mxu3  ;;  %v3743_v52 = vunpack.i.l.bf16 %v5528_v27  ;;  %v1060_v27 = vld [vmem:[#allocation2 + $0x108] sm:$0xff] }
 0x1f7   : > { %v2560_v33 = vadd.f32 %v2559_v54, %v2446_v62  ;;  %v2833_v10 = vmax.f32 %v2801_v32, 0.0  ;;  %v5570_v32 = vpop.permute.xlu2 %3771 }
 0x1f8   : > { %v3747_v48 = vpop.permute.xlu0 %3746 }
 0x1f9   : > { %v3737_v15 = vpop.permute.xlu1 %3736  ;;  %v2673_v5 = vadd.f32 %v5405_v20, %v2560_v33  ;;  %3304 = vmatmul.msk.f32.gmra.mxu1 %vm959_vm1, %v2833_v10  ;;  %v1187_v20 = vld [vmem:[#allocation2 + $0x111] sm:$0xff]  ;;  %v3748_v3 = vunpack.i.l.bf16 %v3747_v48 }
 0x1fa   : > { %v3739_v9 = vunpack.i.h.bf16 %v3737_v15  ;;  %v3738_v24 = vunpack.i.l.bf16 %v3737_v15  ;;  %v2213_v50 = vsel %vm959_vm1, %v1187_v20, %v3734_v13  ;;  %v1188_v20 = vld [vmem:[#allocation2 + $0x121] sm:$0xff] }
 0x1fb   : > { %v2766_v57 = vmul.f32 %v5510_v47, %v2673_v5  ;;  %2496 = vmatmul.f32.gmra.mxu2 %v2180_v2  ;;  %2609 = vmatmul.f32.gmra.mxu3 %v2276_v7  ;;  %v3749_v2 = vunpack.i.h.bf16 %v3747_v48 }
 0x1fc   : > { %v2148_v22 = vsel %vm532_vm0, %v2116_v14, %v3738_v24  ;;  %v2245_v15 = vsel %vm532_vm0, %v2213_v50, %v3739_v9 }
 0x1fd   : > { %v2802_v26 = vadd.f32 %v5520_v16, %v2766_v57  ;;  %v2181_v13 = vsel %vm2159_vm4, %v2148_v22, %v3743_v52  ;;  %v2277_v7 = vsel %vm2159_vm4, %v2245_v15, %v3744_v56  ;;  %v5584_v57 = vpop.f32.mrf.mxu0  ;;  %v2214_v14 = vsel %vm959_vm1, %v1188_v20, %v3749_v2 }
 0x1fe   : > { %v2449_v62 = vpop.f32.mrf.mxu2  ;;  %v2562_v54 = vpop.f32.mrf.mxu3  ;;  %v3759_v56 = vunpack.i.h.bf16 %v5550_v45  ;;  %v3758_v52 = vunpack.i.l.bf16 %v5550_v45 }
 0x1ff   : > { %v2563_v12 = vadd.f32 %v2562_v54, %v2449_v62  ;;  %v2834_v41 = vmax.f32 %v2802_v26, 0.0  ;;  %v5587_v28 = vpop.permute.xlu2 %3786  ;;  %v2117_v54 = vsel %vm959_vm1, %v1060_v27, %v3748_v3  ;;  %v1061_v27 = vld [vmem:[#allocation2 + $0x110] sm:$0xff] }
 0x200   : > { %v3762_v10 = vpop.permute.xlu0 %3761 }
 0x201   : > { %v3752_v33 = vpop.permute.xlu1 %3751  ;;  %v2676_v5 = vadd.f32 %v5441_v4, %v2563_v12  ;;  %3305 = vmatmul.msk.f32.gmra.mxu1 %vm959_vm1, %v2834_v41  ;;  %v3763_v3 = vunpack.i.l.bf16 %v3762_v10 }
 0x202   : > { %v3754_v26 = vunpack.i.h.bf16 %v3752_v33  ;;  %v3753_v9 = vunpack.i.l.bf16 %v3752_v33 }
 0x203   : > { %v2767_v24 = vmul.f32 %v5510_v47, %v2676_v5  ;;  %2499 = vmatmul.f32.gmra.mxu2 %v2181_v13  ;;  %2612 = vmatmul.f32.gmra.mxu3 %v2277_v7  ;;  %v3764_v13 = vunpack.i.h.bf16 %v3762_v10  ;;  %v2118_v10 = vsel %vm959_vm1, %v1061_v27, %v3763_v3  ;;  %v1190_v27 = vld [vmem:[#allocation2 + $0x139] sm:$0xff] }
 0x204   : > { %v2149_v33 = vsel %vm532_vm0, %v2117_v54, %v3753_v9  ;;  %v2246_v15 = vsel %vm532_vm0, %v2214_v14, %v3754_v26 }
 0x205   : > { %v2803_v4 = vadd.f32 %v5520_v16, %v2767_v24  ;;  %v2182_v2 = vsel %vm2159_vm4, %v2149_v33, %v3758_v52  ;;  %v2278_v7 = vsel %vm2159_vm4, %v2246_v15, %v3759_v56  ;;  %v5601_v26 = vpop.f32.mrf.mxu0  ;;  %v3774_v15 = vunpack.i.h.bf16 %v5570_v32 }
 0x206   : > { %v2452_v62 = vpop.f32.mrf.mxu2  ;;  %v2565_v48 = vpop.f32.mrf.mxu3  ;;  %v3773_v56 = vunpack.i.l.bf16 %v5570_v32  ;;  %v1062_v32 = vld [vmem:[#allocation2 + $0x120] sm:$0xff] }
 0x207   : > { %v2566_v50 = vadd.f32 %v2565_v48, %v2452_v62  ;;  %v2835_v22 = vmax.f32 %v2803_v4, 0.0  ;;  %v3802_v52 = vpop.permute.xlu2 %3801 }
 0x208   : > { %v3777_v41 = vpop.permute.xlu0 %3776 }
 0x209   : > { %v3767_v12 = vpop.permute.xlu1 %3766  ;;  %v2679_v5 = vadd.f32 %v5468_v36, %v2566_v50  ;;  %3306 = vmatmul.msk.f32.gmra.mxu1 %vm959_vm1, %v2835_v22  ;;  %v1189_v36 = vld [vmem:[#allocation2 + $0x129] sm:$0xff]  ;;  %v3779_v3 = vunpack.i.h.bf16 %v3777_v41 }
 0x20a   : > { %v3769_v4 = vunpack.i.h.bf16 %v3767_v12  ;;  %v3768_v9 = vunpack.i.l.bf16 %v3767_v12  ;;  %v2215_v48 = vsel %vm959_vm1, %v1189_v36, %v3764_v13 }
 0x20b   : > { %v2768_v24 = vmul.f32 %v5510_v47, %v2679_v5  ;;  %2502 = vmatmul.f32.gmra.mxu2 %v2182_v2  ;;  %2615 = vmatmul.f32.gmra.mxu3 %v2278_v7  ;;  %v3778_v2 = vunpack.i.l.bf16 %v3777_v41  ;;  %v2216_v41 = vsel %vm959_vm1, %v1190_v27, %v3779_v3 }
 0x20c   : > { %v2150_v12 = vsel %vm532_vm0, %v2118_v10, %v3768_v9  ;;  %v2247_v33 = vsel %vm532_vm0, %v2215_v48, %v3769_v4 }
 0x20d   : > { %v2804_v45 = vadd.f32 %v5520_v16, %v2768_v24  ;;  %v2183_v13 = vsel %vm2159_vm4, %v2150_v12, %v3773_v56  ;;  %v2279_v7 = vsel %vm2159_vm4, %v2247_v33, %v3774_v15  ;;  %v3789_v12 = vunpack.i.h.bf16 %v5587_v28  ;;  %v5622_v15 = vpop.f32.mrf.mxu0 }
 0x20e   : > { %v2455_v20 = vpop.f32.mrf.mxu2  ;;  %v2568_v62 = vpop.f32.mrf.mxu3  ;;  %v3788_v33 = vunpack.i.l.bf16 %v5587_v28 }
 0x20f   : > { %v2569_v54 = vadd.f32 %v2568_v62, %v2455_v20  ;;  %v2836_v22 = vmax.f32 %v2804_v45, 0.0  ;;  %v2119_v20 = vsel %vm959_vm1, %v1062_v32, %v3778_v2  ;;  %v1191_v32 = vld [vmem:[#allocation2 + $0x141] sm:$0xff] }
 0x210   : > { %v3792_v50 = vpop.permute.xlu0 %3791 }
 0x211   : > { %v3782_v14 = vpop.permute.xlu1 %3781  ;;  %v2682_v5 = vadd.f32 %v5498_v21, %v2569_v54  ;;  %3307 = vmatmul.msk.f32.gmra.mxu1 %vm959_vm1, %v2836_v22  ;;  %v3793_v3 = vunpack.i.l.bf16 %v3792_v50 }
 0x212   : > { %v3784_v9 = vunpack.i.h.bf16 %v3782_v14  ;;  %v3783_v45 = vunpack.i.l.bf16 %v3782_v14 }
 0x213   : > { %v2769_v24 = vmul.f32 %v5510_v47, %v2682_v5  ;;  %2505 = vmatmul.f32.gmra.mxu2 %v2183_v13  ;;  %2618 = vmatmul.f32.gmra.mxu3 %v2279_v7  ;;  %v3794_v5 = vunpack.i.h.bf16 %v3792_v50  ;;  %v3817_v7 = vpop.permute.xlu2 %3816 }
 0x214   : > { %v2151_v22 = vsel %vm532_vm0, %v2119_v20, %v3783_v45  ;;  %v2248_v14 = vsel %vm532_vm0, %v2216_v41, %v3784_v9 }
 0x215   : > { %v2805_v4 = vadd.f32 %v5520_v16, %v2769_v24  ;;  %v2184_v2 = vsel %vm2159_vm4, %v2151_v22, %v3788_v33  ;;  %v2280_v13 = vsel %vm2159_vm4, %v2248_v14, %v3789_v12  ;;  %v2217_v50 = vsel %vm959_vm1, %v1191_v32, %v3794_v5 }
 0x216   : > { %v2458_v36 = vpop.f32.mrf.mxu2  ;;  %v2571_v21 = vpop.f32.mrf.mxu3  ;;  %v3804_v22 = vunpack.i.h.bf16 %v3802_v52  ;;  %v3803_v14 = vunpack.i.l.bf16 %v3802_v52 }
 0x217   : > { %v2572_v62 = vadd.f32 %v2571_v21, %v2458_v36  ;;  %v2837_v54 = vmax.f32 %v2805_v4, 0.0  ;;  %v1063_v4 = vld [vmem:[#allocation2 + $0x128] sm:$0xff] }
 0x218   : > { %v3807_v48 = vpop.permute.xlu0 %3806  ;;  %v2120_v36 = vsel %vm959_vm1, %v1063_v4, %v3793_v3 }
 0x219   : > { %v3797_v10 = vpop.permute.xlu1 %3796  ;;  %v2685_v56 = vadd.f32 %v5524_v44, %v2572_v62  ;;  %3308 = vmatmul.msk.f32.gmra.mxu1 %vm959_vm1, %v2837_v54  ;;  %v3809_v33 = vunpack.i.h.bf16 %v3807_v48 }
 0x21a   : > { %v3799_v9 = vunpack.i.h.bf16 %v3797_v10  ;;  %v3798_v45 = vunpack.i.l.bf16 %v3797_v10 }
 0x21b   : > { %v2770_v24 = vmul.f32 %v5510_v47, %v2685_v56  ;;  %2508 = vmatmul.f32.gmra.mxu2 %v2184_v2  ;;  %2621 = vmatmul.f32.gmra.mxu3 %v2280_v13  ;;  %v3808_v56 = vunpack.i.l.bf16 %v3807_v48  ;;  %v5638_v2 = vpop.f32.mrf.mxu0 }
 0x21c   : > { %v2152_v54 = vsel %vm532_vm0, %v2120_v36, %v3798_v45  ;;  %v2249_v10 = vsel %vm532_vm0, %v2217_v50, %v3799_v9  ;;  %v3832_v9 = vpop.permute.xlu2 %3831 }
 0x21d   : > { %v2806_v28 = vadd.f32 %v5520_v16, %v2770_v24  ;;  %v2185_v3 = vsel %vm2159_vm4, %v2152_v54, %v3803_v14  ;;  %v2281_v5 = vsel %vm2159_vm4, %v2249_v10, %v3804_v22  ;;  %v3819_v54 = vunpack.i.h.bf16 %v3817_v7 }
 0x21e   : > { %v2461_v44 = vpop.f32.mrf.mxu2  ;;  %v2574_v27 = vpop.f32.mrf.mxu3  ;;  %v3818_v10 = vunpack.i.l.bf16 %v3817_v7 }
 0x21f   : > { %v2575_v21 = vadd.f32 %v2574_v27, %v2461_v44  ;;  %v2838_v62 = vmax.f32 %v2806_v28, 0.0  ;;  %v1192_v28 = vld [vmem:[#allocation2 + $0x151] sm:$0xff] }
 0x220   : > { %v3822_v41 = vpop.permute.xlu0 %3821  ;;  %v2218_v44 = vsel %vm959_vm1, %v1192_v28, %v3809_v33 }
 0x221   : > { %v3812_v20 = vpop.permute.xlu1 %3811  ;;  %v2688_v12 = vadd.f32 %v5541_v34, %v2575_v21  ;;  %3309 = vmatmul.msk.f32.gmra.mxu1 %vm959_vm1, %v2838_v62  ;;  %v1064_v34 = vld [vmem:[#allocation2 + $0x138] sm:$0xff]  ;;  %v3824_v14 = vunpack.i.h.bf16 %v3822_v41 }
 0x222   : > { %v3814_v24 = vunpack.i.h.bf16 %v3812_v20  ;;  %v3813_v45 = vunpack.i.l.bf16 %v3812_v20  ;;  %v2121_v48 = vsel %vm959_vm1, %v1064_v34, %v3808_v56 }
 0x223   : > { %v2771_v13 = vmul.f32 %v5510_v47, %v2688_v12  ;;  %2511 = vmatmul.f32.gmra.mxu2 %v2185_v3  ;;  %2624 = vmatmul.f32.gmra.mxu3 %v2281_v5  ;;  %v3823_v12 = vunpack.i.l.bf16 %v3822_v41 }
 0x224   : > { %v2153_v62 = vsel %vm532_vm0, %v2121_v48, %v3813_v45  ;;  %v2250_v20 = vsel %vm532_vm0, %v2218_v44, %v3814_v24  ;;  %v5651_v45 = vpop.f32.mrf.mxu0  ;;  %v1065_v24 = vld [vmem:[#allocation2 + $0x140] sm:$0xff] }
 0x225   : > { %v2807_v52 = vadd.f32 %v5520_v16, %v2771_v13  ;;  %v2186_v56 = vsel %vm2159_vm4, %v2153_v62, %v3818_v10  ;;  %v2282_v33 = vsel %vm2159_vm4, %v2250_v20, %v3819_v54  ;;  %v2122_v41 = vsel %vm959_vm1, %v1065_v24, %v3823_v12  ;;  %v3847_v20 = vpop.permute.xlu2 %3846 }
 0x226   : > { %v2464_v4 = vpop.f32.mrf.mxu2  ;;  %v2577_v32 = vpop.f32.mrf.mxu3  ;;  %v3833_v62 = vunpack.i.l.bf16 %v3832_v9 }
 0x227   : > { %v2839_v27 = vmax.f32 %v2807_v52, 0.0  ;;  %v2578_v36 = vadd.f32 %v2577_v32, %v2464_v4 }
 0x228   : > { %v3837_v21 = vpop.permute.xlu0 %3836 }
 0x229   : > { %v3827_v50 = vpop.permute.xlu1 %3826  ;;  %v2691_v22 = vadd.f32 %v5564_v49, %v2578_v36  ;;  %3310 = vmatmul.msk.f32.gmra.mxu1 %vm959_vm1, %v2839_v27  ;;  %v1193_v49 = vld [vmem:[#allocation2 + $0x159] sm:$0xff]  ;;  %v3839_v10 = vunpack.i.h.bf16 %v3837_v21 }
 0x22a   : > { %v3829_v5 = vunpack.i.h.bf16 %v3827_v50  ;;  %v3828_v13 = vunpack.i.l.bf16 %v3827_v50  ;;  %v2219_v28 = vsel %vm959_vm1, %v1193_v49, %v3824_v14  ;;  %v3834_v50 = vunpack.i.h.bf16 %v3832_v9  ;;  %v1066_v9 = vld [vmem:[#allocation2 + $0x150] sm:$0xff] }
 0x22b   : > { %v2772_v3 = vmul.f32 %v5510_v47, %v2691_v22  ;;  %2514 = vmatmul.f32.gmra.mxu2 %v2186_v56  ;;  %2627 = vmatmul.f32.gmra.mxu3 %v2282_v33  ;;  %v3838_v22 = vunpack.i.l.bf16 %v3837_v21 }
 0x22c   : > { %v2154_v27 = vsel %vm532_vm0, %v2122_v41, %v3828_v13  ;;  %v2251_v36 = vsel %vm532_vm0, %v2219_v28, %v3829_v5  ;;  %v1194_v13 = vld [vmem:[#allocation2 + $0x169] sm:$0xff] }
 0x22d   : > { %v2808_v7 = vadd.f32 %v5520_v16, %v2772_v3  ;;  %v2187_v12 = vsel %vm2159_vm4, %v2154_v27, %v3833_v62  ;;  %v2283_v14 = vsel %vm2159_vm4, %v2251_v36, %v3834_v50  ;;  %v2123_v49 = vsel %vm959_vm1, %v1066_v9, %v3838_v22  ;;  %v5669_v27 = vpop.f32.mrf.mxu0 }
 0x22e   : > { %v2467_v52 = vpop.f32.mrf.mxu2  ;;  %v2580_v34 = vpop.f32.mrf.mxu3  ;;  %v2220_v21 = vsel %vm959_vm1, %v1194_v13, %v3839_v10 }
 0x22f   : > { %v2840_v4 = vmax.f32 %v2808_v7, 0.0  ;;  %v2581_v32 = vadd.f32 %v2580_v34, %v2467_v52  ;;  %v1325_v7 = vld [vmem:[#allocation2 + $0x19a] sm:$0xff] }
 0x230   : > { %v3852_v44 = vpop.permute.xlu0 %3851  ;;  %3300 = vmatmul.msk.f32.gmra.mxu0 %vm959_vm1, %v1325_v7 }
 0x231   : > { %v3842_v48 = vpop.permute.xlu1 %3841  ;;  %v2694_v54 = vadd.f32 %v5584_v57, %v2581_v32  ;;  %3311 = vmatmul.msk.f32.gmra.mxu1 %vm959_vm1, %v2840_v4  ;;  %v3849_v32 = vunpack.i.h.bf16 %v3847_v20  ;;  %v3854_v62 = vunpack.i.h.bf16 %v3852_v44 }
 0x232   : > { %v3844_v33 = vunpack.i.h.bf16 %v3842_v48  ;;  %v3843_v3 = vunpack.i.l.bf16 %v3842_v48  ;;  %v3848_v48 = vunpack.i.l.bf16 %v3847_v20 }
 0x233   : > { %v2773_v56 = vmul.f32 %v5510_v47, %v2694_v54  ;;  %2517 = vmatmul.f32.gmra.mxu2 %v2187_v12  ;;  %2630 = vmatmul.f32.gmra.mxu3 %v2283_v14  ;;  %v3853_v54 = vunpack.i.l.bf16 %v3852_v44  ;;  %v3867_v12 = vpop.permute.xlu2 %3866 }
 0x234   : > { %v2155_v28 = vsel %vm532_vm0, %v2123_v49, %v3843_v3  ;;  %v2252_v4 = vsel %vm532_vm0, %v2220_v21, %v3844_v33  ;;  %v1067_v3 = vld [vmem:[#allocation2 + $0x158] sm:$0xff] }
 0x235   : > { %v2809_v5 = vadd.f32 %v5520_v16, %v2773_v56  ;;  %v2188_v10 = vsel %vm2159_vm4, %v2155_v28, %v3848_v48  ;;  %v2284_v22 = vsel %vm2159_vm4, %v2252_v4, %v3849_v32  ;;  %v2124_v13 = vsel %vm959_vm1, %v1067_v3, %v3853_v54 }
 0x236   : > { %v2470_v57 = vpop.f32.mrf.mxu2  ;;  %v2583_v24 = vpop.f32.mrf.mxu3 }
 0x237   : > { %v2841_v52 = vmax.f32 %v2809_v5, 0.0  ;;  %v2584_v34 = vadd.f32 %v2583_v24, %v2470_v57 }
 0x238   : > { %v3877_v50 = vpop.permute.xlu0 %3876 }
 0x239   : > { %v3857_v41 = vpop.permute.xlu1 %3856  ;;  %v2697_v36 = vadd.f32 %v5601_v26, %v2584_v34  ;;  %3312 = vmatmul.msk.f32.gmra.mxu1 %vm959_vm1, %v2841_v52  ;;  %v1195_v26 = vld [vmem:[#allocation2 + $0x171] sm:$0xff]  ;;  %v3869_v52 = vunpack.i.h.bf16 %v3867_v12  ;;  %v3868_v34 = vunpack.i.l.bf16 %v3867_v12  ;;  %v3879_v28 = vunpack.i.h.bf16 %v3877_v50 }
 0x23a   : > { %v3859_v56 = vunpack.i.h.bf16 %v3857_v41  ;;  %v3858_v33 = vunpack.i.l.bf16 %v3857_v41  ;;  %v2221_v44 = vsel %vm959_vm1, %v1195_v26, %v3854_v62  ;;  %v3878_v4 = vunpack.i.l.bf16 %v3877_v50 }
 0x23b   : > { %v2774_v14 = vmul.f32 %v5510_v47, %v2697_v36  ;;  %2520 = vmatmul.f32.gmra.mxu2 %v2188_v10  ;;  %2633 = vmatmul.f32.gmra.mxu3 %v2284_v22  ;;  %v5685_v36 = vpop.f32.mrf.mxu0  ;;  %v3872_v12 = vpop.permute.xlu2 %3871 }
 0x23c   : > { %v2156_v49 = vsel %vm532_vm0, %v2124_v13, %v3858_v33  ;;  %v2253_v21 = vsel %vm532_vm0, %v2221_v44, %v3859_v56  ;;  %v1196_v56 = vld [vmem:[#allocation2 + $0x181] sm:$0xff] }
 0x23d   : > { %v2810_v20 = vadd.f32 %v5520_v16, %v2774_v14  ;;  %v2189_v32 = vsel %vm2159_vm4, %v2156_v49, %v3868_v34  ;;  %v2285_v48 = vsel %vm2159_vm4, %v2253_v21, %v3869_v52  ;;  %v1068_v14 = vld [vmem:[#allocation2 + $0x168] sm:$0xff]  ;;  %v2222_v3 = vsel %vm959_vm1, %v1196_v56, %v3879_v28 }
 0x23e   : > { %v2473_v5 = vpop.f32.mrf.mxu2  ;;  %v2586_v9 = vpop.f32.mrf.mxu3 }
 0x23f   : > { %v2842_v7 = vmax.f32 %v2810_v20, 0.0  ;;  %v2587_v57 = vadd.f32 %v2586_v9, %v2473_v5  ;;  %v2125_v20 = vsel %vm959_vm1, %v1068_v14, %v3878_v4 }
 0x240   : > { %v3882_v22 = vpop.permute.xlu0 %3881 }
 0x241   : > { %v3862_v24 = vpop.permute.xlu1 %3861  ;;  %v2700_v41 = vadd.f32 %v5622_v15, %v2587_v57  ;;  %3313 = vmatmul.msk.f32.gmra.mxu1 %vm959_vm1, %v2842_v7  ;;  %v3874_v7 = vunpack.i.h.bf16 %v3872_v12  ;;  %v3873_v57 = vunpack.i.l.bf16 %v3872_v12  ;;  %v3883_v49 = vunpack.i.l.bf16 %v3882_v22 }
 0x242   : > { %v3864_v54 = vunpack.i.h.bf16 %v3862_v24  ;;  %v3863_v10 = vunpack.i.l.bf16 %v3862_v24 }
 0x243   : > { %v2775_v62 = vmul.f32 %v5510_v47, %v2700_v41  ;;  %2523 = vmatmul.f32.gmra.mxu2 %v2189_v32  ;;  %2636 = vmatmul.f32.gmra.mxu3 %v2285_v48  ;;  %v3884_v41 = vunpack.i.h.bf16 %v3882_v22  ;;  %v2714_v28 = vpop.f32.mrf.mxu0  ;;  %v1069_v32 = vld [vmem:[#allocation2 + $0x170] sm:$0xff] }
 0x244   : > { %v2157_v13 = vsel %vm532_vm0, %v2125_v20, %v3863_v10  ;;  %v2254_v44 = vsel %vm532_vm0, %v2222_v3, %v3864_v54 }
 0x245   : > { %v2811_v15 = vadd.f32 %v5520_v16, %v2775_v62  ;;  %v2190_v21 = vsel %vm2159_vm4, %v2157_v13, %v3873_v57  ;;  %v2286_v52 = vsel %vm2159_vm4, %v2254_v44, %v3874_v7  ;;  %v2126_v62 = vsel %vm959_vm1, %v1069_v32, %v3883_v49  ;;  %v1326_v57 = vld [vmem:[#allocation2 + $0x1a2] sm:$0xff] }
 0x246   : > { %v2476_v33 = vpop.f32.mrf.mxu2  ;;  %v2589_v50 = vpop.f32.mrf.mxu3  ;;  %v2223_v56 = vsel %vm959_vm1, %v5439_v38, %v3884_v41 }
 0x247   : > { %v2843_v26 = vmax.f32 %v2811_v15, 0.0  ;;  %v2590_v5 = vadd.f32 %v2589_v50, %v2476_v33  ;;  %v1678_v33 = vpop.permute.xlu2 %1677 }
 0x248   : > { %v1934_v48 = vpop.permute.xlu0 %1933 }
 0x249   : > { %v1550_v9 = vpop.permute.xlu1 %1549  ;;  %v2703_v24 = vadd.f32 %v5638_v2, %v2590_v5  ;;  %3314 = vmatmul.msk.f32.gmra.mxu1 %vm959_vm1, %v2843_v26  ;;  %v2255_v22 = vsel %vm532_vm0, %v2223_v56, %v1934_v48 }
 0x24a   : > { %v2158_v12 = vsel %vm532_vm0, %v2126_v62, %v1550_v9 }
 0x24b   : > { %v2776_v34 = vmul.f32 %v5510_v47, %v2703_v24  ;;  %2526 = vmatmul.f32.gmra.mxu2 %v2190_v21  ;;  %2639 = vmatmul.f32.gmra.mxu3 %v2286_v52  ;;  %v2191_v20 = vsel %vm2159_vm4, %v2158_v12, %v1678_v33  ;;  %v2717_v38 = vpop.f32.mrf.mxu0 }
 0x24d   : > { %v2812_v4 = vadd.f32 %v5520_v16, %v2776_v34 }
 0x24e   : > { %v2479_v2 = vpop.f32.mrf.mxu2  ;;  %v2592_v54 = vpop.f32.mrf.mxu3 }
 0x24f   : > { %v2844_v10 = vmax.f32 %v2812_v4, 0.0  ;;  %v2593_v15 = vadd.f32 %v2592_v54, %v2479_v2 }
 0x251   : > { %v2062_v14 = vpop.permute.xlu1 %2061  ;;  %v2706_v50 = vadd.f32 %v5651_v45, %v2593_v15  ;;  %3315 = vmatmul.msk.f32.gmra.mxu1 %vm959_vm1, %v2844_v10 }
 0x252   : > { %v2287_v3 = vsel %vm2159_vm4, %v2255_v22, %v2062_v14 }
 0x253   : > { %v2777_v26 = vmul.f32 %v5510_v47, %v2706_v50  ;;  %2529 = vmatmul.f32.gmra.mxu2 %v2191_v20  ;;  %2642 = vmatmul.f32.gmra.mxu3 %v2287_v3  ;;  %v2720_v4 = vpop.f32.mrf.mxu0 }
 0x255   : > { %v2813_v5 = vadd.f32 %v5520_v16, %v2777_v26 }
 0x256   : > { %v2482_v9 = vpop.f32.mrf.mxu2  ;;  %v2595_v13 = vpop.f32.mrf.mxu3 }
 0x257   : > { %v2845_v44 = vmax.f32 %v2813_v5, 0.0  ;;  %v2596_v7 = vadd.f32 %v2595_v13, %v2482_v9 }
 0x259   : > { %v2709_v45 = vadd.f32 %v5669_v27, %v2596_v7  ;;  %3316 = vmatmul.msk.f32.gmra.mxu1 %vm959_vm1, %v2845_v44 }
 0x25b   : > { %v2778_v24 = vmul.f32 %v5510_v47, %v2709_v45  ;;  %3301 = vmatmul.msk.f32.vlgmr.msra.gmra.mxu2 %vm959_vm1, %v1326_v57 }
 0x25d   : > { %v2814_v49 = vadd.f32 %v5520_v16, %v2778_v24 }
 0x25e   : > { %v2485_v21 = vpop.f32.mrf.mxu2  ;;  %v2598_v52 = vpop.f32.mrf.mxu3 }
 0x25f   : > { %v2846_v34 = vmax.f32 %v2814_v49, 0.0  ;;  %v2599_v41 = vadd.f32 %v2598_v52, %v2485_v21 }
 0x261   : > { %v2712_v32 = vadd.f32 %v5685_v36, %v2599_v41  ;;  %3317 = vmatmul.msk.f32.gmra.mxu1 %vm959_vm1, %v2846_v34  ;;  %v2723_v36 = vpop.f32.mrf.mxu0 }
 0x263   : > { %v2779_v27 = vmul.f32 %v5510_v47, %v2712_v32 }
 0x265   : > { %v2815_v48 = vadd.f32 %v5520_v16, %v2779_v27 }
 0x266   : > { %v2488_v62 = vpop.f32.mrf.mxu2  ;;  %v2601_v2 = vpop.f32.mrf.mxu3 }
 0x267   : > { %v2847_v54 = vmax.f32 %v2815_v48, 0.0  ;;  %v2602_v10 = vadd.f32 %v2601_v2, %v2488_v62  ;;  %v2980_v12 = vpop.f32.mrf.mxu1 }
 0x268   : > { %v2981_v15 = vadd.f32 %v2980_v12, %v4591_v37 }
 0x269   : > { %v2715_v14 = vadd.f32 %v2714_v28, %v2602_v10  ;;  %3318 = vmatmul.msk.f32.gmra.mxu1 %vm959_vm1, %v2847_v54  ;;  %v2726_v9 = vpop.f32.mrf.mxu0 }
 0x26a   : > { %3076 = vst [vmem:[%s5723_s12] sm:$0xff] %v2981_v15 }
 0x26b   : > { %v2780_v56 = vmul.f32 %v5510_v47, %v2715_v14 }
 0x26d   : > { %v2816_v33 = vadd.f32 %v5520_v16, %v2780_v56 }
 0x26e   : > { %v2491_v22 = vpop.f32.mrf.mxu2  ;;  %v2604_v50 = vpop.f32.mrf.mxu3 }
 0x26f   : > { %v2848_v20 = vmax.f32 %v2816_v33, 0.0  ;;  %v2605_v3 = vadd.f32 %v2604_v50, %v2491_v22  ;;  %v2983_v26 = vpop.f32.mrf.mxu1 }
 0x270   : > { %v2984_v37 = vadd.f32 %v2983_v26, %v4626_v55 }
 0x271   : > { %v2718_v28 = vadd.f32 %v2717_v38, %v2605_v3  ;;  %3319 = vmatmul.msk.f32.gmra.mxu1 %vm959_vm1, %v2848_v20  ;;  %v2729_v41 = vpop.f32.mrf.mxu0 }
 0x272   : > { %3077 = vst [vmem:[%s5723_s12 + $0x8] sm:$0xff] %v2984_v37 }
 0x273   : > { %v2781_v5 = vmul.f32 %v5510_v47, %v2718_v28 }
 0x275   : > { %v2817_v13 = vadd.f32 %v5520_v16, %v2781_v5 }
 0x276   : > { %v2494_v44 = vpop.f32.mrf.mxu2  ;;  %v2607_v7 = vpop.f32.mrf.mxu3 }
 0x277   : > { %v2849_v57 = vmax.f32 %v2817_v13, 0.0  ;;  %v2608_v45 = vadd.f32 %v2607_v7, %v2494_v44  ;;  %v2986_v24 = vpop.f32.mrf.mxu1 }
 0x278   : > { %v2987_v49 = vadd.f32 %v2986_v24, %v4675_v19 }
 0x279   : > { %v2721_v21 = vadd.f32 %v2720_v4, %v2608_v45  ;;  %3320 = vmatmul.msk.f32.gmra.mxu1 %vm959_vm1, %v2849_v57  ;;  %v2732_v33 = vpop.f32.mrf.mxu0 }
 0x27a   : > { %3078 = vst [vmem:[%s5723_s12 + $0x10] sm:$0xff] %v2987_v49 }
 0x27b   : > { %v2782_v55 = vmul.f32 %v5510_v47, %v2721_v21 }
 0x27d   : > { %v2818_v38 = vadd.f32 %v5520_v16, %v2782_v55 }
 0x27e   : > { %v2497_v52 = vpop.f32.mrf.mxu2  ;;  %v2610_v34 = vpop.f32.mrf.mxu3 }
 0x27f   : > { %v2850_v32 = vmax.f32 %v2818_v38, 0.0  ;;  %v2611_v27 = vadd.f32 %v2610_v34, %v2497_v52  ;;  %v2989_v48 = vpop.f32.mrf.mxu1 }
 0x280   : > { %v2990_v62 = vadd.f32 %v2989_v48, %v4710_v39 }
 0x281   : > { %v2724_v2 = vadd.f32 %v2723_v36, %v2611_v27  ;;  %3321 = vmatmul.msk.f32.gmra.mxu1 %vm959_vm1, %v2850_v32 }
 0x282   : > { %3079 = vst [vmem:[%s5723_s12 + $0x18] sm:$0xff] %v2990_v62 }
 0x283   : > { %v2783_v19 = vmul.f32 %v5510_v47, %v2724_v2 }
 0x285   : > { %v2819_v4 = vadd.f32 %v5520_v16, %v2783_v19 }
 0x286   : > { %v2500_v54 = vpop.f32.mrf.mxu2  ;;  %v2613_v10 = vpop.f32.mrf.mxu3 }
 0x287   : > { %v2851_v12 = vmax.f32 %v2819_v4, 0.0  ;;  %v2614_v15 = vadd.f32 %v2613_v10, %v2500_v54  ;;  %v2992_v14 = vpop.f32.mrf.mxu1 }
 0x288   : > { %v2993_v56 = vadd.f32 %v2992_v14, %v4744_v6  ;;  %v2735_v6 = vpop.f32.mrf.mxu0 }
 0x289   : > { %v2727_v22 = vadd.f32 %v2726_v9, %v2614_v15  ;;  %3322 = vmatmul.msk.f32.gmra.mxu1 %vm959_vm1, %v2851_v12 }
 0x28a   : > { %3080 = vst [vmem:[%s5723_s12 + $0x20] sm:$0xff] %v2993_v56 }
 0x28b   : > { %v2784_v39 = vmul.f32 %v5510_v47, %v2727_v22 }
 0x28d   : > { %v2820_v36 = vadd.f32 %v5520_v16, %v2784_v39 }
 0x28e   : > { %v2503_v50 = vpop.f32.mrf.mxu2  ;;  %v2616_v20 = vpop.f32.mrf.mxu3 }
 0x28f   : > { %v2852_v3 = vmax.f32 %v2820_v36, 0.0  ;;  %v2617_v26 = vadd.f32 %v2616_v20, %v2503_v50  ;;  %v2995_v37 = vpop.f32.mrf.mxu1 }
 0x290   : > { %v2996_v28 = vadd.f32 %v2995_v37, %v4781_v23  ;;  %v2738_v55 = vpop.f32.mrf.mxu0 }
 0x291   : > { %v2730_v5 = vadd.f32 %v2729_v41, %v2617_v26  ;;  %3323 = vmatmul.msk.f32.gmra.mxu1 %vm959_vm1, %v2852_v3 }
 0x292   : > { %3081 = vst [vmem:[%s5723_s12 + $0x28] sm:$0xff] %v2996_v28 }
 0x293   : > { %v2785_v9 = vmul.f32 %v5510_v47, %v2730_v5 }
 0x295   : > { %v2821_v13 = vadd.f32 %v5520_v16, %v2785_v9 }
 0x296   : > { %v2506_v44 = vpop.f32.mrf.mxu2  ;;  %v2619_v7 = vpop.f32.mrf.mxu3 }
 0x297   : > { %v2853_v57 = vmax.f32 %v2821_v13, 0.0  ;;  %v2620_v45 = vadd.f32 %v2619_v7, %v2506_v44  ;;  %v2998_v24 = vpop.f32.mrf.mxu1 }
 0x298   : > { %v2999_v49 = vadd.f32 %v2998_v24, %v4831_v53  ;;  %v2741_v54 = vpop.f32.mrf.mxu0 }
 0x299   : > { %v2733_v21 = vadd.f32 %v2732_v33, %v2620_v45  ;;  %3324 = vmatmul.msk.f32.gmra.mxu1 %vm959_vm1, %v2853_v57 }
 0x29a   : > { %3082 = vst [vmem:[%s5723_s12 + $0x30] sm:$0xff] %v2999_v49 }
 0x29b   : > { %v2786_v23 = vmul.f32 %v5510_v47, %v2733_v21 }
 0x29d   : > { %v2822_v38 = vadd.f32 %v5520_v16, %v2786_v23 }
 0x29e   : > { %v2509_v52 = vpop.f32.mrf.mxu2  ;;  %v2622_v34 = vpop.f32.mrf.mxu3 }
 0x29f   : > { %v2854_v41 = vmax.f32 %v2822_v38, 0.0  ;;  %v2623_v32 = vadd.f32 %v2622_v34, %v2509_v52  ;;  %v3001_v27 = vpop.f32.mrf.mxu1 }
 0x2a0   : > { %v3002_v48 = vadd.f32 %v3001_v27, %v4863_v11  ;;  %v5769_v11 = vld [vmem:[%s5883_s7] ss:$0 sm:$0xff]  ;;  %v2744_v3 = vpop.f32.mrf.mxu0 }
 0x2a1   : > { %v2736_v62 = vadd.f32 %v2735_v6, %v2623_v32  ;;  %3325 = vmatmul.msk.f32.gmra.mxu1 %vm959_vm1, %v2854_v41 }
 0x2a2   : > { %3083 = vst [vmem:[%s5723_s12 + $0x38] sm:$0xff] %v3002_v48 }
 0x2a3   : > { %v2787_v53 = vmul.f32 %v5510_v47, %v2736_v62 }
 0x2a5   : > { %v2823_v2 = vadd.f32 %v5520_v16, %v2787_v53  ;;  %v5775_v16 = vld [vmem:[%s5884_s8] ss:$0 sm:$0xff] }
 0x2a6   : > { %v2512_v19 = vpop.f32.mrf.mxu2  ;;  %v2625_v4 = vpop.f32.mrf.mxu3 }
 0x2a7   : > { %v2855_v10 = vmax.f32 %v2823_v2, 0.0  ;;  %v2626_v12 = vadd.f32 %v2625_v4, %v2512_v19  ;;  %v3004_v15 = vpop.f32.mrf.mxu1 }
 0x2a8   : > { %v3005_v14 = vadd.f32 %v3004_v15, %v4895_v29 }
 0x2a9   : > { %v2739_v56 = vadd.f32 %v2738_v55, %v2626_v12  ;;  %3326 = vmatmul.msk.f32.gmra.mxu1 %vm959_vm1, %v2855_v10 }
 0x2aa   : > { %3084 = vst [vmem:[%s5723_s12 + $0x40] sm:$0xff] %v3005_v14 }
 0x2ab   : > { %v2788_v47 = vmul.f32 %v5769_v11, %v2739_v56 }
 0x2ad   : > { %v2824_v33 = vadd.f32 %v5775_v16, %v2788_v47 }
 0x2ae   : > { %v2515_v29 = vpop.f32.mrf.mxu2  ;;  %v2628_v22 = vpop.f32.mrf.mxu3 }
 0x2af   : > { %v2856_v39 = vmax.f32 %v2824_v33, 0.0  ;;  %v2629_v36 = vadd.f32 %v2628_v22, %v2515_v29  ;;  %v3007_v50 = vpop.f32.mrf.mxu1 }
 0x2b0   : > { %v3008_v20 = vadd.f32 %v3007_v50, %v4927_v51  ;;  %v2747_v51 = vpop.f32.mrf.mxu0 }
 0x2b1   : > { %v2742_v26 = vadd.f32 %v2741_v54, %v2629_v36  ;;  %3327 = vmatmul.msk.f32.gmra.mxu1 %vm959_vm1, %v2856_v39 }
 0x2b2   : > { %3085 = vst [vmem:[%s5723_s12 + $0x48] sm:$0xff] %v3008_v20 }
 0x2b3   : > { %v2789_v37 = vmul.f32 %v5769_v11, %v2742_v26 }
 0x2b5   : > { %v2825_v28 = vadd.f32 %v5775_v16, %v2789_v37 }
 0x2b6   : > { %v2518_v5 = vpop.f32.mrf.mxu2  ;;  %v2631_v6 = vpop.f32.mrf.mxu3 }
 0x2b7   : > { %v2857_v9 = vmax.f32 %v2825_v28, 0.0  ;;  %v2632_v13 = vadd.f32 %v2631_v6, %v2518_v5  ;;  %v3010_v44 = vpop.f32.mrf.mxu1 }
 0x2b8   : > { %v3011_v7 = vadd.f32 %v3010_v44, %v4965_v63  ;;  %v2750_v41 = vpop.f32.mrf.mxu0 }
 0x2b9   : > { %v2745_v57 = vadd.f32 %v2744_v3, %v2632_v13  ;;  %3328 = vmatmul.msk.f32.gmra.mxu1 %vm959_vm1, %v2857_v9 }
 0x2ba   : > { %3086 = vst [vmem:[%s5723_s12 + $0x50] sm:$0xff] %v3011_v7 }
 0x2bb   : > { %v2790_v45 = vmul.f32 %v5769_v11, %v2745_v57 }
 0x2bd   : > { %v2826_v24 = vadd.f32 %v5775_v16, %v2790_v45 }
 0x2be   : > { %v2521_v49 = vpop.f32.mrf.mxu2  ;;  %v2634_v21 = vpop.f32.mrf.mxu3 }
 0x2bf   : > { %v2858_v23 = vmax.f32 %v2826_v24, 0.0  ;;  %v2635_v55 = vadd.f32 %v2634_v21, %v2521_v49  ;;  %v3013_v38 = vpop.f32.mrf.mxu1 }
 0x2c0   : > { %v3014_v52 = vadd.f32 %v3013_v38, %v5005_v25  ;;  %v2753_v10 = vpop.f32.mrf.mxu0 }
 0x2c1   : > { %v2748_v34 = vadd.f32 %v2747_v51, %v2635_v55  ;;  %3329 = vmatmul.msk.f32.gmra.mxu1 %vm959_vm1, %v2858_v23 }
 0x2c2   : > { %3087 = vst [vmem:[%s5723_s12 + $0x58] sm:$0xff] %v3014_v52 }
 0x2c3   : > { %v2791_v63 = vmul.f32 %v5769_v11, %v2748_v34 }
 0x2c5   : > { %v2827_v32 = vadd.f32 %v5775_v16, %v2791_v63  ;;  %v5904_v63 = vld [vmem:[#allocation13_spill] sm:$0xff] }
 0x2c6   : > { %v2524_v27 = vpop.f32.mrf.mxu2  ;;  %v2637_v48 = vpop.f32.mrf.mxu3 }
 0x2c7   : > { %v2859_v62 = vmax.f32 %v2827_v32, 0.0  ;;  %v2638_v53 = vadd.f32 %v2637_v48, %v2524_v27  ;;  %v3016_v2 = vpop.f32.mrf.mxu1  ;;  %v5906_v48 = vld [vmem:[#allocation15_spill] sm:$0xff] }
 0x2c8   : > { %v3017_v19 = vadd.f32 %v3016_v2, %v5061_v0 }
 0x2c9   : > { %v2751_v4 = vadd.f32 %v2750_v41, %v2638_v53  ;;  %3330 = vmatmul.msk.f32.gmra.mxu1 %vm959_vm1, %v2859_v62 }
 0x2ca   : > { %3088 = vst [vmem:[%s5723_s12 + $0x60] sm:$0xff] %v3017_v19 }
 0x2cb   : > { %v2792_v25 = vmul.f32 %v5769_v11, %v2751_v4 }
 0x2cd   : > { %v2828_v54 = vadd.f32 %v5775_v16, %v2792_v25 }
 0x2ce   : > { %v2527_v12 = vpop.f32.mrf.mxu2  ;;  %v2640_v15 = vpop.f32.mrf.mxu3 }
 0x2cf   : > { %v2860_v14 = vmax.f32 %v2828_v54, 0.0  ;;  %v2641_v56 = vadd.f32 %v2640_v15, %v2527_v12  ;;  %v3019_v47 = vpop.f32.mrf.mxu1 }
 0x2d0   : > { %v3020_v33 = vadd.f32 %v3019_v47, %v5113_v1 }
 0x2d1   : > { %v2754_v29 = vadd.f32 %v2753_v10, %v2641_v56  ;;  %3331 = vmatmul.msk.f32.gmra.mxu1 %vm959_vm1, %v2860_v14 }
 0x2d2   : > { %3089 = vst [vmem:[%s5723_s12 + $0x68] sm:$0xff] %v3020_v33 }
 0x2d3   : > { %v2793_v0 = vmul.f32 %v5769_v11, %v2754_v29 }
 0x2d5   : > { %v2829_v22 = vadd.f32 %v5775_v16, %v2793_v0 }
 0x2d6   : > { %v2530_v39 = vpop.f32.mrf.mxu2  ;;  %v2643_v3 = vpop.f32.mrf.mxu3 }
 0x2d7   : > { %v2861_v36 = vmax.f32 %v2829_v22, 0.0  ;;  %v3022_v50 = vpop.f32.mrf.mxu1  ;;  %v2644_v1 = vadd.f32 %v2643_v3, %v2530_v39 }
 0x2d8   : > { %v3023_v20 = vadd.f32 %v3022_v50, %v5157_v31 }
 0x2d9   : > { %3332 = vmatmul.msk.f32.gmra.mxu1 %vm959_vm1, %v2861_v36 }
 0x2da   : > { %3090 = vst [vmem:[%s5723_s12 + $0x70] sm:$0xff] %v3023_v20 }
 0x2de   : > { %v2756_v26 = vpop.f32.mrf.mxu2 }
 0x2df   : > { %v2757_v37 = vadd.f32 %v2756_v26, %v2644_v1  ;;  %v3025_v28 = vpop.f32.mrf.mxu1 }
 0x2e0   : > { %v3026_v5 = vadd.f32 %v3025_v28, %v5202_v18 }
 0x2e1   : > { %v2794_v6 = vmul.f32 %v5769_v11, %v2757_v37 }
 0x2e2   : > { %3091 = vst [vmem:[%s5723_s12 + $0x78] sm:$0xff] %v3026_v5 }
 0x2e3   : > { %v2830_v9 = vadd.f32 %v5775_v16, %v2794_v6 }
 0x2e5   : > { %v2862_v31 = vmax.f32 %v2830_v9, 0.0 }
 0x2e7   : > { %v3028_v13 = vpop.f32.mrf.mxu1  ;;  %3333 = vmatmul.msk.f32.gmra.mxu1 %vm959_vm1, %v2862_v31 }
 0x2e8   : > { %v3029_v44 = vadd.f32 %v3028_v13, %v5245_v40 }
 0x2ea   : > { %3092 = vst [vmem:[%s5723_s12 + $0x80] sm:$0xff] %v3029_v44 }
 0x2ef   : > { %v3031_v7 = vpop.f32.mrf.mxu1 }
 0x2f0   : > { %v3032_v57 = vadd.f32 %v3031_v7, %v4923_v30 }
 0x2f2   : > { %3093 = vst [vmem:[%s5723_s12 + $0x88] sm:$0xff] %v3032_v57 }
 0x2f7   : > { %v3034_v18 = vpop.f32.mrf.mxu1 }
 0x2f8   : > { %v3035_v11 = vadd.f32 %v3034_v18, %v4956_v59 }
 0x2fa   : > { %3094 = vst [vmem:[%s5723_s12 + $0x90] sm:$0xff] %v3035_v11 }
 0x2ff   : > { %v3037_v16 = vpop.f32.mrf.mxu1 }
 0x300   : > { %v3038_v51 = vadd.f32 %v3037_v16, %v4999_v46 }
 0x302   : > { %3095 = vst [vmem:[%s5723_s12 + $0x98] sm:$0xff] %v3038_v51 }
 0x307   : > { %v3040_v45 = vpop.f32.mrf.mxu1 }
 0x308   : > { %v3041_v40 = vadd.f32 %v3040_v45, %v5054_v60 }
 0x30a   : > { %3096 = vst [vmem:[%s5723_s12 + $0xa0] sm:$0xff] %v3041_v40 }
 0x30f   : > { %v3043_v24 = vpop.f32.mrf.mxu1 }
 0x310   : > { %v3044_v30 = vadd.f32 %v3043_v24, %v5106_v43 }
 0x312   : > { %3097 = vst [vmem:[%s5723_s12 + $0xa8] sm:$0xff] %v3044_v30 }
 0x317   : > { %v3046_v49 = vpop.f32.mrf.mxu1 }
 0x318   : > { %v3047_v59 = vadd.f32 %v3046_v49, %v5153_v35 }
 0x31a   : > { %3098 = vst [vmem:[%s5723_s12 + $0xb0] sm:$0xff] %v3047_v59 }
 0x31f   : > { %v3049_v21 = vpop.f32.mrf.mxu1 }
 0x320   : > { %v3050_v46 = vadd.f32 %v3049_v21, %v5197_v58 }
 0x322   : > { %3099 = vst [vmem:[%s5723_s12 + $0xb8] sm:$0xff] %v3050_v46 }
 0x327   : > { %v3052_v23 = vpop.f32.mrf.mxu1 }
 0x328   : > { %v3053_v60 = vadd.f32 %v3052_v23, %v5236_v17 }
 0x32a   : > { %3100 = vst [vmem:[%s5723_s12 + $0xc0] sm:$0xff] %v3053_v60 }
 0x32f   : > { %v3055_v55 = vpop.f32.mrf.mxu1 }
 0x330   : > { %v3056_v43 = vadd.f32 %v3055_v55, %v5282_v8  ;;  %v5905_v8 = vld [vmem:[#allocation14_spill] sm:$0xff] }
 0x332   : > { %3101 = vst [vmem:[%s5723_s12 + $0xc8] sm:$0xff] %v3056_v43 }
 0x337   : > { %v3058_v38 = vpop.f32.mrf.mxu1 }
 0x338   : > { %v3059_v35 = vadd.f32 %v3058_v38, %v5321_v42 }
 0x33a   : > { %3102 = vst [vmem:[%s5723_s12 + $0xd0] sm:$0xff] %v3059_v35 }
 0x33f   : > { %v3061_v52 = vpop.f32.mrf.mxu1 }
 0x340   : > { %v3062_v58 = vadd.f32 %v3061_v52, %v5362_v61  ;;  %v5907_v61 = vld [vmem:[#allocation16_spill] sm:$0xff] }
 0x342   : > { %3103 = vst [vmem:[%s5723_s12 + $0xd8] sm:$0xff] %v3062_v58 }
 0x347   : > { %v3064_v34 = vpop.f32.mrf.mxu1 }
 0x348   : > { %v3065_v17 = vadd.f32 %v3064_v34, %v5904_v63 }
 0x34a   : > { %3104 = vst [vmem:[%s5723_s12 + $0xe0] sm:$0xff] %v3065_v17 }
 0x34f   : > { %v3067_v41 = vpop.f32.mrf.mxu1 }
 0x350   : > { %v3068_v32 = vadd.f32 %v3067_v41, %v5905_v8 }
 0x352   : > { %3105 = vst [vmem:[%s5723_s12 + $0xe8] sm:$0xff] %v3068_v32 }
 0x357   : > { %v3070_v27 = vpop.f32.mrf.mxu1 }
 0x358   : > { %v3071_v62 = vadd.f32 %v3070_v27, %v5906_v48 }
 0x35a   : > { %3106 = vst [vmem:[%s5723_s12 + $0xf0] sm:$0xff] %v3071_v62 }
 0x364   : > { %v3073_v42 = vpop.f32.mrf.mxu1 }
 0x365   : > { %v3074_v53 = vadd.f32 %v3073_v42, %v5907_v61 }
 0x367   : > { %3107 = vst [vmem:[%s5723_s12 + $0xf8] sm:$0xff] %v3074_v53 }
 0x368   : > { %3952 = shalt.err (!%p3949_p4)
}
 0x369   : > { %s3999_s21 = smov 128   ;;  %s4000_s12 = smov 8  }
 0x36a   : > { %3363 = dma.vmem_to_hbm [thread:$0]  (%p4105_p10), %s3122_s11, 4096, %s3124_s15, %s3109_s24, %s3999_s21, %s3999_s21, %s4000_s12  }
 0x36b PF: > { %p3374_p5 = scmp.ge.s32.totalorder %s3991_s16, 2  ;;  %s3138_s29 = sand.u32 1, %s3979_s13  }
 0x36c   : > { %s3139_s23 = scalar_lea.sflag [#allocation5], %s3138_s29 }
 0x36d   : > { %p3370_p7 = pnand %p3374_p5, %p4109_p11 }
 0x36f   : > { %p3371_p8 = pneg %p3370_p7 }
 0x371   : > { %3974 = dma.done.wait (%p3371_p8), %s3139_s23, 4096  }
 0x372   : > { %3976 = vsyncadd (%p3371_p8), %s3139_s23, 4294963200  ;;  %s5909_s16 = sld [smem:[#allocation10_spill]]  ;;  %s5912_s13 = smov %s3983_s14 }
 0x373   : > { %s5910_s30 = sld [smem:[#allocation9_spill]] }
 0x374   : > { %s5911_s15 = sld [smem:[#allocation11_spill]] }
 0x378   : > { %p23_p9 = scmp.ge.s32.totalorder %s5909_s16, 6  }
 0x379   : > { %s5913_s14 = smov %s5910_s30 }
 0x37a   :  { %25 = sbr.rel (!%p23_p9) target bundleno = 5 (0x5), region = 108 }
 0x37f   :  { %3145 = vsyncpa [#allocation4], 1 }
 0x380   :  { %3147 = vsyncpa [#allocation4 + $0x1], 1 }
 0x381   :  { %3148 = vsyncpa [#allocation5], 1 }
 0x382   :  { %3150 = vsyncpa [#allocation5 + $0x1], 1 }

</bundles_post_ra>
